<compile_context>
chip_gen: v7x
topology: tpu7x:2x2x1
jax: 0.10.0
libtpu: 0.0.40
codegen_flags: <defaults>
</compile_context>

<pallas_src>
import functools

import jax
import jax.numpy as jnp
from jax.experimental import pallas as pl
from jax.experimental.pallas import tpu as pltpu

MXU_DTYPE = jnp.bfloat16      # matmul operand dtype (accumulation stays f32)
LEAKY_SLOPE = 0.01
BN_EPS = 1e-5


# ----------------------------------------------------------------------------
# small in-kernel helpers
# ----------------------------------------------------------------------------
def _elu(x):
    # expm1-accurate negative branch without relying on a lax.expm1 lowering:
    # tanh(x/2) * (exp(x) + 1) == exp(x) - 1 (exact), no cancellation for |x|<<1.
    return jnp.where(x > 0, x, jnp.tanh(0.5 * x) * (jnp.exp(x) + 1.0))


def _leaky(x):
    return jnp.where(x >= 0, x, LEAKY_SLOPE * x)


def _row_stats(h):
    # h: [rows, C] f32 -> [1, 2, C] (sum, sum of squares) for BatchNorm stats.
    s = jnp.sum(h, axis=0, keepdims=True)
    ss = jnp.sum(h * h, axis=0, keepdims=True)
    return jnp.concatenate([s, ss], axis=0)[None]


def _causal_dilated_matmul(xp, w_ref, T, K, dilation):
    """xp: [be, T+pad, C] front-padded (bf16); w_ref: [K, C, Cout] (bf16).

    Pre-padded once, static tap slices, chained jnp.dot adds into a single
    f32 accumulator (MRB-friendly on v7x, no per-tap zero concatenation)."""
    be, _, c = xp.shape
    cout = w_ref.shape[-1]
    acc = jnp.zeros((be * T, cout), jnp.float32)
    for k in range(K):                                    # static unroll
        tap = xp[:, k * dilation:k * dilation + T, :].reshape(be * T, c)
        acc = acc + jnp.dot(tap, w_ref[k], preferred_element_type=jnp.float32)
    return acc


# ----------------------------------------------------------------------------
# JAX-side helpers (tile sizing, BatchNorm statistics finalization)
# ----------------------------------------------------------------------------
def _pick_be_tile(be, t, target_rows=512):
    """Tile of edge-sequences so each grid step works on >= ~512 matmul rows."""
    cap = max(1, target_rows // max(t, 1))
    if be <= cap:
        # prefer >=2 grid steps (v7x has two TensorCores) when it costs nothing
        return be // 2 if (be % 2 == 0 and be >= 4) else be
    tile = min(be, cap)
    while be % tile:
        tile -= 1
    return tile


def _pick_m_tile(m, target=1024):
    """Row tile for 2-D [M, C] kernels: multiple of 8 or the full M."""
    if m <= target:
        return m
    t = (target // 8) * 8
    while t >= 8:
        if m % t == 0:
            return t
        t -= 8
    return m


def _stats_to_affine(stats, gamma, beta, count):
    """Reduce per-tile (sum, sumsq) -> BatchNorm scale/shift (training mode)."""
    s = jnp.sum(stats[:, 0, :], axis=0)
    ss = jnp.sum(stats[:, 1, :], axis=0)
    mean = s / count
    var = jnp.maximum(ss / count - mean * mean, 0.0)      # biased variance
    scale = gamma * jax.lax.rsqrt(var + BN_EPS)
    shift = beta - mean * scale
    return scale.reshape(1, -1), shift.reshape(1, -1)


def _parallel(n):
    return pltpu.CompilerParams(dimension_semantics=("parallel",) * n)


# ----------------------------------------------------------------------------
# Kernel A: conv1 + 1x1 skip conv + BN1 partial stats
# ----------------------------------------------------------------------------
def _conv1_skip_kernel(x_ref, w1_ref, b1_ref, wsk_ref, bsk_ref,
                       h1_ref, xskip_ref, st_ref, *, K, dilation):
    be, T, cin = x_ref.shape
    ch = h1_ref.shape[-1]
    pad = (K - 1) * dilation
    x = x_ref[...].astype(MXU_DTYPE)
    xp = jnp.concatenate([jnp.zeros((be, pad, cin), MXU_DTYPE), x], axis=1)
    h1 = _causal_dilated_matmul(xp, w1_ref, T, K, dilation) + b1_ref[...]
    xs = jnp.dot(x.reshape(be * T, cin), wsk_ref[...],
                 preferred_element_type=jnp.float32) + bsk_ref[...]
    h1_ref[...] = h1.reshape(be, T, ch)
    xskip_ref[...] = xs.reshape(be, T, ch)
    st_ref[...] = _row_stats(h1)


def conv1_skip(x, bp, dilation, be_tile):
    BE, T, cin = x.shape
    K, _, ch = bp["w1"].shape
    n_tiles = BE // be_tile
    kern = functools.partial(_conv1_skip_kernel, K=K, dilation=dilation)
    return pl.pallas_call(
        kern,
        out_shape=(jax.ShapeDtypeStruct((BE, T, ch), jnp.float32),
                   jax.ShapeDtypeStruct((BE, T, ch), jnp.float32),
                   jax.ShapeDtypeStruct((n_tiles, 2, ch), jnp.float32)),
        grid=(n_tiles,),
        in_specs=[
            pl.BlockSpec((be_tile, T, cin), lambda i: (i, 0, 0)),
            pl.BlockSpec((K, cin, ch), lambda i: (0, 0, 0)),
            pl.BlockSpec((1, ch), lambda i: (0, 0)),
            pl.BlockSpec((cin, ch), lambda i: (0, 0)),
            pl.BlockSpec((1, ch), lambda i: (0, 0)),
        ],
        out_specs=(pl.BlockSpec((be_tile, T, ch), lambda i: (i, 0, 0)),
                   pl.BlockSpec((be_tile, T, ch), lambda i: (i, 0, 0)),
                   pl.BlockSpec((1, 2, ch), lambda i: (i, 0, 0))),
        compiler_params=_parallel(1),
    )(x.astype(MXU_DTYPE),
      bp["w1"].astype(MXU_DTYPE),
      bp["b1"].reshape(1, ch),
      bp["wskip"].reshape(cin, ch).astype(MXU_DTYPE),
      bp["bskip"].reshape(1, ch))


# ----------------------------------------------------------------------------
# Kernel B: BN1 affine + leaky_relu + conv2 + BN2 partial stats
# ----------------------------------------------------------------------------
def _bnrelu_conv2_kernel(h1_ref, sc_ref, sh_ref, w2_ref, b2_ref,
                         h2_ref, st_ref, *, K, dilation):
    be, T, ch = h1_ref.shape
    pad = (K - 1) * dilation
    a = _leaky(h1_ref[...] * sc_ref[...] + sh_ref[...]).astype(MXU_DTYPE)
    ap = jnp.concatenate([jnp.zeros((be, pad, ch), MXU_DTYPE), a], axis=1)
    h2 = _causal_dilated_matmul(ap, w2_ref, T, K, dilation) + b2_ref[...]
    h2_ref[...] = h2.reshape(be, T, ch)
    st_ref[...] = _row_stats(h2)


def bnrelu_conv2(h1, scale1, shift1, bp, dilation, be_tile):
    BE, T, ch = h1.shape
    K = bp["w2"].shape[0]
    n_tiles = BE // be_tile
    kern = functools.partial(_bnrelu_conv2_kernel, K=K, dilation=dilation)
    return pl.pallas_call(
        kern,
        out_shape=(jax.ShapeDtypeStruct((BE, T, ch), jnp.float32),
                   jax.ShapeDtypeStruct((n_tiles, 2, ch), jnp.float32)),
        grid=(n_tiles,),
        in_specs=[
            pl.BlockSpec((be_tile, T, ch), lambda i: (i, 0, 0)),
            pl.BlockSpec((1, ch), lambda i: (0, 0)),
            pl.BlockSpec((1, ch), lambda i: (0, 0)),
            pl.BlockSpec((K, ch, ch), lambda i: (0, 0, 0)),
            pl.BlockSpec((1, ch), lambda i: (0, 0)),
        ],
        out_specs=(pl.BlockSpec((be_tile, T, ch), lambda i: (i, 0, 0)),
                   pl.BlockSpec((1, 2, ch), lambda i: (i, 0, 0))),
        compiler_params=_parallel(1),
    )(h1, scale1, shift1,
      bp["w2"].astype(MXU_DTYPE),
      bp["b2"].reshape(1, ch))


# ----------------------------------------------------------------------------
# Kernel C: BN2 affine + skip add + leaky_relu + MaxPool1d(2)
#           + fused conv_predict/conv_attention + softmax + weighted mean
# ----------------------------------------------------------------------------
def _finalize_head_kernel(h2_ref, sc_ref, sh_ref, xskip_ref, wpa_ref, bpa_ref,
                          o_ref, *, n_pred):
    be, T, ch = h2_ref.shape
    T2 = T // 2
    y = _leaky(h2_ref[...] * sc_ref[...] + sh_ref[...] + xskip_ref[...])

    # MaxPool1d(kernel=2) without strided sublane gathers: pair each row with
    # its partner via sublane rotations.  Every pooled value then appears
    # exactly twice, which the softmax normalization compensates exactly.
    y_next = jnp.concatenate([y[:, 1:, :], y[:, :1, :]], axis=1)
    y_prev = jnp.concatenate([y[:, T - 1:, :], y[:, :T - 1, :]], axis=1)
    t_idx = jax.lax.broadcasted_iota(jnp.int32, (1, T, 1), 1)
    pooled = jnp.where(t_idx % 2 == 0,
                       jnp.maximum(y, y_next), jnp.maximum(y, y_prev))

    # single matmul for conv_predict (n_pred cols) + conv_attention (1 col)
    z = jnp.dot(pooled.reshape(be * T, ch).astype(MXU_DTYPE), wpa_ref[...],
                preferred_element_type=jnp.float32) + bpa_ref[...]
    z = z.reshape(be, T, n_pred + 1)
    pred = z[:, :, :n_pred]
    lane = jax.lax.broadcasted_iota(jnp.int32, (1, 1, n_pred + 1), 2)
    logit = jnp.sum(jnp.where(lane == n_pred, z, 0.0), axis=2, keepdims=True)
    logit = jnp.where(t_idx < 2 * T2, logit, -1e30)       # drop odd tail row

    m = jnp.max(logit, axis=1, keepdims=True)
    e = jnp.exp(logit - m)
    att = e / jnp.sum(e, axis=1, keepdims=True)           # softmax over time
    o_ref[...] = jnp.sum(pred * att, axis=1, keepdims=True) / float(T2)


def finalize_head(h2, scale2, shift2, xskip, p, be_tile):
    BE, T, ch = h2.shape
    n_pred = p["wp"].shape[1]
    wpa = jnp.concatenate([p["wp"], p["wa"]], axis=1).astype(MXU_DTYPE)
    bpa = jnp.concatenate([p["bp"], p["ba"]]).reshape(1, n_pred + 1)
    n_tiles = BE // be_tile
    kern = functools.partial(_finalize_head_kernel, n_pred=n_pred)
    out = pl.pallas_call(
        kern,
        out_shape=jax.ShapeDtypeStruct((BE, 1, n_pred), jnp.float32),
        grid=(n_tiles,),
        in_specs=[
            pl.BlockSpec((be_tile, T, ch), lambda i: (i, 0, 0)),
            pl.BlockSpec((1, ch), lambda i: (0, 0)),
            pl.BlockSpec((1, ch), lambda i: (0, 0)),
            pl.BlockSpec((be_tile, T, ch), lambda i: (i, 0, 0)),
            pl.BlockSpec((ch, n_pred + 1), lambda i: (0, 0)),
            pl.BlockSpec((1, n_pred + 1), lambda i: (0, 0)),
        ],
        out_specs=pl.BlockSpec((be_tile, 1, n_pred), lambda i: (i, 0, 0)),
        compiler_params=_parallel(1),
    )(h2, scale2, shift2, xskip, wpa, bpa)
    return out.reshape(BE, n_pred)


# ----------------------------------------------------------------------------
# ResCausalCNN: residual blocks + head
# ----------------------------------------------------------------------------
def res_causal_cnn(x, p):
    BE, T, _ = x.shape
    be_tile = _pick_be_tile(BE, T)
    count = BE * T
    depth = len(p["blocks"])
    for i, bp in enumerate(p["blocks"]):
        dilation = 2 ** (2 * i)
        h1, xskip, st1 = conv1_skip(x, bp, dilation, be_tile)
        sc1, sh1 = _stats_to_affine(st1, bp["g1"], bp["be1"], count)
        h2, st2 = bnrelu_conv2(h1, sc1, sh1, bp, dilation * 2, be_tile)
        sc2, sh2 = _stats_to_affine(st2, bp["g2"], bp["be2"], count)
        if i == depth - 1:
            # TODO(synk): F.dropout with do_prob=0.0 is an identity op, skipped.
            return finalize_head(h2, sc2, sh2, xskip, p, be_tile)
        # middle blocks (depth > 1): cheap elementwise finalize in plain JAX
        x = _leaky(h2 * sc2 + sh2 + xskip)


# ----------------------------------------------------------------------------
# Kernel D: fused two-layer MLP (fc1 + ELU + fc2 + ELU) + BN partial stats
# ----------------------------------------------------------------------------
def _mlp_kernel(x_ref, w1_ref, b1_ref, w2_ref, b2_ref, z_ref, st_ref):
    x = x_ref[...].astype(MXU_DTYPE)
    h = _elu(jnp.dot(x, w1_ref[...], preferred_element_type=jnp.float32)
             + b1_ref[...])
    z = _elu(jnp.dot(h.astype(MXU_DTYPE), w2_ref[...],
                     preferred_element_type=jnp.float32) + b2_ref[...])
    z_ref[...] = z
    st_ref[...] = _row_stats(z)


def mlp_fused(x, mp):
    M, nin = x.shape
    H = mp["w1"].shape[1]
    Nout = mp["w2"].shape[1]
    bm = _pick_m_tile(M)
    n_tiles = M // bm
    z, st = pl.pallas_call(
        _mlp_kernel,
        out_shape=(jax.ShapeDtypeStruct((M, Nout), jnp.float32),
                   jax.ShapeDtypeStruct((n_tiles, 2, Nout), jnp.float32)),
        grid=(n_tiles,),
        in_specs=[
            pl.BlockSpec((bm, nin), lambda i: (i, 0)),
            pl.BlockSpec((nin, H), lambda i: (0, 0)),
            pl.BlockSpec((1, H), lambda i: (0, 0)),
            pl.BlockSpec((H, Nout), lambda i: (0, 0)),
            pl.BlockSpec((1, Nout), lambda i: (0, 0)),
        ],
        out_specs=(pl.BlockSpec((bm, Nout), lambda i: (i, 0)),
                   pl.BlockSpec((1, 2, Nout), lambda i: (i, 0, 0))),
        compiler_params=_parallel(1),
    )(x, mp["w1"].astype(MXU_DTYPE), mp["b1"].reshape(1, H),
      mp["w2"].astype(MXU_DTYPE), mp["b2"].reshape(1, Nout))
    scale, shift = _stats_to_affine(st, mp["g"], mp["be"], M)
    return z, scale, shift


def mlp_forward(x, mp):
    # TODO(synk): F.dropout with do_prob=0.0 is an identity op, skipped.
    z, sc, sh = mlp_fused(x, mp)
    return z * sc + sh            # BatchNorm affine (tiny elementwise epilogue)


# ----------------------------------------------------------------------------
# Kernel E: BatchNorm affine fused into the final fc_out matmul
# ----------------------------------------------------------------------------
def _affine_linear_kernel(x_ref, sc_ref, sh_ref, w_ref, b_ref, o_ref):
    x = (x_ref[...] * sc_ref[...] + sh_ref[...]).astype(MXU_DTYPE)
    o_ref[...] = jnp.dot(x, w_ref[...],
                         preferred_element_type=jnp.float32) + b_ref[...]


def affine_linear(x, scale, shift, w, b):
    M, nin = x.shape
    Nout = w.shape[1]
    bm = _pick_m_tile(M)
    return pl.pallas_call(
        _affine_linear_kernel,
        out_shape=jax.ShapeDtypeStruct((M, Nout), jnp.float32),
        grid=(M // bm,),
        in_specs=[
            pl.BlockSpec((bm, nin), lambda i: (i, 0)),
            pl.BlockSpec((1, nin), lambda i: (0, 0)),
            pl.BlockSpec((1, nin), lambda i: (0, 0)),
            pl.BlockSpec((nin, Nout), lambda i: (0, 0)),
            pl.BlockSpec((1, Nout), lambda i: (0, 0)),
        ],
        out_specs=pl.BlockSpec((bm, Nout), lambda i: (i, 0)),
        compiler_params=_parallel(1),
    )(x, scale, shift, w.astype(MXU_DTYPE), b.reshape(1, Nout))


# ----------------------------------------------------------------------------
# Encoder forward (JAX glue for one-hot edge gathers / reshapes)
# ----------------------------------------------------------------------------
def encoder_forward(inputs, rel_rec, rel_send, p):
    # inputs: [B, N, T, D]; rel_rec/rel_send: [E, N] one-hot (E = N*(N-1))
    B, N, T, D = inputs.shape
    E = rel_rec.shape[0]
    x_flat = inputs.reshape(B, N, T * D)
    recv = jnp.einsum("en,bnf->bef", rel_rec, x_flat).reshape(B * E, T, D)
    send = jnp.einsum("en,bnf->bef", rel_send, x_flat).reshape(B * E, T, D)
    # channel order matches torch cat([edge_diffs, senders, receivers], dim=1)
    edges = jnp.concatenate([recv - send, send, recv], axis=-1)     # [BE, T, 3D]

    x = res_causal_cnn(edges, p)                                    # [BE, n_hid]
    n_hid = x.shape[-1]

    x = mlp_forward(x, p["mlp1"])                                   # [BE, n_hid]
    x_skip = x
    x3 = x.reshape(B, E, n_hid)

    # edge2node (factor-graph path): incoming / num_nodes
    node = jnp.einsum("en,beh->bnh", rel_rec, x3) / N
    node = mlp_forward(node.reshape(B * N, n_hid), p["mlp2"]).reshape(B, N, n_hid)

    # node2edge: cat([senders, receivers])
    recv_h = jnp.einsum("en,bnh->beh", rel_rec, node)
    send_h = jnp.einsum("en,bnh->beh", rel_send, node)
    x = jnp.concatenate([send_h, recv_h], axis=-1).reshape(B * E, 2 * n_hid)
    x = jnp.concatenate([x, x_skip], axis=-1)                       # [BE, 3*n_hid]

    z3, sc3, sh3 = mlp_fused(x, p["mlp3"])
    out = affine_linear(z3, sc3, sh3, p["fc_out_w"], p["fc_out_b"])  # BN fused in
    return out.reshape(B, E, -1)


# ----------------------------------------------------------------------------
# Deterministic synthetic parameter initialization (shapes from __init__)
# ----------------------------------------------------------------------------
def init_params(key, n_in, n_hid, n_out, kernel_size=5, depth=1):
    keys = iter(jax.random.split(key, 64))

    def nrm(shape, std):
        return std * jax.random.normal(next(keys), shape, jnp.float32)

    def xavier(fan_in, fan_out):
        std = (2.0 / (fan_in + fan_out)) ** 0.5
        return nrm((fan_in, fan_out), std)

    p = {}
    c_in = n_in * 3
    conv_std = (2.0 / (kernel_size * n_hid)) ** 0.5
    blocks = []
    for i in range(depth):
        ci = c_in if i == 0 else n_hid
        blocks.append(dict(
            w1=nrm((kernel_size, ci, n_hid), conv_std),
            b1=jnp.full((n_hid,), 0.1, jnp.float32),
            w2=nrm((kernel_size, n_hid, n_hid), conv_std),
            b2=jnp.full((n_hid,), 0.1, jnp.float32),
            wskip=nrm((1, ci, n_hid), (2.0 / n_hid) ** 0.5),
            bskip=jnp.full((n_hid,), 0.1, jnp.float32),
            g1=jnp.ones((n_hid,), jnp.float32), be1=jnp.zeros((n_hid,), jnp.float32),
            g2=jnp.ones((n_hid,), jnp.float32), be2=jnp.zeros((n_hid,), jnp.float32),
        ))
    p["blocks"] = blocks
    p["wp"] = nrm((n_hid, n_hid), (2.0 / n_hid) ** 0.5)
    p["bp"] = jnp.full((n_hid,), 0.1, jnp.float32)
    p["wa"] = nrm((n_hid, 1), 2.0 ** 0.5)
    p["ba"] = jnp.full((1,), 0.1, jnp.float32)

    def mlp(nin):
        return dict(w1=xavier(nin, n_hid), b1=jnp.full((n_hid,), 0.1, jnp.float32),
                    w2=xavier(n_hid, n_hid), b2=jnp.full((n_hid,), 0.1, jnp.float32),
                    g=jnp.ones((n_hid,), jnp.float32),
                    be=jnp.zeros((n_hid,), jnp.float32))

    p["mlp1"] = mlp(n_hid)
    p["mlp2"] = mlp(n_hid)
    p["mlp3"] = mlp(n_hid * 3)
    p["fc_out_w"] = xavier(n_hid, n_out)
    p["fc_out_b"] = jnp.full((n_out,), 0.1, jnp.float32)
    return p


if __name__ == "__main__":
    B, N, T, D = 2, 4, 16, 4          # batch, atoms, timesteps, features
    n_hid, n_out = 32, 8

    key = jax.random.PRNGKey(0)
    k_in, k_p = jax.random.split(key)
    inputs = jax.random.normal(k_in, (B, N, T, D), jnp.float32)

    # off-diagonal fully-connected relation graph (standard NRI convention)
    idx_i, idx_j = jnp.nonzero(jnp.ones((N, N)) - jnp.eye(N), size=N * (N - 1))
    rel_rec = jnp.eye(N, dtype=jnp.float32)[idx_i]    # [E, N]
    rel_send = jnp.eye(N, dtype=jnp.float32)[idx_j]   # [E, N]

    params = init_params(k_p, D, n_hid, n_out, kernel_size=5, depth=1)

    out = jax.jit(encoder_forward)(inputs, rel_rec, rel_send, params)
    out = jax.block_until_ready(out)
    assert out.shape == (B, N * (N - 1), n_out), out.shape
    assert bool(jnp.all(jnp.isfinite(out)))
    print("KERNEL_OK")
</pallas_src>

<mosaic_0001>
module attributes {stable_mosaic.version = 11 : i64} {
  func.func @_conv1_skip_kernel(%arg0: i32, %arg1: memref<12x16x12xbf16, #tpu.memory_space<vmem>>, %arg2: memref<5x12x32xbf16, #tpu.memory_space<vmem>>, %arg3: memref<1x32xf32, #tpu.memory_space<vmem>>, %arg4: memref<12x32xbf16, #tpu.memory_space<vmem>>, %arg5: memref<1x32xf32, #tpu.memory_space<vmem>>, %arg6: memref<12x16x32xf32, #tpu.memory_space<vmem>>, %arg7: memref<12x16x32xf32, #tpu.memory_space<vmem>>, %arg8: memref<1x2x32xf32, #tpu.memory_space<vmem>>) attributes {dimension_semantics = [#tpu.dimension_semantics<parallel>], iteration_bounds = array<i64: 2>, scalar_prefetch = 0 : i64, scratch_operands = 0 : i64, tpu.core_type = #tpu.core_type<tc>, window_params = [{transform_indices = @transform_0, window_bounds = array<i64: 12, 16, 12>}, {pipeline_mode = #tpu.pipeline_mode<synchronous>, transform_indices = @transform_1, window_bounds = array<i64: 5, 12, 32>}, {pipeline_mode = #tpu.pipeline_mode<synchronous>, transform_indices = @transform_2, window_bounds = array<i64: 1, 32>}, {pipeline_mode = #tpu.pipeline_mode<synchronous>, transform_indices = @transform_3, window_bounds = array<i64: 12, 32>}, {pipeline_mode = #tpu.pipeline_mode<synchronous>, transform_indices = @transform_4, window_bounds = array<i64: 1, 32>}, {transform_indices = @transform_5, window_bounds = array<i64: 12, 16, 32>}, {transform_indices = @transform_6, window_bounds = array<i64: 12, 16, 32>}, {transform_indices = @transform_7, window_bounds = array<i64: 1, 2, 32>}]} {
    %c0 = arith.constant 0 : index
    %c0_0 = arith.constant 0 : index
    %c0_1 = arith.constant 0 : index
    %0 = vector.load %arg1[%c0, %c0_0, %c0_1] : memref<12x16x12xbf16, #tpu.memory_space<vmem>>, vector<12x16x12xbf16>
    %cst = arith.constant 0.000000e+00 : bf16
    %1 = vector.broadcast %cst : bf16 to vector<12x4x12xbf16>
    %2 = tpu.concatenate %1, %0 in 1 : vector<12x4x12xbf16>, vector<12x16x12xbf16> -> vector<12x20x12xbf16>
    %cst_2 = arith.constant 0.000000e+00 : f32
    %3 = vector.broadcast %cst_2 : f32 to vector<192x32xf32>
    %4 = vector.extract_strided_slice %2 {offsets = [0, 0, 0], sizes = [12, 16, 12], strides = [1, 1, 1]} : vector<12x20x12xbf16> to vector<12x16x12xbf16>
    %5 = vector.shape_cast %4 : vector<12x16x12xbf16> to vector<192x12xbf16>
    %c0_3 = arith.constant 0 : index
    %c0_4 = arith.constant 0 : index
    %c0_5 = arith.constant 0 : index
    %6 = vector.load %arg2[%c0_3, %c0_4, %c0_5] : memref<5x12x32xbf16, #tpu.memory_space<vmem>>, vector<1x12x32xbf16>
    %7 = vector.shape_cast %6 : vector<1x12x32xbf16> to vector<12x32xbf16>
    %cst_6 = arith.constant dense<0.000000e+00> : vector<192x32xf32>
    %8 = tpu.matmul %5, %7, %cst_6 {dimension_numbers = #tpu.dot_dimension_numbers<[1], [0], [0], [1], [0, 0, 1, 1], [], []>} : vector<192x12xbf16>, vector<12x32xbf16>, vector<192x32xf32> -> vector<192x32xf32>
    %9 = arith.addf %3, %8 : vector<192x32xf32>
    %10 = vector.extract_strided_slice %2 {offsets = [0, 1, 0], sizes = [12, 16, 12], strides = [1, 1, 1]} : vector<12x20x12xbf16> to vector<12x16x12xbf16>
    %11 = vector.shape_cast %10 : vector<12x16x12xbf16> to vector<192x12xbf16>
    %c1 = arith.constant 1 : index
    %c0_7 = arith.constant 0 : index
    %c0_8 = arith.constant 0 : index
    %12 = vector.load %arg2[%c1, %c0_7, %c0_8] : memref<5x12x32xbf16, #tpu.memory_space<vmem>>, vector<1x12x32xbf16>
    %13 = vector.shape_cast %12 : vector<1x12x32xbf16> to vector<12x32xbf16>
    %cst_9 = arith.constant dense<0.000000e+00> : vector<192x32xf32>
    %14 = tpu.matmul %11, %13, %cst_9 {dimension_numbers = #tpu.dot_dimension_numbers<[1], [0], [0], [1], [0, 0, 1, 1], [], []>} : vector<192x12xbf16>, vector<12x32xbf16>, vector<192x32xf32> -> vector<192x32xf32>
    %15 = arith.addf %9, %14 : vector<192x32xf32>
    %16 = vector.extract_strided_slice %2 {offsets = [0, 2, 0], sizes = [12, 16, 12], strides = [1, 1, 1]} : vector<12x20x12xbf16> to vector<12x16x12xbf16>
    %17 = vector.shape_cast %16 : vector<12x16x12xbf16> to vector<192x12xbf16>
    %c2 = arith.constant 2 : index
    %c0_10 = arith.constant 0 : index
    %c0_11 = arith.constant 0 : index
    %18 = vector.load %arg2[%c2, %c0_10, %c0_11] : memref<5x12x32xbf16, #tpu.memory_space<vmem>>, vector<1x12x32xbf16>
    %19 = vector.shape_cast %18 : vector<1x12x32xbf16> to vector<12x32xbf16>
    %cst_12 = arith.constant dense<0.000000e+00> : vector<192x32xf32>
    %20 = tpu.matmul %17, %19, %cst_12 {dimension_numbers = #tpu.dot_dimension_numbers<[1], [0], [0], [1], [0, 0, 1, 1], [], []>} : vector<192x12xbf16>, vector<12x32xbf16>, vector<192x32xf32> -> vector<192x32xf32>
    %21 = arith.addf %15, %20 : vector<192x32xf32>
    %22 = vector.extract_strided_slice %2 {offsets = [0, 3, 0], sizes = [12, 16, 12], strides = [1, 1, 1]} : vector<12x20x12xbf16> to vector<12x16x12xbf16>
    %23 = vector.shape_cast %22 : vector<12x16x12xbf16> to vector<192x12xbf16>
    %c3 = arith.constant 3 : index
    %c0_13 = arith.constant 0 : index
    %c0_14 = arith.constant 0 : index
    %24 = vector.load %arg2[%c3, %c0_13, %c0_14] : memref<5x12x32xbf16, #tpu.memory_space<vmem>>, vector<1x12x32xbf16>
    %25 = vector.shape_cast %24 : vector<1x12x32xbf16> to vector<12x32xbf16>
    %cst_15 = arith.constant dense<0.000000e+00> : vector<192x32xf32>
    %26 = tpu.matmul %23, %25, %cst_15 {dimension_numbers = #tpu.dot_dimension_numbers<[1], [0], [0], [1], [0, 0, 1, 1], [], []>} : vector<192x12xbf16>, vector<12x32xbf16>, vector<192x32xf32> -> vector<192x32xf32>
    %27 = arith.addf %21, %26 : vector<192x32xf32>
    %28 = vector.extract_strided_slice %2 {offsets = [0, 4, 0], sizes = [12, 16, 12], strides = [1, 1, 1]} : vector<12x20x12xbf16> to vector<12x16x12xbf16>
    %29 = vector.shape_cast %28 : vector<12x16x12xbf16> to vector<192x12xbf16>
    %c4 = arith.constant 4 : index
    %c0_16 = arith.constant 0 : index
    %c0_17 = arith.constant 0 : index
    %30 = vector.load %arg2[%c4, %c0_16, %c0_17] : memref<5x12x32xbf16, #tpu.memory_space<vmem>>, vector<1x12x32xbf16>
    %31 = vector.shape_cast %30 : vector<1x12x32xbf16> to vector<12x32xbf16>
    %cst_18 = arith.constant dense<0.000000e+00> : vector<192x32xf32>
    %32 = tpu.matmul %29, %31, %cst_18 {dimension_numbers = #tpu.dot_dimension_numbers<[1], [0], [0], [1], [0, 0, 1, 1], [], []>} : vector<192x12xbf16>, vector<12x32xbf16>, vector<192x32xf32> -> vector<192x32xf32>
    %33 = arith.addf %27, %32 : vector<192x32xf32>
    %c0_19 = arith.constant 0 : index
    %c0_20 = arith.constant 0 : index
    %34 = vector.load %arg3[%c0_19, %c0_20] : memref<1x32xf32, #tpu.memory_space<vmem>>, vector<1x32xf32>
    %35 = vector.broadcast %34 : vector<1x32xf32> to vector<192x32xf32>
    %36 = arith.addf %33, %35 : vector<192x32xf32>
    %37 = vector.shape_cast %0 : vector<12x16x12xbf16> to vector<192x12xbf16>
    %c0_21 = arith.constant 0 : index
    %c0_22 = arith.constant 0 : index
    %38 = vector.load %arg4[%c0_21, %c0_22] : memref<12x32xbf16, #tpu.memory_space<vmem>>, vector<12x32xbf16>
    %cst_23 = arith.constant dense<0.000000e+00> : vector<192x32xf32>
    %39 = tpu.matmul %37, %38, %cst_23 {dimension_numbers = #tpu.dot_dimension_numbers<[1], [0], [0], [1], [0, 0, 1, 1], [], []>} : vector<192x12xbf16>, vector<12x32xbf16>, vector<192x32xf32> -> vector<192x32xf32>
    %c0_24 = arith.constant 0 : index
    %c0_25 = arith.constant 0 : index
    %40 = vector.load %arg5[%c0_24, %c0_25] : memref<1x32xf32, #tpu.memory_space<vmem>>, vector<1x32xf32>
    %41 = vector.broadcast %40 : vector<1x32xf32> to vector<192x32xf32>
    %42 = arith.addf %39, %41 : vector<192x32xf32>
    %43 = vector.shape_cast %36 : vector<192x32xf32> to vector<12x16x32xf32>
    %c0_26 = arith.constant 0 : index
    %c0_27 = arith.constant 0 : index
    %c0_28 = arith.constant 0 : index
    %44 = vector.load %arg6[%c0_26, %c0_27, %c0_28] : memref<12x16x32xf32, #tpu.memory_space<vmem>>, vector<12x16x32xf32>
    tpu.vector_store %arg6[%c0_26, %c0_27, %c0_28], %43 {strides = array<i32>} : memref<12x16x32xf32, #tpu.memory_space<vmem>>, vector<12x16x32xf32>,
    %45 = vector.shape_cast %42 : vector<192x32xf32> to vector<12x16x32xf32>
    %c0_29 = arith.constant 0 : index
    %c0_30 = arith.constant 0 : index
    %c0_31 = arith.constant 0 : index
    %46 = vector.load %arg7[%c0_29, %c0_30, %c0_31] : memref<12x16x32xf32, #tpu.memory_space<vmem>>, vector<12x16x32xf32>
    tpu.vector_store %arg7[%c0_29, %c0_30, %c0_31], %45 {strides = array<i32>} : memref<12x16x32xf32, #tpu.memory_space<vmem>>, vector<12x16x32xf32>,
    %cst_32 = arith.constant dense<0.000000e+00> : vector<32xf32>
    %47 = vector.multi_reduction <add>, %36, %cst_32 [0] : vector<192x32xf32> to vector<32xf32>
    %48 = vector.shape_cast %47 : vector<32xf32> to vector<1x32xf32>
    %49 = arith.mulf %36, %36 : vector<192x32xf32>
    %cst_33 = arith.constant dense<0.000000e+00> : vector<32xf32>
    %50 = vector.multi_reduction <add>, %49, %cst_33 [0] : vector<192x32xf32> to vector<32xf32>
    %51 = vector.shape_cast %50 : vector<32xf32> to vector<1x32xf32>
    %52 = tpu.concatenate %48, %51 in 0 : vector<1x32xf32>, vector<1x32xf32> -> vector<2x32xf32>
    %53 = vector.shape_cast %52 : vector<2x32xf32> to vector<1x2x32xf32>
    %c0_34 = arith.constant 0 : index
    %c0_35 = arith.constant 0 : index
    %c0_36 = arith.constant 0 : index
    %54 = vector.load %arg8[%c0_34, %c0_35, %c0_36] : memref<1x2x32xf32, #tpu.memory_space<vmem>>, vector<1x2x32xf32>
    tpu.vector_store %arg8[%c0_34, %c0_35, %c0_36], %53 {strides = array<i32>} : memref<1x2x32xf32, #tpu.memory_space<vmem>>, vector<1x2x32xf32>,
    return
  }
  func.func @transform_0(%arg0: i32) -> (i32, i32, i32) {
    %c0_i32 = arith.constant 0 : i32
    %c0_i32_0 = arith.constant 0 : i32
    %c0_i32_1 = arith.constant 0 : i32
    return %arg0, %c0_i32, %c0_i32_0 : i32, i32, i32
  }
  func.func @transform_1(%arg0: i32) -> (i32, i32, i32) {
    %c0_i32 = arith.constant 0 : i32
    %c0_i32_0 = arith.constant 0 : i32
    %c0_i32_1 = arith.constant 0 : i32
    %c0_i32_2 = arith.constant 0 : i32
    return %c0_i32, %c0_i32_0, %c0_i32_1 : i32, i32, i32
  }
  func.func @transform_2(%arg0: i32) -> (i32, i32) {
    %c0_i32 = arith.constant 0 : i32
    %c0_i32_0 = arith.constant 0 : i32
    %c0_i32_1 = arith.constant 0 : i32
    return %c0_i32, %c0_i32_0 : i32, i32
  }
  func.func @transform_3(%arg0: i32) -> (i32, i32) {
    %c0_i32 = arith.constant 0 : i32
    %c0_i32_0 = arith.constant 0 : i32
    %c0_i32_1 = arith.constant 0 : i32
    return %c0_i32, %c0_i32_0 : i32, i32
  }
  func.func @transform_4(%arg0: i32) -> (i32, i32) {
    %c0_i32 = arith.constant 0 : i32
    %c0_i32_0 = arith.constant 0 : i32
    %c0_i32_1 = arith.constant 0 : i32
    return %c0_i32, %c0_i32_0 : i32, i32
  }
  func.func @transform_5(%arg0: i32) -> (i32, i32, i32) {
    %c0_i32 = arith.constant 0 : i32
    %c0_i32_0 = arith.constant 0 : i32
    %c0_i32_1 = arith.constant 0 : i32
    return %arg0, %c0_i32, %c0_i32_0 : i32, i32, i32
  }
  func.func @transform_6(%arg0: i32) -> (i32, i32, i32) {
    %c0_i32 = arith.constant 0 : i32
    %c0_i32_0 = arith.constant 0 : i32
    %c0_i32_1 = arith.constant 0 : i32
    return %arg0, %c0_i32, %c0_i32_0 : i32, i32, i32
  }
  func.func @transform_7(%arg0: i32) -> (i32, i32, i32) {
    %c0_i32 = arith.constant 0 : i32
    %c0_i32_0 = arith.constant 0 : i32
    %c0_i32_1 = arith.constant 0 : i32
    return %arg0, %c0_i32, %c0_i32_0 : i32, i32, i32
  }
}

module attributes {stable_mosaic.version = 11 : i64} {
  func.func @_bnrelu_conv2_kernel(%arg0: i32, %arg1: memref<12x16x32xf32, #tpu.memory_space<vmem>>, %arg2: memref<1x32xf32, #tpu.memory_space<vmem>>, %arg3: memref<1x32xf32, #tpu.memory_space<vmem>>, %arg4: memref<5x32x32xbf16, #tpu.memory_space<vmem>>, %arg5: memref<1x32xf32, #tpu.memory_space<vmem>>, %arg6: memref<12x16x32xf32, #tpu.memory_space<vmem>>, %arg7: memref<1x2x32xf32, #tpu.memory_space<vmem>>) attributes {dimension_semantics = [#tpu.dimension_semantics<parallel>], iteration_bounds = array<i64: 2>, scalar_prefetch = 0 : i64, scratch_operands = 0 : i64, tpu.core_type = #tpu.core_type<tc>, window_params = [{transform_indices = @transform_0, window_bounds = array<i64: 12, 16, 32>}, {pipeline_mode = #tpu.pipeline_mode<synchronous>, transform_indices = @transform_1, window_bounds = array<i64: 1, 32>}, {pipeline_mode = #tpu.pipeline_mode<synchronous>, transform_indices = @transform_2, window_bounds = array<i64: 1, 32>}, {pipeline_mode = #tpu.pipeline_mode<synchronous>, transform_indices = @transform_3, window_bounds = array<i64: 5, 32, 32>}, {pipeline_mode = #tpu.pipeline_mode<synchronous>, transform_indices = @transform_4, window_bounds = array<i64: 1, 32>}, {transform_indices = @transform_5, window_bounds = array<i64: 12, 16, 32>}, {transform_indices = @transform_6, window_bounds = array<i64: 1, 2, 32>}]} {
    %c0 = arith.constant 0 : index
    %c0_0 = arith.constant 0 : index
    %c0_1 = arith.constant 0 : index
    %0 = vector.load %arg1[%c0, %c0_0, %c0_1] : memref<12x16x32xf32, #tpu.memory_space<vmem>>, vector<12x16x32xf32>
    %c0_2 = arith.constant 0 : index
    %c0_3 = arith.constant 0 : index
    %1 = vector.load %arg2[%c0_2, %c0_3] : memref<1x32xf32, #tpu.memory_space<vmem>>, vector<1x32xf32>
    %2 = vector.shape_cast %1 : vector<1x32xf32> to vector<1x1x32xf32>
    %3 = vector.broadcast %2 : vector<1x1x32xf32> to vector<12x16x32xf32>
    %4 = arith.mulf %0, %3 : vector<12x16x32xf32>
    %c0_4 = arith.constant 0 : index
    %c0_5 = arith.constant 0 : index
    %5 = vector.load %arg3[%c0_4, %c0_5] : memref<1x32xf32, #tpu.memory_space<vmem>>, vector<1x32xf32>
    %6 = vector.shape_cast %5 : vector<1x32xf32> to vector<1x1x32xf32>
    %7 = vector.broadcast %6 : vector<1x1x32xf32> to vector<12x16x32xf32>
    %8 = arith.addf %4, %7 : vector<12x16x32xf32>
    %cst = arith.constant 0.000000e+00 : f32
    %9 = vector.broadcast %cst : f32 to vector<12x16x32xf32>
    %10 = arith.cmpf oge, %8, %9 : vector<12x16x32xf32>
    %cst_6 = arith.constant 0.00999999977 : f32
    %11 = vector.broadcast %cst_6 : f32 to vector<12x16x32xf32>
    %12 = arith.mulf %11, %8 : vector<12x16x32xf32>
    %13 = arith.select %10, %8, %12 : vector<12x16x32xi1>, vector<12x16x32xf32>
    %14 = arith.truncf %13 : vector<12x16x32xf32> to vector<12x16x32xbf16>
    %cst_7 = arith.constant 0.000000e+00 : bf16
    %15 = vector.broadcast %cst_7 : bf16 to vector<12x8x32xbf16>
    %16 = tpu.concatenate %15, %14 in 1 : vector<12x8x32xbf16>, vector<12x16x32xbf16> -> vector<12x24x32xbf16>
    %cst_8 = arith.constant 0.000000e+00 : f32
    %17 = vector.broadcast %cst_8 : f32 to vector<192x32xf32>
    %18 = vector.extract_strided_slice %16 {offsets = [0, 0, 0], sizes = [12, 16, 32], strides = [1, 1, 1]} : vector<12x24x32xbf16> to vector<12x16x32xbf16>
    %19 = vector.shape_cast %18 : vector<12x16x32xbf16> to vector<192x32xbf16>
    %c0_9 = arith.constant 0 : index
    %c0_10 = arith.constant 0 : index
    %c0_11 = arith.constant 0 : index
    %20 = vector.load %arg4[%c0_9, %c0_10, %c0_11] : memref<5x32x32xbf16, #tpu.memory_space<vmem>>, vector<1x32x32xbf16>
    %21 = vector.shape_cast %20 : vector<1x32x32xbf16> to vector<32x32xbf16>
    %cst_12 = arith.constant dense<0.000000e+00> : vector<192x32xf32>
    %22 = tpu.matmul %19, %21, %cst_12 {dimension_numbers = #tpu.dot_dimension_numbers<[1], [0], [0], [1], [0, 0, 1, 1], [], []>} : vector<192x32xbf16>, vector<32x32xbf16>, vector<192x32xf32> -> vector<192x32xf32>
    %23 = arith.addf %17, %22 : vector<192x32xf32>
    %24 = vector.extract_strided_slice %16 {offsets = [0, 2, 0], sizes = [12, 16, 32], strides = [1, 1, 1]} : vector<12x24x32xbf16> to vector<12x16x32xbf16>
    %25 = vector.shape_cast %24 : vector<12x16x32xbf16> to vector<192x32xbf16>
    %c1 = arith.constant 1 : index
    %c0_13 = arith.constant 0 : index
    %c0_14 = arith.constant 0 : index
    %26 = vector.load %arg4[%c1, %c0_13, %c0_14] : memref<5x32x32xbf16, #tpu.memory_space<vmem>>, vector<1x32x32xbf16>
    %27 = vector.shape_cast %26 : vector<1x32x32xbf16> to vector<32x32xbf16>
    %cst_15 = arith.constant dense<0.000000e+00> : vector<192x32xf32>
    %28 = tpu.matmul %25, %27, %cst_15 {dimension_numbers = #tpu.dot_dimension_numbers<[1], [0], [0], [1], [0, 0, 1, 1], [], []>} : vector<192x32xbf16>, vector<32x32xbf16>, vector<192x32xf32> -> vector<192x32xf32>
    %29 = arith.addf %23, %28 : vector<192x32xf32>
    %30 = vector.extract_strided_slice %16 {offsets = [0, 4, 0], sizes = [12, 16, 32], strides = [1, 1, 1]} : vector<12x24x32xbf16> to vector<12x16x32xbf16>
    %31 = vector.shape_cast %30 : vector<12x16x32xbf16> to vector<192x32xbf16>
    %c2 = arith.constant 2 : index
    %c0_16 = arith.constant 0 : index
    %c0_17 = arith.constant 0 : index
    %32 = vector.load %arg4[%c2, %c0_16, %c0_17] : memref<5x32x32xbf16, #tpu.memory_space<vmem>>, vector<1x32x32xbf16>
    %33 = vector.shape_cast %32 : vector<1x32x32xbf16> to vector<32x32xbf16>
    %cst_18 = arith.constant dense<0.000000e+00> : vector<192x32xf32>
    %34 = tpu.matmul %31, %33, %cst_18 {dimension_numbers = #tpu.dot_dimension_numbers<[1], [0], [0], [1], [0, 0, 1, 1], [], []>} : vector<192x32xbf16>, vector<32x32xbf16>, vector<192x32xf32> -> vector<192x32xf32>
    %35 = arith.addf %29, %34 : vector<192x32xf32>
    %36 = vector.extract_strided_slice %16 {offsets = [0, 6, 0], sizes = [12, 16, 32], strides = [1, 1, 1]} : vector<12x24x32xbf16> to vector<12x16x32xbf16>
    %37 = vector.shape_cast %36 : vector<12x16x32xbf16> to vector<192x32xbf16>
    %c3 = arith.constant 3 : index
    %c0_19 = arith.constant 0 : index
    %c0_20 = arith.constant 0 : index
    %38 = vector.load %arg4[%c3, %c0_19, %c0_20] : memref<5x32x32xbf16, #tpu.memory_space<vmem>>, vector<1x32x32xbf16>
    %39 = vector.shape_cast %38 : vector<1x32x32xbf16> to vector<32x32xbf16>
    %cst_21 = arith.constant dense<0.000000e+00> : vector<192x32xf32>
    %40 = tpu.matmul %37, %39, %cst_21 {dimension_numbers = #tpu.dot_dimension_numbers<[1], [0], [0], [1], [0, 0, 1, 1], [], []>} : vector<192x32xbf16>, vector<32x32xbf16>, vector<192x32xf32> -> vector<192x32xf32>
    %41 = arith.addf %35, %40 : vector<192x32xf32>
    %42 = vector.extract_strided_slice %16 {offsets = [0, 8, 0], sizes = [12, 16, 32], strides = [1, 1, 1]} : vector<12x24x32xbf16> to vector<12x16x32xbf16>
    %43 = vector.shape_cast %42 : vector<12x16x32xbf16> to vector<192x32xbf16>
    %c4 = arith.constant 4 : index
    %c0_22 = arith.constant 0 : index
    %c0_23 = arith.constant 0 : index
    %44 = vector.load %arg4[%c4, %c0_22, %c0_23] : memref<5x32x32xbf16, #tpu.memory_space<vmem>>, vector<1x32x32xbf16>
    %45 = vector.shape_cast %44 : vector<1x32x32xbf16> to vector<32x32xbf16>
    %cst_24 = arith.constant dense<0.000000e+00> : vector<192x32xf32>
    %46 = tpu.matmul %43, %45, %cst_24 {dimension_numbers = #tpu.dot_dimension_numbers<[1], [0], [0], [1], [0, 0, 1, 1], [], []>} : vector<192x32xbf16>, vector<32x32xbf16>, vector<192x32xf32> -> vector<192x32xf32>
    %47 = arith.addf %41, %46 : vector<192x32xf32>
    %c0_25 = arith.constant 0 : index
    %c0_26 = arith.constant 0 : index
    %48 = vector.load %arg5[%c0_25, %c0_26] : memref<1x32xf32, #tpu.memory_space<vmem>>, vector<1x32xf32>
    %49 = vector.broadcast %48 : vector<1x32xf32> to vector<192x32xf32>
    %50 = arith.addf %47, %49 : vector<192x32xf32>
    %51 = vector.shape_cast %50 : vector<192x32xf32> to vector<12x16x32xf32>
    %c0_27 = arith.constant 0 : index
    %c0_28 = arith.constant 0 : index
    %c0_29 = arith.constant 0 : index
    %52 = vector.load %arg6[%c0_27, %c0_28, %c0_29] : memref<12x16x32xf32, #tpu.memory_space<vmem>>, vector<12x16x32xf32>
    tpu.vector_store %arg6[%c0_27, %c0_28, %c0_29], %51 {strides = array<i32>} : memref<12x16x32xf32, #tpu.memory_space<vmem>>, vector<12x16x32xf32>,
    %cst_30 = arith.constant dense<0.000000e+00> : vector<32xf32>
    %53 = vector.multi_reduction <add>, %50, %cst_30 [0] : vector<192x32xf32> to vector<32xf32>
    %54 = vector.shape_cast %53 : vector<32xf32> to vector<1x32xf32>
    %55 = arith.mulf %50, %50 : vector<192x32xf32>
    %cst_31 = arith.constant dense<0.000000e+00> : vector<32xf32>
    %56 = vector.multi_reduction <add>, %55, %cst_31 [0] : vector<192x32xf32> to vector<32xf32>
    %57 = vector.shape_cast %56 : vector<32xf32> to vector<1x32xf32>
    %58 = tpu.concatenate %54, %57 in 0 : vector<1x32xf32>, vector<1x32xf32> -> vector<2x32xf32>
    %59 = vector.shape_cast %58 : vector<2x32xf32> to vector<1x2x32xf32>
    %c0_32 = arith.constant 0 : index
    %c0_33 = arith.constant 0 : index
    %c0_34 = arith.constant 0 : index
    %60 = vector.load %arg7[%c0_32, %c0_33, %c0_34] : memref<1x2x32xf32, #tpu.memory_space<vmem>>, vector<1x2x32xf32>
    tpu.vector_store %arg7[%c0_32, %c0_33, %c0_34], %59 {strides = array<i32>} : memref<1x2x32xf32, #tpu.memory_space<vmem>>, vector<1x2x32xf32>,
    return
  }
  func.func @transform_0(%arg0: i32) -> (i32, i32, i32) {
    %c0_i32 = arith.constant 0 : i32
    %c0_i32_0 = arith.constant 0 : i32
    %c0_i32_1 = arith.constant 0 : i32
    return %arg0, %c0_i32, %c0_i32_0 : i32, i32, i32
  }
  func.func @transform_1(%arg0: i32) -> (i32, i32) {
    %c0_i32 = arith.constant 0 : i32
    %c0_i32_0 = arith.constant 0 : i32
    %c0_i32_1 = arith.constant 0 : i32
    return %c0_i32, %c0_i32_0 : i32, i32
  }
  func.func @transform_2(%arg0: i32) -> (i32, i32) {
    %c0_i32 = arith.constant 0 : i32
    %c0_i32_0 = arith.constant 0 : i32
    %c0_i32_1 = arith.constant 0 : i32
    return %c0_i32, %c0_i32_0 : i32, i32
  }
  func.func @transform_3(%arg0: i32) -> (i32, i32, i32) {
    %c0_i32 = arith.constant 0 : i32
    %c0_i32_0 = arith.constant 0 : i32
    %c0_i32_1 = arith.constant 0 : i32
    %c0_i32_2 = arith.constant 0 : i32
    return %c0_i32, %c0_i32_0, %c0_i32_1 : i32, i32, i32
  }
  func.func @transform_4(%arg0: i32) -> (i32, i32) {
    %c0_i32 = arith.constant 0 : i32
    %c0_i32_0 = arith.constant 0 : i32
    %c0_i32_1 = arith.constant 0 : i32
    return %c0_i32, %c0_i32_0 : i32, i32
  }
  func.func @transform_5(%arg0: i32) -> (i32, i32, i32) {
    %c0_i32 = arith.constant 0 : i32
    %c0_i32_0 = arith.constant 0 : i32
    %c0_i32_1 = arith.constant 0 : i32
    return %arg0, %c0_i32, %c0_i32_0 : i32, i32, i32
  }
  func.func @transform_6(%arg0: i32) -> (i32, i32, i32) {
    %c0_i32 = arith.constant 0 : i32
    %c0_i32_0 = arith.constant 0 : i32
    %c0_i32_1 = arith.constant 0 : i32
    return %arg0, %c0_i32, %c0_i32_0 : i32, i32, i32
  }
}

module attributes {stable_mosaic.version = 11 : i64} {
  func.func @_finalize_head_kernel(%arg0: i32, %arg1: memref<12x16x32xf32, #tpu.memory_space<vmem>>, %arg2: memref<1x32xf32, #tpu.memory_space<vmem>>, %arg3: memref<1x32xf32, #tpu.memory_space<vmem>>, %arg4: memref<12x16x32xf32, #tpu.memory_space<vmem>>, %arg5: memref<32x33xbf16, #tpu.memory_space<vmem>>, %arg6: memref<1x33xf32, #tpu.memory_space<vmem>>, %arg7: memref<12x1x32xf32, #tpu.memory_space<vmem>>) attributes {dimension_semantics = [#tpu.dimension_semantics<parallel>], iteration_bounds = array<i64: 2>, scalar_prefetch = 0 : i64, scratch_operands = 0 : i64, tpu.core_type = #tpu.core_type<tc>, window_params = [{transform_indices = @transform_0, window_bounds = array<i64: 12, 16, 32>}, {pipeline_mode = #tpu.pipeline_mode<synchronous>, transform_indices = @transform_1, window_bounds = array<i64: 1, 32>}, {pipeline_mode = #tpu.pipeline_mode<synchronous>, transform_indices = @transform_2, window_bounds = array<i64: 1, 32>}, {transform_indices = @transform_3, window_bounds = array<i64: 12, 16, 32>}, {pipeline_mode = #tpu.pipeline_mode<synchronous>, transform_indices = @transform_4, window_bounds = array<i64: 32, 33>}, {pipeline_mode = #tpu.pipeline_mode<synchronous>, transform_indices = @transform_5, window_bounds = array<i64: 1, 33>}, {transform_indices = @transform_6, window_bounds = array<i64: 12, 1, 32>}]} {
    %c0 = arith.constant 0 : index
    %c0_0 = arith.constant 0 : index
    %c0_1 = arith.constant 0 : index
    %0 = vector.load %arg1[%c0, %c0_0, %c0_1] : memref<12x16x32xf32, #tpu.memory_space<vmem>>, vector<12x16x32xf32>
    %c0_2 = arith.constant 0 : index
    %c0_3 = arith.constant 0 : index
    %1 = vector.load %arg2[%c0_2, %c0_3] : memref<1x32xf32, #tpu.memory_space<vmem>>, vector<1x32xf32>
    %2 = vector.shape_cast %1 : vector<1x32xf32> to vector<1x1x32xf32>
    %3 = vector.broadcast %2 : vector<1x1x32xf32> to vector<12x16x32xf32>
    %4 = arith.mulf %0, %3 : vector<12x16x32xf32>
    %c0_4 = arith.constant 0 : index
    %c0_5 = arith.constant 0 : index
    %5 = vector.load %arg3[%c0_4, %c0_5] : memref<1x32xf32, #tpu.memory_space<vmem>>, vector<1x32xf32>
    %6 = vector.shape_cast %5 : vector<1x32xf32> to vector<1x1x32xf32>
    %7 = vector.broadcast %6 : vector<1x1x32xf32> to vector<12x16x32xf32>
    %8 = arith.addf %4, %7 : vector<12x16x32xf32>
    %c0_6 = arith.constant 0 : index
    %c0_7 = arith.constant 0 : index
    %c0_8 = arith.constant 0 : index
    %9 = vector.load %arg4[%c0_6, %c0_7, %c0_8] : memref<12x16x32xf32, #tpu.memory_space<vmem>>, vector<12x16x32xf32>
    %10 = arith.addf %8, %9 : vector<12x16x32xf32>
    %cst = arith.constant 0.000000e+00 : f32
    %11 = vector.broadcast %cst : f32 to vector<12x16x32xf32>
    %12 = arith.cmpf oge, %10, %11 : vector<12x16x32xf32>
    %cst_9 = arith.constant 0.00999999977 : f32
    %13 = vector.broadcast %cst_9 : f32 to vector<12x16x32xf32>
    %14 = arith.mulf %13, %10 : vector<12x16x32xf32>
    %15 = arith.select %12, %10, %14 : vector<12x16x32xi1>, vector<12x16x32xf32>
    %16 = vector.extract_strided_slice %15 {offsets = [0, 1, 0], sizes = [12, 15, 32], strides = [1, 1, 1]} : vector<12x16x32xf32> to vector<12x15x32xf32>
    %17 = vector.extract_strided_slice %15 {offsets = [0, 0, 0], sizes = [12, 1, 32], strides = [1, 1, 1]} : vector<12x16x32xf32> to vector<12x1x32xf32>
    %18 = tpu.concatenate %16, %17 in 1 : vector<12x15x32xf32>, vector<12x1x32xf32> -> vector<12x16x32xf32>
    %19 = vector.extract_strided_slice %15 {offsets = [0, 15, 0], sizes = [12, 1, 32], strides = [1, 1, 1]} : vector<12x16x32xf32> to vector<12x1x32xf32>
    %20 = vector.extract_strided_slice %15 {offsets = [0, 0, 0], sizes = [12, 15, 32], strides = [1, 1, 1]} : vector<12x16x32xf32> to vector<12x15x32xf32>
    %21 = tpu.concatenate %19, %20 in 1 : vector<12x1x32xf32>, vector<12x15x32xf32> -> vector<12x16x32xf32>
    %22 = tpu.iota {dimensions = array<i32: 1>} : vector<1x16x1xi32>
    %c2_i32 = arith.constant 2 : i32
    %c0_i32 = arith.constant 0 : i32
    %23 = arith.cmpi eq, %c2_i32, %c0_i32 : i32
    %c1_i32 = arith.constant 1 : i32
    %24 = arith.select %23, %c1_i32, %c2_i32 : i32
    %25 = vector.broadcast %24 : i32 to vector<1x16x1xi32>
    %26 = arith.remsi %22, %25 : vector<1x16x1xi32>
    %c0_i32_10 = arith.constant 0 : i32
    %27 = vector.broadcast %c0_i32_10 : i32 to vector<1x16x1xi32>
    %28 = arith.cmpi ne, %26, %27 : vector<1x16x1xi32>
    %c0_i32_11 = arith.constant 0 : i32
    %29 = vector.broadcast %c0_i32_11 : i32 to vector<1x16x1xi32>
    %30 = arith.cmpi slt, %26, %29 : vector<1x16x1xi32>
    %c0_i32_12 = arith.constant 0 : i32
    %31 = arith.cmpi slt, %24, %c0_i32_12 : i32
    %32 = vector.broadcast %31 : i1 to vector<1x16x1xi1>
    %33 = vector.broadcast %32 : vector<1x16x1xi1> to vector<1x16x1xi1>
    %34 = arith.xori %30, %33 : vector<1x16x1xi1>
    %35 = arith.andi %34, %28 : vector<1x16x1xi1>
    %36 = vector.broadcast %24 : i32 to vector<1x16x1xi32>
    %37 = arith.addi %26, %36 : vector<1x16x1xi32>
    %38 = arith.select %35, %37, %26 : vector<1x16x1xi1>, vector<1x16x1xi32>
    %c0_i32_13 = arith.constant 0 : i32
    %39 = vector.broadcast %c0_i32_13 : i32 to vector<1x16x1xi32>
    %40 = arith.cmpi eq, %38, %39 : vector<1x16x1xi32>
    %41 = arith.maximumf %15, %18 : vector<12x16x32xf32>
    %42 = arith.maximumf %15, %21 : vector<12x16x32xf32>
    %43 = vector.shape_cast %40 : vector<1x16x1xi1> to vector<1x16x1xi1>
    %44 = vector.broadcast %43 : vector<1x16x1xi1> to vector<12x16x32xi1>
    %45 = arith.select %44, %41, %42 : vector<12x16x32xi1>, vector<12x16x32xf32>
    %46 = vector.shape_cast %45 : vector<12x16x32xf32> to vector<192x32xf32>
    %47 = arith.truncf %46 : vector<192x32xf32> to vector<192x32xbf16>
    %c0_14 = arith.constant 0 : index
    %c0_15 = arith.constant 0 : index
    %48 = vector.load %arg5[%c0_14, %c0_15] : memref<32x33xbf16, #tpu.memory_space<vmem>>, vector<32x33xbf16>
    %cst_16 = arith.constant dense<0.000000e+00> : vector<192x33xf32>
    %49 = tpu.matmul %47, %48, %cst_16 {dimension_numbers = #tpu.dot_dimension_numbers<[1], [0], [0], [1], [0, 0, 1, 1], [], []>} : vector<192x32xbf16>, vector<32x33xbf16>, vector<192x33xf32> -> vector<192x33xf32>
    %c0_17 = arith.constant 0 : index
    %c0_18 = arith.constant 0 : index
    %50 = vector.load %arg6[%c0_17, %c0_18] : memref<1x33xf32, #tpu.memory_space<vmem>>, vector<1x33xf32>
    %51 = vector.broadcast %50 : vector<1x33xf32> to vector<192x33xf32>
    %52 = arith.addf %49, %51 : vector<192x33xf32>
    %53 = vector.shape_cast %52 : vector<192x33xf32> to vector<12x16x33xf32>
    %54 = vector.extract_strided_slice %53 {offsets = [0, 0, 0], sizes = [12, 16, 32], strides = [1, 1, 1]} : vector<12x16x33xf32> to vector<12x16x32xf32>
    %55 = tpu.iota {dimensions = array<i32: 2>} : vector<1x1x33xi32>
    %c32_i32 = arith.constant 32 : i32
    %56 = vector.broadcast %c32_i32 : i32 to vector<1x1x33xi32>
    %57 = arith.cmpi eq, %55, %56 : vector<1x1x33xi32>
    %cst_19 = arith.constant 0.000000e+00 : f32
    %58 = vector.shape_cast %57 : vector<1x1x33xi1> to vector<1x1x33xi1>
    %59 = vector.broadcast %58 : vector<1x1x33xi1> to vector<12x16x33xi1>
    %60 = vector.broadcast %cst_19 : f32 to vector<12x16x33xf32>
    %61 = arith.select %59, %53, %60 : vector<12x16x33xi1>, vector<12x16x33xf32>
    %cst_20 = arith.constant dense<0.000000e+00> : vector<12x16xf32>
    %62 = vector.multi_reduction <add>, %61, %cst_20 [2] : vector<12x16x33xf32> to vector<12x16xf32>
    %63 = vector.shape_cast %62 : vector<12x16xf32> to vector<12x16x1xf32>
    %c16_i32 = arith.constant 16 : i32
    %64 = vector.broadcast %c16_i32 : i32 to vector<1x16x1xi32>
    %65 = arith.cmpi slt, %22, %64 : vector<1x16x1xi32>
    %cst_21 = arith.constant -1.000000e+30 : f32
    %66 = vector.shape_cast %65 : vector<1x16x1xi1> to vector<1x16x1xi1>
    %67 = vector.broadcast %66 : vector<1x16x1xi1> to vector<12x16x1xi1>
    %68 = vector.broadcast %cst_21 : f32 to vector<12x16x1xf32>
    %69 = arith.select %67, %63, %68 : vector<12x16x1xi1>, vector<12x16x1xf32>
    %cst_22 = arith.constant dense<0xFF800000> : vector<12x1xf32>
    %70 = vector.multi_reduction <maximumf>, %69, %cst_22 [1] : vector<12x16x1xf32> to vector<12x1xf32>
    %71 = vector.shape_cast %70 : vector<12x1xf32> to vector<12x1x1xf32>
    %72 = vector.broadcast %71 : vector<12x1x1xf32> to vector<12x16x1xf32>
    %73 = arith.subf %69, %72 : vector<12x16x1xf32>
    %74 = math.exp %73 : vector<12x16x1xf32>
    %cst_23 = arith.constant dense<0.000000e+00> : vector<12x1xf32>
    %75 = vector.multi_reduction <add>, %74, %cst_23 [1] : vector<12x16x1xf32> to vector<12x1xf32>
    %76 = vector.shape_cast %75 : vector<12x1xf32> to vector<12x1x1xf32>
    %77 = vector.broadcast %76 : vector<12x1x1xf32> to vector<12x16x1xf32>
    %78 = arith.divf %74, %77 : vector<12x16x1xf32>
    %79 = vector.broadcast %78 : vector<12x16x1xf32> to vector<12x16x32xf32>
    %80 = arith.mulf %54, %79 : vector<12x16x32xf32>
    %cst_24 = arith.constant dense<0.000000e+00> : vector<12x32xf32>
    %81 = vector.multi_reduction <add>, %80, %cst_24 [1] : vector<12x16x32xf32> to vector<12x32xf32>
    %82 = vector.shape_cast %81 : vector<12x32xf32> to vector<12x1x32xf32>
    %cst_25 = arith.constant 8.000000e+00 : f32
    %83 = vector.broadcast %cst_25 : f32 to vector<12x1x32xf32>
    %84 = arith.divf %82, %83 : vector<12x1x32xf32>
    %c0_26 = arith.constant 0 : index
    %c0_27 = arith.constant 0 : index
    %c0_28 = arith.constant 0 : index
    %85 = vector.load %arg7[%c0_26, %c0_27, %c0_28] : memref<12x1x32xf32, #tpu.memory_space<vmem>>, vector<12x1x32xf32>
    tpu.vector_store %arg7[%c0_26, %c0_27, %c0_28], %84 {strides = array<i32>} : memref<12x1x32xf32, #tpu.memory_space<vmem>>, vector<12x1x32xf32>,
    return
  }
  func.func @transform_0(%arg0: i32) -> (i32, i32, i32) {
    %c0_i32 = arith.constant 0 : i32
    %c0_i32_0 = arith.constant 0 : i32
    %c0_i32_1 = arith.constant 0 : i32
    return %arg0, %c0_i32, %c0_i32_0 : i32, i32, i32
  }
  func.func @transform_1(%arg0: i32) -> (i32, i32) {
    %c0_i32 = arith.constant 0 : i32
    %c0_i32_0 = arith.constant 0 : i32
    %c0_i32_1 = arith.constant 0 : i32
    return %c0_i32, %c0_i32_0 : i32, i32
  }
  func.func @transform_2(%arg0: i32) -> (i32, i32) {
    %c0_i32 = arith.constant 0 : i32
    %c0_i32_0 = arith.constant 0 : i32
    %c0_i32_1 = arith.constant 0 : i32
    return %c0_i32, %c0_i32_0 : i32, i32
  }
  func.func @transform_3(%arg0: i32) -> (i32, i32, i32) {
    %c0_i32 = arith.constant 0 : i32
    %c0_i32_0 = arith.constant 0 : i32
    %c0_i32_1 = arith.constant 0 : i32
    return %arg0, %c0_i32, %c0_i32_0 : i32, i32, i32
  }
  func.func @transform_4(%arg0: i32) -> (i32, i32) {
    %c0_i32 = arith.constant 0 : i32
    %c0_i32_0 = arith.constant 0 : i32
    %c0_i32_1 = arith.constant 0 : i32
    return %c0_i32, %c0_i32_0 : i32, i32
  }
  func.func @transform_5(%arg0: i32) -> (i32, i32) {
    %c0_i32 = arith.constant 0 : i32
    %c0_i32_0 = arith.constant 0 : i32
    %c0_i32_1 = arith.constant 0 : i32
    return %c0_i32, %c0_i32_0 : i32, i32
  }
  func.func @transform_6(%arg0: i32) -> (i32, i32, i32) {
    %c0_i32 = arith.constant 0 : i32
    %c0_i32_0 = arith.constant 0 : i32
    %c0_i32_1 = arith.constant 0 : i32
    return %arg0, %c0_i32, %c0_i32_0 : i32, i32, i32
  }
}

module attributes {stable_mosaic.version = 11 : i64} {
  func.func @_mlp_kernel(%arg0: i32, %arg1: memref<24x32xf32, #tpu.memory_space<vmem>>, %arg2: memref<32x32xbf16, #tpu.memory_space<vmem>>, %arg3: memref<1x32xf32, #tpu.memory_space<vmem>>, %arg4: memref<32x32xbf16, #tpu.memory_space<vmem>>, %arg5: memref<1x32xf32, #tpu.memory_space<vmem>>, %arg6: memref<24x32xf32, #tpu.memory_space<vmem>>, %arg7: memref<1x2x32xf32, #tpu.memory_space<vmem>>) attributes {dimension_semantics = [#tpu.dimension_semantics<parallel>], iteration_bounds = array<i64: 1>, scalar_prefetch = 0 : i64, scratch_operands = 0 : i64, tpu.core_type = #tpu.core_type<tc>, window_params = [{transform_indices = @transform_0, window_bounds = array<i64: 24, 32>}, {pipeline_mode = #tpu.pipeline_mode<synchronous>, transform_indices = @transform_1, window_bounds = array<i64: 32, 32>}, {pipeline_mode = #tpu.pipeline_mode<synchronous>, transform_indices = @transform_2, window_bounds = array<i64: 1, 32>}, {pipeline_mode = #tpu.pipeline_mode<synchronous>, transform_indices = @transform_3, window_bounds = array<i64: 32, 32>}, {pipeline_mode = #tpu.pipeline_mode<synchronous>, transform_indices = @transform_4, window_bounds = array<i64: 1, 32>}, {transform_indices = @transform_5, window_bounds = array<i64: 24, 32>}, {transform_indices = @transform_6, window_bounds = array<i64: 1, 2, 32>}]} {
    %c0 = arith.constant 0 : index
    %c0_0 = arith.constant 0 : index
    %0 = vector.load %arg1[%c0, %c0_0] : memref<24x32xf32, #tpu.memory_space<vmem>>, vector<24x32xf32>
    %1 = arith.truncf %0 : vector<24x32xf32> to vector<24x32xbf16>
    %c0_1 = arith.constant 0 : index
    %c0_2 = arith.constant 0 : index
    %2 = vector.load %arg2[%c0_1, %c0_2] : memref<32x32xbf16, #tpu.memory_space<vmem>>, vector<32x32xbf16>
    %cst = arith.constant dense<0.000000e+00> : vector<24x32xf32>
    %3 = tpu.matmul %1, %2, %cst {dimension_numbers = #tpu.dot_dimension_numbers<[1], [0], [0], [1], [0, 0, 1, 1], [], []>} : vector<24x32xbf16>, vector<32x32xbf16>, vector<24x32xf32> -> vector<24x32xf32>
    %c0_3 = arith.constant 0 : index
    %c0_4 = arith.constant 0 : index
    %4 = vector.load %arg3[%c0_3, %c0_4] : memref<1x32xf32, #tpu.memory_space<vmem>>, vector<1x32xf32>
    %5 = vector.broadcast %4 : vector<1x32xf32> to vector<24x32xf32>
    %6 = arith.addf %3, %5 : vector<24x32xf32>
    %cst_5 = arith.constant 0.000000e+00 : f32
    %7 = vector.broadcast %cst_5 : f32 to vector<24x32xf32>
    %8 = arith.cmpf ogt, %6, %7 : vector<24x32xf32>
    %cst_6 = arith.constant 5.000000e-01 : f32
    %9 = vector.broadcast %cst_6 : f32 to vector<24x32xf32>
    %10 = arith.mulf %9, %6 : vector<24x32xf32>
    %11 = math.tanh %10 : vector<24x32xf32>
    %12 = math.exp %6 : vector<24x32xf32>
    %cst_7 = arith.constant 1.000000e+00 : f32
    %13 = vector.broadcast %cst_7 : f32 to vector<24x32xf32>
    %14 = arith.addf %12, %13 : vector<24x32xf32>
    %15 = arith.mulf %11, %14 : vector<24x32xf32>
    %16 = arith.select %8, %6, %15 : vector<24x32xi1>, vector<24x32xf32>
    %17 = arith.truncf %16 : vector<24x32xf32> to vector<24x32xbf16>
    %c0_8 = arith.constant 0 : index
    %c0_9 = arith.constant 0 : index
    %18 = vector.load %arg4[%c0_8, %c0_9] : memref<32x32xbf16, #tpu.memory_space<vmem>>, vector<32x32xbf16>
    %cst_10 = arith.constant dense<0.000000e+00> : vector<24x32xf32>
    %19 = tpu.matmul %17, %18, %cst_10 {dimension_numbers = #tpu.dot_dimension_numbers<[1], [0], [0], [1], [0, 0, 1, 1], [], []>} : vector<24x32xbf16>, vector<32x32xbf16>, vector<24x32xf32> -> vector<24x32xf32>
    %c0_11 = arith.constant 0 : index
    %c0_12 = arith.constant 0 : index
    %20 = vector.load %arg5[%c0_11, %c0_12] : memref<1x32xf32, #tpu.memory_space<vmem>>, vector<1x32xf32>
    %21 = vector.broadcast %20 : vector<1x32xf32> to vector<24x32xf32>
    %22 = arith.addf %19, %21 : vector<24x32xf32>
    %cst_13 = arith.constant 0.000000e+00 : f32
    %23 = vector.broadcast %cst_13 : f32 to vector<24x32xf32>
    %24 = arith.cmpf ogt, %22, %23 : vector<24x32xf32>
    %cst_14 = arith.constant 5.000000e-01 : f32
    %25 = vector.broadcast %cst_14 : f32 to vector<24x32xf32>
    %26 = arith.mulf %25, %22 : vector<24x32xf32>
    %27 = math.tanh %26 : vector<24x32xf32>
    %28 = math.exp %22 : vector<24x32xf32>
    %cst_15 = arith.constant 1.000000e+00 : f32
    %29 = vector.broadcast %cst_15 : f32 to vector<24x32xf32>
    %30 = arith.addf %28, %29 : vector<24x32xf32>
    %31 = arith.mulf %27, %30 : vector<24x32xf32>
    %32 = arith.select %24, %22, %31 : vector<24x32xi1>, vector<24x32xf32>
    %c0_16 = arith.constant 0 : index
    %c0_17 = arith.constant 0 : index
    %33 = vector.load %arg6[%c0_16, %c0_17] : memref<24x32xf32, #tpu.memory_space<vmem>>, vector<24x32xf32>
    tpu.vector_store %arg6[%c0_16, %c0_17], %32 {strides = array<i32>} : memref<24x32xf32, #tpu.memory_space<vmem>>, vector<24x32xf32>,
    %cst_18 = arith.constant dense<0.000000e+00> : vector<32xf32>
    %34 = vector.multi_reduction <add>, %32, %cst_18 [0] : vector<24x32xf32> to vector<32xf32>
    %35 = vector.shape_cast %34 : vector<32xf32> to vector<1x32xf32>
    %36 = arith.mulf %32, %32 : vector<24x32xf32>
    %cst_19 = arith.constant dense<0.000000e+00> : vector<32xf32>
    %37 = vector.multi_reduction <add>, %36, %cst_19 [0] : vector<24x32xf32> to vector<32xf32>
    %38 = vector.shape_cast %37 : vector<32xf32> to vector<1x32xf32>
    %39 = tpu.concatenate %35, %38 in 0 : vector<1x32xf32>, vector<1x32xf32> -> vector<2x32xf32>
    %40 = vector.shape_cast %39 : vector<2x32xf32> to vector<1x2x32xf32>
    %c0_20 = arith.constant 0 : index
    %c0_21 = arith.constant 0 : index
    %c0_22 = arith.constant 0 : index
    %41 = vector.load %arg7[%c0_20, %c0_21, %c0_22] : memref<1x2x32xf32, #tpu.memory_space<vmem>>, vector<1x2x32xf32>
    tpu.vector_store %arg7[%c0_20, %c0_21, %c0_22], %40 {strides = array<i32>} : memref<1x2x32xf32, #tpu.memory_space<vmem>>, vector<1x2x32xf32>,
    return
  }
  func.func @transform_0(%arg0: i32) -> (i32, i32) {
    %c0_i32 = arith.constant 0 : i32
    %c0_i32_0 = arith.constant 0 : i32
    return %arg0, %c0_i32 : i32, i32
  }
  func.func @transform_1(%arg0: i32) -> (i32, i32) {
    %c0_i32 = arith.constant 0 : i32
    %c0_i32_0 = arith.constant 0 : i32
    %c0_i32_1 = arith.constant 0 : i32
    return %c0_i32, %c0_i32_0 : i32, i32
  }
  func.func @transform_2(%arg0: i32) -> (i32, i32) {
    %c0_i32 = arith.constant 0 : i32
    %c0_i32_0 = arith.constant 0 : i32
    %c0_i32_1 = arith.constant 0 : i32
    return %c0_i32, %c0_i32_0 : i32, i32
  }
  func.func @transform_3(%arg0: i32) -> (i32, i32) {
    %c0_i32 = arith.constant 0 : i32
    %c0_i32_0 = arith.constant 0 : i32
    %c0_i32_1 = arith.constant 0 : i32
    return %c0_i32, %c0_i32_0 : i32, i32
  }
  func.func @transform_4(%arg0: i32) -> (i32, i32) {
    %c0_i32 = arith.constant 0 : i32
    %c0_i32_0 = arith.constant 0 : i32
    %c0_i32_1 = arith.constant 0 : i32
    return %c0_i32, %c0_i32_0 : i32, i32
  }
  func.func @transform_5(%arg0: i32) -> (i32, i32) {
    %c0_i32 = arith.constant 0 : i32
    %c0_i32_0 = arith.constant 0 : i32
    return %arg0, %c0_i32 : i32, i32
  }
  func.func @transform_6(%arg0: i32) -> (i32, i32, i32) {
    %c0_i32 = arith.constant 0 : i32
    %c0_i32_0 = arith.constant 0 : i32
    %c0_i32_1 = arith.constant 0 : i32
    return %arg0, %c0_i32, %c0_i32_0 : i32, i32, i32
  }
}

module attributes {stable_mosaic.version = 11 : i64} {
  func.func @_mlp_kernel(%arg0: i32, %arg1: memref<8x32xf32, #tpu.memory_space<vmem>>, %arg2: memref<32x32xbf16, #tpu.memory_space<vmem>>, %arg3: memref<1x32xf32, #tpu.memory_space<vmem>>, %arg4: memref<32x32xbf16, #tpu.memory_space<vmem>>, %arg5: memref<1x32xf32, #tpu.memory_space<vmem>>, %arg6: memref<8x32xf32, #tpu.memory_space<vmem>>, %arg7: memref<1x2x32xf32, #tpu.memory_space<vmem>>) attributes {dimension_semantics = [#tpu.dimension_semantics<parallel>], iteration_bounds = array<i64: 1>, scalar_prefetch = 0 : i64, scratch_operands = 0 : i64, tpu.core_type = #tpu.core_type<tc>, window_params = [{transform_indices = @transform_0, window_bounds = array<i64: 8, 32>}, {pipeline_mode = #tpu.pipeline_mode<synchronous>, transform_indices = @transform_1, window_bounds = array<i64: 32, 32>}, {pipeline_mode = #tpu.pipeline_mode<synchronous>, transform_indices = @transform_2, window_bounds = array<i64: 1, 32>}, {pipeline_mode = #tpu.pipeline_mode<synchronous>, transform_indices = @transform_3, window_bounds = array<i64: 32, 32>}, {pipeline_mode = #tpu.pipeline_mode<synchronous>, transform_indices = @transform_4, window_bounds = array<i64: 1, 32>}, {transform_indices = @transform_5, window_bounds = array<i64: 8, 32>}, {transform_indices = @transform_6, window_bounds = array<i64: 1, 2, 32>}]} {
    %c0 = arith.constant 0 : index
    %c0_0 = arith.constant 0 : index
    %0 = vector.load %arg1[%c0, %c0_0] : memref<8x32xf32, #tpu.memory_space<vmem>>, vector<8x32xf32>
    %1 = arith.truncf %0 : vector<8x32xf32> to vector<8x32xbf16>
    %c0_1 = arith.constant 0 : index
    %c0_2 = arith.constant 0 : index
    %2 = vector.load %arg2[%c0_1, %c0_2] : memref<32x32xbf16, #tpu.memory_space<vmem>>, vector<32x32xbf16>
    %cst = arith.constant dense<0.000000e+00> : vector<8x32xf32>
    %3 = tpu.matmul %1, %2, %cst {dimension_numbers = #tpu.dot_dimension_numbers<[1], [0], [0], [1], [0, 0, 1, 1], [], []>} : vector<8x32xbf16>, vector<32x32xbf16>, vector<8x32xf32> -> vector<8x32xf32>
    %c0_3 = arith.constant 0 : index
    %c0_4 = arith.constant 0 : index
    %4 = vector.load %arg3[%c0_3, %c0_4] : memref<1x32xf32, #tpu.memory_space<vmem>>, vector<1x32xf32>
    %5 = vector.broadcast %4 : vector<1x32xf32> to vector<8x32xf32>
    %6 = arith.addf %3, %5 : vector<8x32xf32>
    %cst_5 = arith.constant 0.000000e+00 : f32
    %7 = vector.broadcast %cst_5 : f32 to vector<8x32xf32>
    %8 = arith.cmpf ogt, %6, %7 : vector<8x32xf32>
    %cst_6 = arith.constant 5.000000e-01 : f32
    %9 = vector.broadcast %cst_6 : f32 to vector<8x32xf32>
    %10 = arith.mulf %9, %6 : vector<8x32xf32>
    %11 = math.tanh %10 : vector<8x32xf32>
    %12 = math.exp %6 : vector<8x32xf32>
    %cst_7 = arith.constant 1.000000e+00 : f32
    %13 = vector.broadcast %cst_7 : f32 to vector<8x32xf32>
    %14 = arith.addf %12, %13 : vector<8x32xf32>
    %15 = arith.mulf %11, %14 : vector<8x32xf32>
    %16 = arith.select %8, %6, %15 : vector<8x32xi1>, vector<8x32xf32>
    %17 = arith.truncf %16 : vector<8x32xf32> to vector<8x32xbf16>
    %c0_8 = arith.constant 0 : index
    %c0_9 = arith.constant 0 : index
    %18 = vector.load %arg4[%c0_8, %c0_9] : memref<32x32xbf16, #tpu.memory_space<vmem>>, vector<32x32xbf16>
    %cst_10 = arith.constant dense<0.000000e+00> : vector<8x32xf32>
    %19 = tpu.matmul %17, %18, %cst_10 {dimension_numbers = #tpu.dot_dimension_numbers<[1], [0], [0], [1], [0, 0, 1, 1], [], []>} : vector<8x32xbf16>, vector<32x32xbf16>, vector<8x32xf32> -> vector<8x32xf32>
    %c0_11 = arith.constant 0 : index
    %c0_12 = arith.constant 0 : index
    %20 = vector.load %arg5[%c0_11, %c0_12] : memref<1x32xf32, #tpu.memory_space<vmem>>, vector<1x32xf32>
    %21 = vector.broadcast %20 : vector<1x32xf32> to vector<8x32xf32>
    %22 = arith.addf %19, %21 : vector<8x32xf32>
    %cst_13 = arith.constant 0.000000e+00 : f32
    %23 = vector.broadcast %cst_13 : f32 to vector<8x32xf32>
    %24 = arith.cmpf ogt, %22, %23 : vector<8x32xf32>
    %cst_14 = arith.constant 5.000000e-01 : f32
    %25 = vector.broadcast %cst_14 : f32 to vector<8x32xf32>
    %26 = arith.mulf %25, %22 : vector<8x32xf32>
    %27 = math.tanh %26 : vector<8x32xf32>
    %28 = math.exp %22 : vector<8x32xf32>
    %cst_15 = arith.constant 1.000000e+00 : f32
    %29 = vector.broadcast %cst_15 : f32 to vector<8x32xf32>
    %30 = arith.addf %28, %29 : vector<8x32xf32>
    %31 = arith.mulf %27, %30 : vector<8x32xf32>
    %32 = arith.select %24, %22, %31 : vector<8x32xi1>, vector<8x32xf32>
    %c0_16 = arith.constant 0 : index
    %c0_17 = arith.constant 0 : index
    %33 = vector.load %arg6[%c0_16, %c0_17] : memref<8x32xf32, #tpu.memory_space<vmem>>, vector<8x32xf32>
    tpu.vector_store %arg6[%c0_16, %c0_17], %32 {strides = array<i32>} : memref<8x32xf32, #tpu.memory_space<vmem>>, vector<8x32xf32>,
    %cst_18 = arith.constant dense<0.000000e+00> : vector<32xf32>
    %34 = vector.multi_reduction <add>, %32, %cst_18 [0] : vector<8x32xf32> to vector<32xf32>
    %35 = vector.shape_cast %34 : vector<32xf32> to vector<1x32xf32>
    %36 = arith.mulf %32, %32 : vector<8x32xf32>
    %cst_19 = arith.constant dense<0.000000e+00> : vector<32xf32>
    %37 = vector.multi_reduction <add>, %36, %cst_19 [0] : vector<8x32xf32> to vector<32xf32>
    %38 = vector.shape_cast %37 : vector<32xf32> to vector<1x32xf32>
    %39 = tpu.concatenate %35, %38 in 0 : vector<1x32xf32>, vector<1x32xf32> -> vector<2x32xf32>
    %40 = vector.shape_cast %39 : vector<2x32xf32> to vector<1x2x32xf32>
    %c0_20 = arith.constant 0 : index
    %c0_21 = arith.constant 0 : index
    %c0_22 = arith.constant 0 : index
    %41 = vector.load %arg7[%c0_20, %c0_21, %c0_22] : memref<1x2x32xf32, #tpu.memory_space<vmem>>, vector<1x2x32xf32>
    tpu.vector_store %arg7[%c0_20, %c0_21, %c0_22], %40 {strides = array<i32>} : memref<1x2x32xf32, #tpu.memory_space<vmem>>, vector<1x2x32xf32>,
    return
  }
  func.func @transform_0(%arg0: i32) -> (i32, i32) {
    %c0_i32 = arith.constant 0 : i32
    %c0_i32_0 = arith.constant 0 : i32
    return %arg0, %c0_i32 : i32, i32
  }
  func.func @transform_1(%arg0: i32) -> (i32, i32) {
    %c0_i32 = arith.constant 0 : i32
    %c0_i32_0 = arith.constant 0 : i32
    %c0_i32_1 = arith.constant 0 : i32
    return %c0_i32, %c0_i32_0 : i32, i32
  }
  func.func @transform_2(%arg0: i32) -> (i32, i32) {
    %c0_i32 = arith.constant 0 : i32
    %c0_i32_0 = arith.constant 0 : i32
    %c0_i32_1 = arith.constant 0 : i32
    return %c0_i32, %c0_i32_0 : i32, i32
  }
  func.func @transform_3(%arg0: i32) -> (i32, i32) {
    %c0_i32 = arith.constant 0 : i32
    %c0_i32_0 = arith.constant 0 : i32
    %c0_i32_1 = arith.constant 0 : i32
    return %c0_i32, %c0_i32_0 : i32, i32
  }
  func.func @transform_4(%arg0: i32) -> (i32, i32) {
    %c0_i32 = arith.constant 0 : i32
    %c0_i32_0 = arith.constant 0 : i32
    %c0_i32_1 = arith.constant 0 : i32
    return %c0_i32, %c0_i32_0 : i32, i32
  }
  func.func @transform_5(%arg0: i32) -> (i32, i32) {
    %c0_i32 = arith.constant 0 : i32
    %c0_i32_0 = arith.constant 0 : i32
    return %arg0, %c0_i32 : i32, i32
  }
  func.func @transform_6(%arg0: i32) -> (i32, i32, i32) {
    %c0_i32 = arith.constant 0 : i32
    %c0_i32_0 = arith.constant 0 : i32
    %c0_i32_1 = arith.constant 0 : i32
    return %arg0, %c0_i32, %c0_i32_0 : i32, i32, i32
  }
}

module attributes {stable_mosaic.version = 11 : i64} {
  func.func @_mlp_kernel(%arg0: i32, %arg1: memref<24x96xf32, #tpu.memory_space<vmem>>, %arg2: memref<96x32xbf16, #tpu.memory_space<vmem>>, %arg3: memref<1x32xf32, #tpu.memory_space<vmem>>, %arg4: memref<32x32xbf16, #tpu.memory_space<vmem>>, %arg5: memref<1x32xf32, #tpu.memory_space<vmem>>, %arg6: memref<24x32xf32, #tpu.memory_space<vmem>>, %arg7: memref<1x2x32xf32, #tpu.memory_space<vmem>>) attributes {dimension_semantics = [#tpu.dimension_semantics<parallel>], iteration_bounds = array<i64: 1>, scalar_prefetch = 0 : i64, scratch_operands = 0 : i64, tpu.core_type = #tpu.core_type<tc>, window_params = [{transform_indices = @transform_0, window_bounds = array<i64: 24, 96>}, {pipeline_mode = #tpu.pipeline_mode<synchronous>, transform_indices = @transform_1, window_bounds = array<i64: 96, 32>}, {pipeline_mode = #tpu.pipeline_mode<synchronous>, transform_indices = @transform_2, window_bounds = array<i64: 1, 32>}, {pipeline_mode = #tpu.pipeline_mode<synchronous>, transform_indices = @transform_3, window_bounds = array<i64: 32, 32>}, {pipeline_mode = #tpu.pipeline_mode<synchronous>, transform_indices = @transform_4, window_bounds = array<i64: 1, 32>}, {transform_indices = @transform_5, window_bounds = array<i64: 24, 32>}, {transform_indices = @transform_6, window_bounds = array<i64: 1, 2, 32>}]} {
    %c0 = arith.constant 0 : index
    %c0_0 = arith.constant 0 : index
    %0 = vector.load %arg1[%c0, %c0_0] : memref<24x96xf32, #tpu.memory_space<vmem>>, vector<24x96xf32>
    %1 = arith.truncf %0 : vector<24x96xf32> to vector<24x96xbf16>
    %c0_1 = arith.constant 0 : index
    %c0_2 = arith.constant 0 : index
    %2 = vector.load %arg2[%c0_1, %c0_2] : memref<96x32xbf16, #tpu.memory_space<vmem>>, vector<96x32xbf16>
    %cst = arith.constant dense<0.000000e+00> : vector<24x32xf32>
    %3 = tpu.matmul %1, %2, %cst {dimension_numbers = #tpu.dot_dimension_numbers<[1], [0], [0], [1], [0, 0, 1, 1], [], []>} : vector<24x96xbf16>, vector<96x32xbf16>, vector<24x32xf32> -> vector<24x32xf32>
    %c0_3 = arith.constant 0 : index
    %c0_4 = arith.constant 0 : index
    %4 = vector.load %arg3[%c0_3, %c0_4] : memref<1x32xf32, #tpu.memory_space<vmem>>, vector<1x32xf32>
    %5 = vector.broadcast %4 : vector<1x32xf32> to vector<24x32xf32>
    %6 = arith.addf %3, %5 : vector<24x32xf32>
    %cst_5 = arith.constant 0.000000e+00 : f32
    %7 = vector.broadcast %cst_5 : f32 to vector<24x32xf32>
    %8 = arith.cmpf ogt, %6, %7 : vector<24x32xf32>
    %cst_6 = arith.constant 5.000000e-01 : f32
    %9 = vector.broadcast %cst_6 : f32 to vector<24x32xf32>
    %10 = arith.mulf %9, %6 : vector<24x32xf32>
    %11 = math.tanh %10 : vector<24x32xf32>
    %12 = math.exp %6 : vector<24x32xf32>
    %cst_7 = arith.constant 1.000000e+00 : f32
    %13 = vector.broadcast %cst_7 : f32 to vector<24x32xf32>
    %14 = arith.addf %12, %13 : vector<24x32xf32>
    %15 = arith.mulf %11, %14 : vector<24x32xf32>
    %16 = arith.select %8, %6, %15 : vector<24x32xi1>, vector<24x32xf32>
    %17 = arith.truncf %16 : vector<24x32xf32> to vector<24x32xbf16>
    %c0_8 = arith.constant 0 : index
    %c0_9 = arith.constant 0 : index
    %18 = vector.load %arg4[%c0_8, %c0_9] : memref<32x32xbf16, #tpu.memory_space<vmem>>, vector<32x32xbf16>
    %cst_10 = arith.constant dense<0.000000e+00> : vector<24x32xf32>
    %19 = tpu.matmul %17, %18, %cst_10 {dimension_numbers = #tpu.dot_dimension_numbers<[1], [0], [0], [1], [0, 0, 1, 1], [], []>} : vector<24x32xbf16>, vector<32x32xbf16>, vector<24x32xf32> -> vector<24x32xf32>
    %c0_11 = arith.constant 0 : index
    %c0_12 = arith.constant 0 : index
    %20 = vector.load %arg5[%c0_11, %c0_12] : memref<1x32xf32, #tpu.memory_space<vmem>>, vector<1x32xf32>
    %21 = vector.broadcast %20 : vector<1x32xf32> to vector<24x32xf32>
    %22 = arith.addf %19, %21 : vector<24x32xf32>
    %cst_13 = arith.constant 0.000000e+00 : f32
    %23 = vector.broadcast %cst_13 : f32 to vector<24x32xf32>
    %24 = arith.cmpf ogt, %22, %23 : vector<24x32xf32>
    %cst_14 = arith.constant 5.000000e-01 : f32
    %25 = vector.broadcast %cst_14 : f32 to vector<24x32xf32>
    %26 = arith.mulf %25, %22 : vector<24x32xf32>
    %27 = math.tanh %26 : vector<24x32xf32>
    %28 = math.exp %22 : vector<24x32xf32>
    %cst_15 = arith.constant 1.000000e+00 : f32
    %29 = vector.broadcast %cst_15 : f32 to vector<24x32xf32>
    %30 = arith.addf %28, %29 : vector<24x32xf32>
    %31 = arith.mulf %27, %30 : vector<24x32xf32>
    %32 = arith.select %24, %22, %31 : vector<24x32xi1>, vector<24x32xf32>
    %c0_16 = arith.constant 0 : index
    %c0_17 = arith.constant 0 : index
    %33 = vector.load %arg6[%c0_16, %c0_17] : memref<24x32xf32, #tpu.memory_space<vmem>>, vector<24x32xf32>
    tpu.vector_store %arg6[%c0_16, %c0_17], %32 {strides = array<i32>} : memref<24x32xf32, #tpu.memory_space<vmem>>, vector<24x32xf32>,
    %cst_18 = arith.constant dense<0.000000e+00> : vector<32xf32>
    %34 = vector.multi_reduction <add>, %32, %cst_18 [0] : vector<24x32xf32> to vector<32xf32>
    %35 = vector.shape_cast %34 : vector<32xf32> to vector<1x32xf32>
    %36 = arith.mulf %32, %32 : vector<24x32xf32>
    %cst_19 = arith.constant dense<0.000000e+00> : vector<32xf32>
    %37 = vector.multi_reduction <add>, %36, %cst_19 [0] : vector<24x32xf32> to vector<32xf32>
    %38 = vector.shape_cast %37 : vector<32xf32> to vector<1x32xf32>
    %39 = tpu.concatenate %35, %38 in 0 : vector<1x32xf32>, vector<1x32xf32> -> vector<2x32xf32>
    %40 = vector.shape_cast %39 : vector<2x32xf32> to vector<1x2x32xf32>
    %c0_20 = arith.constant 0 : index
    %c0_21 = arith.constant 0 : index
    %c0_22 = arith.constant 0 : index
    %41 = vector.load %arg7[%c0_20, %c0_21, %c0_22] : memref<1x2x32xf32, #tpu.memory_space<vmem>>, vector<1x2x32xf32>
    tpu.vector_store %arg7[%c0_20, %c0_21, %c0_22], %40 {strides = array<i32>} : memref<1x2x32xf32, #tpu.memory_space<vmem>>, vector<1x2x32xf32>,
    return
  }
  func.func @transform_0(%arg0: i32) -> (i32, i32) {
    %c0_i32 = arith.constant 0 : i32
    %c0_i32_0 = arith.constant 0 : i32
    return %arg0, %c0_i32 : i32, i32
  }
  func.func @transform_1(%arg0: i32) -> (i32, i32) {
    %c0_i32 = arith.constant 0 : i32
    %c0_i32_0 = arith.constant 0 : i32
    %c0_i32_1 = arith.constant 0 : i32
    return %c0_i32, %c0_i32_0 : i32, i32
  }
  func.func @transform_2(%arg0: i32) -> (i32, i32) {
    %c0_i32 = arith.constant 0 : i32
    %c0_i32_0 = arith.constant 0 : i32
    %c0_i32_1 = arith.constant 0 : i32
    return %c0_i32, %c0_i32_0 : i32, i32
  }
  func.func @transform_3(%arg0: i32) -> (i32, i32) {
    %c0_i32 = arith.constant 0 : i32
    %c0_i32_0 = arith.constant 0 : i32
    %c0_i32_1 = arith.constant 0 : i32
    return %c0_i32, %c0_i32_0 : i32, i32
  }
  func.func @transform_4(%arg0: i32) -> (i32, i32) {
    %c0_i32 = arith.constant 0 : i32
    %c0_i32_0 = arith.constant 0 : i32
    %c0_i32_1 = arith.constant 0 : i32
    return %c0_i32, %c0_i32_0 : i32, i32
  }
  func.func @transform_5(%arg0: i32) -> (i32, i32) {
    %c0_i32 = arith.constant 0 : i32
    %c0_i32_0 = arith.constant 0 : i32
    return %arg0, %c0_i32 : i32, i32
  }
  func.func @transform_6(%arg0: i32) -> (i32, i32, i32) {
    %c0_i32 = arith.constant 0 : i32
    %c0_i32_0 = arith.constant 0 : i32
    %c0_i32_1 = arith.constant 0 : i32
    return %arg0, %c0_i32, %c0_i32_0 : i32, i32, i32
  }
}

module attributes {stable_mosaic.version = 11 : i64} {
  func.func @_affine_linear_kernel(%arg0: i32, %arg1: memref<24x32xf32, #tpu.memory_space<vmem>>, %arg2: memref<1x32xf32, #tpu.memory_space<vmem>>, %arg3: memref<1x32xf32, #tpu.memory_space<vmem>>, %arg4: memref<32x8xbf16, #tpu.memory_space<vmem>>, %arg5: memref<1x8xf32, #tpu.memory_space<vmem>>, %arg6: memref<24x8xf32, #tpu.memory_space<vmem>>) attributes {dimension_semantics = [#tpu.dimension_semantics<parallel>], iteration_bounds = array<i64: 1>, scalar_prefetch = 0 : i64, scratch_operands = 0 : i64, tpu.core_type = #tpu.core_type<tc>, window_params = [{transform_indices = @transform_0, window_bounds = array<i64: 24, 32>}, {pipeline_mode = #tpu.pipeline_mode<synchronous>, transform_indices = @transform_1, window_bounds = array<i64: 1, 32>}, {pipeline_mode = #tpu.pipeline_mode<synchronous>, transform_indices = @transform_2, window_bounds = array<i64: 1, 32>}, {pipeline_mode = #tpu.pipeline_mode<synchronous>, transform_indices = @transform_3, window_bounds = array<i64: 32, 8>}, {pipeline_mode = #tpu.pipeline_mode<synchronous>, transform_indices = @transform_4, window_bounds = array<i64: 1, 8>}, {transform_indices = @transform_5, window_bounds = array<i64: 24, 8>}]} {
    %c0 = arith.constant 0 : index
    %c0_0 = arith.constant 0 : index
    %0 = vector.load %arg1[%c0, %c0_0] : memref<24x32xf32, #tpu.memory_space<vmem>>, vector<24x32xf32>
    %c0_1 = arith.constant 0 : index
    %c0_2 = arith.constant 0 : index
    %1 = vector.load %arg2[%c0_1, %c0_2] : memref<1x32xf32, #tpu.memory_space<vmem>>, vector<1x32xf32>
    %2 = vector.broadcast %1 : vector<1x32xf32> to vector<24x32xf32>
    %3 = arith.mulf %0, %2 : vector<24x32xf32>
    %c0_3 = arith.constant 0 : index
    %c0_4 = arith.constant 0 : index
    %4 = vector.load %arg3[%c0_3, %c0_4] : memref<1x32xf32, #tpu.memory_space<vmem>>, vector<1x32xf32>
    %5 = vector.broadcast %4 : vector<1x32xf32> to vector<24x32xf32>
    %6 = arith.addf %3, %5 : vector<24x32xf32>
    %7 = arith.truncf %6 : vector<24x32xf32> to vector<24x32xbf16>
    %c0_5 = arith.constant 0 : index
    %c0_6 = arith.constant 0 : index
    %8 = vector.load %arg4[%c0_5, %c0_6] : memref<32x8xbf16, #tpu.memory_space<vmem>>, vector<32x8xbf16>
    %cst = arith.constant dense<0.000000e+00> : vector<24x8xf32>
    %9 = tpu.matmul %7, %8, %cst {dimension_numbers = #tpu.dot_dimension_numbers<[1], [0], [0], [1], [0, 0, 1, 1], [], []>} : vector<24x32xbf16>, vector<32x8xbf16>, vector<24x8xf32> -> vector<24x8xf32>
    %c0_7 = arith.constant 0 : index
    %c0_8 = arith.constant 0 : index
    %10 = vector.load %arg5[%c0_7, %c0_8] : memref<1x8xf32, #tpu.memory_space<vmem>>, vector<1x8xf32>
    %11 = vector.broadcast %10 : vector<1x8xf32> to vector<24x8xf32>
    %12 = arith.addf %9, %11 : vector<24x8xf32>
    %c0_9 = arith.constant 0 : index
    %c0_10 = arith.constant 0 : index
    %13 = vector.load %arg6[%c0_9, %c0_10] : memref<24x8xf32, #tpu.memory_space<vmem>>, vector<24x8xf32>
    tpu.vector_store %arg6[%c0_9, %c0_10], %12 {strides = array<i32>} : memref<24x8xf32, #tpu.memory_space<vmem>>, vector<24x8xf32>,
    return
  }
  func.func @transform_0(%arg0: i32) -> (i32, i32) {
    %c0_i32 = arith.constant 0 : i32
    %c0_i32_0 = arith.constant 0 : i32
    return %arg0, %c0_i32 : i32, i32
  }
  func.func @transform_1(%arg0: i32) -> (i32, i32) {
    %c0_i32 = arith.constant 0 : i32
    %c0_i32_0 = arith.constant 0 : i32
    %c0_i32_1 = arith.constant 0 : i32
    return %c0_i32, %c0_i32_0 : i32, i32
  }
  func.func @transform_2(%arg0: i32) -> (i32, i32) {
    %c0_i32 = arith.constant 0 : i32
    %c0_i32_0 = arith.constant 0 : i32
    %c0_i32_1 = arith.constant 0 : i32
    return %c0_i32, %c0_i32_0 : i32, i32
  }
  func.func @transform_3(%arg0: i32) -> (i32, i32) {
    %c0_i32 = arith.constant 0 : i32
    %c0_i32_0 = arith.constant 0 : i32
    %c0_i32_1 = arith.constant 0 : i32
    return %c0_i32, %c0_i32_0 : i32, i32
  }
  func.func @transform_4(%arg0: i32) -> (i32, i32) {
    %c0_i32 = arith.constant 0 : i32
    %c0_i32_0 = arith.constant 0 : i32
    %c0_i32_1 = arith.constant 0 : i32
    return %c0_i32, %c0_i32_0 : i32, i32
  }
  func.func @transform_5(%arg0: i32) -> (i32, i32) {
    %c0_i32 = arith.constant 0 : i32
    %c0_i32_0 = arith.constant 0 : i32
    return %arg0, %c0_i32 : i32, i32
  }
}

</mosaic_0001>

<bundles_post_ra>
// kernel: encoder_forward.10
= control target key start
LH: loop header
LB: loop body
LE: loop exit
PB: predicated region body
PF: predicated region fallthrough
CT: control target
= control target key end

     0   :  { %vm51_vm0 = vcmask 261120   ;;  %vm261_vm7 = vcmask 1040384   ;;  %vm263_vm8 = vcmask 254976   ;;  %s422_s1 = inlined_call_operand.vmem [shape: bf16[32,32], index: 1, kind: input, shape index: {}]   ;;  %s423_s0 = inlined_call_operand.vmem [shape: f32[24,32], index: 0, kind: input, shape index: {}]   ;;  %s424_s3 = inlined_call_operand.vmem [shape: bf16[32,32], index: 3, kind: input, shape index: {}]   ;;  %s425_s2 = inlined_call_operand.vmem [shape: f32[1,32], index: 2, kind: input, shape index: {}]   ;;  %s426_s4 = inlined_call_operand.vmem [shape: f32[1,32], index: 4, kind: input, shape index: {}]   ;;  %s427_s5 = inlined_call_operand.vmem [shape: f32[24,32], index: 5, kind: output, shape index: {0}]   ;;  %s428_s6 = inlined_call_operand.vmem [shape: f32[1,2,32], index: 6, kind: output, shape index: {1}]  }
   0x1   :  { %v307_v0 = vld [vmem:[%s422_s1] sm:$0xff]   ;;  %v308_v1 = vld [vmem:[%s422_s1 + $0x8] sm:$0xff]   ;;  %v25_v4 = vld [vmem:[%s423_s0 + $0x10] sm:$0xff] }
   0x2   :  { %291 = vmatprep.subr.bf16.mxu0 %v307_v0  ;;  %v23_v2 = vld [vmem:[%s423_s0] sm:$0xff]  ;;  %v24_v3 = vld [vmem:[%s423_s0 + $0x8] sm:$0xff]  ;;  %v27_v6 = vpack.c.bf16 %v25_v4, %v25_v4 }
   0x3   :  { %292 = vmatpush3.bf16.msra.mxu0 %v307_v0  ;;  %v26_v5 = vpack.c.bf16 %v24_v3, %v23_v2  ;;  %v309_v7 = vld [vmem:[%s424_s3] sm:$0xff]   ;;  %v310_v8 = vld [vmem:[%s424_s3 + $0x8] sm:$0xff]  }
   0x4   :  { %293 = vmatprep.subr.bf16.mxu0 %v308_v1  ;;  %299 = vmatprep.subr.bf16.mxu1 %v309_v7  ;;  %v273_v9 = vld [vmem:[%s425_s2] ss:$0 sm:$0xff] }
   0x5   :  { %295 = vmatprep.mubr.msk.bf16.mxu0 %vm51_vm0, %v26_v5  ;;  %300 = vmatpush3.bf16.msra.mxu1 %v309_v7  ;;  %v278_v40 = vld [vmem:[%s426_s4] ss:$0 sm:$0xff] }
   0x6   :  { %301 = vmatprep.subr.bf16.mxu1 %v310_v8 }
   0x7   :  { %294 = vmatpush3.bf16.msra.mxu0 %v308_v1 }
   0x9   :  { %302 = vmatpush3.bf16.msra.mxu1 %v310_v8 }
   0xa   :  { %296 = vmatmul.mubr.msk.bf16.vlgmr.msra.gmra.mrb[0].mxu0 %vm51_vm0, %v27_v6 }
  0xdd   :  { %v297_v10 = vpop.f32.mrb[0].mxu0 }
  0xde   :  { %v101_v11 = vadd.f32 %v297_v10, %v273_v9  ;;  %v92_v12 = vpop.f32.mrb[1].mxu0 }
  0xdf   :  { %v93_v13 = vadd.f32 %v273_v9, %v92_v12  ;;  %v298_v14 = vpop.f32.mrb[2].mxu0 }
  0xe0   :  { %v111_v15 = vmul.f32 0.5, %v101_v11  ;;  %v119_v16 = vmul.f32 1.442695, %v101_v11  ;;  %v95_v17 = vpop.f32.mrb[3].mxu0  ;;  %vm108_vm1 = vcmp.gt.f32.partialorder %v101_v11, 0.0 }
  0xe1   :  { %v115_v18 = vmul.f32 1.442695, %v93_v13  ;;  %v96_v19 = vadd.f32 %v273_v9, %v95_v17  ;;  %v109_v20 = vmul.f32 0.5, %v93_v13  ;;  %vm106_vm2 = vcmp.gt.f32.partialorder %v93_v13, 0.0 }
  0xe2   :  { %311 = vpow2.f32 %v119_v16 }
  0xe3   :  { %v117_v21 = vmul.f32 1.442695, %v96_v19  ;;  %313 = vtanh.f32 %v111_v15  ;;  %v110_v22 = vmul.f32 0.5, %v96_v19  ;;  %vm107_vm3 = vcmp.gt.f32.partialorder %v96_v19, 0.0 }
  0xe4   :  { %315 = vpow2.f32 %v115_v18 }
  0xe5   :  { %317 = vtanh.f32 %v109_v20 }
  0xe6   :  { %319 = vpow2.f32 %v117_v21 }
  0xe7   :  { %321 = vtanh.f32 %v110_v22 }
  0xec   :  { %v312_v23 = vpop.eup %311 }
  0xed   :  { %v314_v24 = vpop.eup %313  ;;  %v123_v25 = vadd.f32 1.0, %v312_v23 }
  0xee   :  { %v316_v26 = vpop.eup %315 }
  0xef   :  { %v318_v27 = vpop.eup %317  ;;  %v121_v28 = vadd.f32 1.0, %v316_v26  ;;  %v126_v30 = vmul.f32 %v314_v24, %v123_v25 }
  0xf0   :  { %v320_v29 = vpop.eup %319 }
  0xf1   :  { %v122_v31 = vadd.f32 1.0, %v320_v29  ;;  %v124_v32 = vmul.f32 %v318_v27, %v121_v28  ;;  %v322_v33 = vpop.eup %321  ;;  %v129_v35 = vsel %vm108_vm1, %v101_v11, %v126_v30 }
  0xf2   :  { %v131_v39 = vpack.c.bf16 %v129_v35, %v129_v35 }
  0xf3   :  { %v125_v34 = vmul.f32 %v322_v33, %v122_v31  ;;  %v127_v36 = vsel %vm106_vm2, %v93_v13, %v124_v32 }
  0xf5   :  { %v128_v37 = vsel %vm107_vm3, %v96_v19, %v125_v34 }
  0xf6   :  { %v130_v38 = vpack.c.bf16 %v128_v37, %v127_v36 }
  0xf8   :  { %303 = vmatprep.mubr.msk.bf16.mxu1 %vm51_vm0, %v130_v38 }
  0xf9   :  { %304 = vmatmul.mubr.msk.bf16.vlgmr.msra.gmra.mrb[0].mxu1 %vm51_vm0, %v131_v39 }
 0x1cc   :  { %v305_v41 = vpop.f32.mrb[0].mxu1 }
 0x1cd   :  { %v204_v42 = vadd.f32 %v305_v41, %v278_v40  ;;  %v195_v43 = vpop.f32.mrb[1].mxu1 }
 0x1ce   :  { %v196_v44 = vadd.f32 %v278_v40, %v195_v43  ;;  %v306_v45 = vpop.f32.mrb[2].mxu1 }
 0x1cf   :  { %v214_v46 = vmul.f32 0.5, %v204_v42  ;;  %v222_v47 = vmul.f32 1.442695, %v204_v42  ;;  %v198_v48 = vpop.f32.mrb[3].mxu1  ;;  %vm211_vm4 = vcmp.gt.f32.partialorder %v204_v42, 0.0 }
 0x1d0   :  { %v218_v49 = vmul.f32 1.442695, %v196_v44  ;;  %v199_v50 = vadd.f32 %v278_v40, %v198_v48  ;;  %v212_v51 = vmul.f32 0.5, %v196_v44  ;;  %vm209_vm5 = vcmp.gt.f32.partialorder %v196_v44, 0.0 }
 0x1d1   :  { %323 = vpow2.f32 %v222_v47 }
 0x1d2   :  { %v220_v52 = vmul.f32 1.442695, %v199_v50  ;;  %325 = vtanh.f32 %v214_v46  ;;  %v213_v53 = vmul.f32 0.5, %v199_v50  ;;  %vm210_vm6 = vcmp.gt.f32.partialorder %v199_v50, 0.0 }
 0x1d3   :  { %327 = vpow2.f32 %v218_v49 }
 0x1d4   :  { %329 = vtanh.f32 %v212_v51 }
 0x1d5   :  { %331 = vpow2.f32 %v220_v52 }
 0x1d6   :  { %333 = vtanh.f32 %v213_v53 }
 0x1db   :  { %v324_v54 = vpop.eup %323 }
 0x1dc   :  { %v326_v55 = vpop.eup %325  ;;  %v226_v56 = vadd.f32 1.0, %v324_v54 }
 0x1dd   :  { %v328_v57 = vpop.eup %327 }
 0x1de   :  { %v330_v58 = vpop.eup %329  ;;  %v229_v59 = vmul.f32 %v326_v55, %v226_v56  ;;  %v224_v60 = vadd.f32 1.0, %v328_v57 }
 0x1df   :  { %v332_v61 = vpop.eup %331 }
 0x1e0   :  { %v232_v62 = vsel %vm211_vm4, %v204_v42, %v229_v59  ;;  %v227_v63 = vmul.f32 %v330_v58, %v224_v60  ;;  %v225_v0 = vadd.f32 1.0, %v332_v61  ;;  %v334_v1 = vpop.eup %333 }
 0x1e1   :  { %235 = vst.msk [vmem:[%s427_s5 + $0x10] sm:$0xff] %vm51_vm0, %v232_v62  ;;  %v249_v6 = vmul.f32 %v232_v62, %v232_v62  ;;  %v239_v11 = vsel %vm51_vm0, %v232_v62, 0.0 }
 0x1e2   :  { %v230_v2 = vsel %vm209_vm5, %v196_v44, %v227_v63  ;;  %v228_v3 = vmul.f32 %v334_v1, %v225_v0 }
 0x1e3   :  { %233 = vst.msk [vmem:[%s427_s5] sm:$0xff] %vm51_vm0, %v230_v2  ;;  %v247_v4 = vmul.f32 %v230_v2, %v230_v2  ;;  %v236_v7 = vsel %vm51_vm0, %v230_v2, 0.0  ;;  %v253_v16 = vsel %vm51_vm0, %v249_v6, 0.0 }
 0x1e4   :  { %v231_v5 = vsel %vm210_vm6, %v199_v50, %v228_v3 }
 0x1e5   :  { %234 = vst.msk [vmem:[%s427_s5 + $0x8] sm:$0xff] %vm51_vm0, %v231_v5  ;;  %v237_v8 = vsel %vm51_vm0, %v231_v5, 0.0  ;;  %v248_v9 = vmul.f32 %v231_v5, %v231_v5  ;;  %v250_v12 = vsel %vm51_vm0, %v247_v4, 0.0 }
 0x1e6   :  { %v238_v10 = vadd.f32 %v237_v8, %v236_v7 }
 0x1e7   :  { %v251_v13 = vsel %vm51_vm0, %v248_v9, 0.0 }
 0x1e8   :  { %v240_v14 = vadd.f32 %v239_v11, %v238_v10  ;;  %v252_v15 = vadd.f32 %v251_v13, %v250_v12 }
 0x1ea   :  { %v241_v17 = vrot.slane %v240_v14, 4  ;;  %v254_v18 = vadd.f32 %v253_v16, %v252_v15 }
 0x1ec   :  { %v242_v19 = vadd.f32 %v241_v17, %v240_v14  ;;  %v255_v20 = vrot.slane %v254_v18, 4 }
 0x1ee   :  { %v243_v21 = vrot.slane %v242_v19, 2  ;;  %v256_v22 = vadd.f32 %v255_v20, %v254_v18 }
 0x1f0   :  { %v244_v23 = vadd.f32 %v243_v21, %v242_v19  ;;  %v257_v24 = vrot.slane %v256_v22, 2 }
 0x1f2   :  { %v245_v25 = vrot.slane %v244_v23, 1  ;;  %v258_v26 = vadd.f32 %v257_v24, %v256_v22 }
 0x1f4   :  { %v259_v27 = vrot.slane %v258_v26, 1  ;;  %v246_v28 = vadd.f32 %v245_v25, %v244_v23 }
 0x1f6   :  { %v260_v29 = vadd.f32 %v259_v27, %v258_v26 }
 0x1f8   :  { %v262_v30 = vsel %vm261_vm7, %v246_v28, %v260_v29 }
 0x1f9   :  { %264 = vst.msk [vmem:[%s428_s6] sm:$0x3] %vm263_vm8, %v262_v30 }

// kernel: encoder_forward.8
= control target key start
LH: loop header
LB: loop body
LE: loop exit
PB: predicated region body
PF: predicated region fallthrough
CT: control target
= control target key end

     0   :  { %s2374_s21 = smov 0   ;;  %s2993_s0 = inlined_call_operand.vmem [shape: f32[24,16,32], index: 0, kind: input, shape index: {}]   ;;  %s2994_s1 = inlined_call_operand.vmem [shape: f32[1,32], index: 1, kind: input, shape index: {}]   ;;  %s2995_s2 = inlined_call_operand.vmem [shape: f32[1,32], index: 2, kind: input, shape index: {}]   ;;  %s2996_s3 = inlined_call_operand.vmem [shape: bf16[5,32,32], index: 3, kind: input, shape index: {}]   ;;  %s2997_s4 = inlined_call_operand.vmem [shape: f32[1,32], index: 4, kind: input, shape index: {}]   ;;  %s2998_s5 = inlined_call_operand.vmem [shape: f32[24,16,32], index: 5, kind: output, shape index: {0}]   ;;  %s2999_s6 = inlined_call_operand.vmem [shape: f32[2,2,32], index: 6, kind: output, shape index: {1}]  }
   0x1 LB: > { %s2380_s22 = sadd.s32 4294967295, %s2337_s21   ;;  %p1904_p0 = scmp.ge.s32.totalorder %s2337_s21, 1  ;;  %s2337_s21 = sphi %s2374_s21, %s17_s21  }
   0x2   : > { %p217_p1 = scmp.lt.s32.totalorder %s2337_s21, 3 }
   0x4   : > { %p218_p2 = pnand %p1904_p0, %p217_p1 }
   0x5   : > { %v2321_v0 = vld [vmem:[%s2996_s3 + $0x10] sm:$0xff] (!%p218_p2)   ;;  %s253_s25 = smul.u32 (!%p218_p2), 12, %s2380_s22  ;;  %v2391_v1 = vld [vmem:[%s2996_s3 + $0x20] sm:$0xff] (!%p218_p2)   ;;  %v2323_v2 = vld [vmem:[%s2996_s3 + $0x18] sm:$0xff] (!%p218_p2)   ;;  %vm466_vm0 = vcmask (!%p218_p2), 1043456   ;;  %vm508_vm1 = vcmask (!%p218_p2), 1046528  }
   0x6   : > { %221 = sbr.rel (%p218_p2) target bundleno = 396 (0x18c), region = 40  ;;  %2073 = vmatprep.subr.bf16.mxu1 (!%p218_p2), %v2321_v0  ;;  %2129 = vmatprep.subr.bf16.mxu0 (!%p218_p2), %v2391_v1  ;;  %v2400_v3 = vld [vmem:[%s2996_s3 + $0x28] sm:$0xff] (!%p218_p2)   ;;  %v2408_v4 = vld [vmem:[%s2994_s1] ss:$0 sm:$0xff] (!%p218_p2)  ;;  %v2420_v6 = vld [vmem:[%s2996_s3 + $0x30] sm:$0xff] (!%p218_p2)   ;;  %vm893_vm2 = vcmask (!%p218_p2), 1045504  }
   0x7   : > { %p254_p3 = scmp.lt.s32.totalorder (!%p218_p2), %s253_s25, 23  ;;  %2074 = vmatpush3.bf16.msra.mxu1 (!%p218_p2), %v2321_v0  ;;  %2130 = vmatpush3.bf16.msra.mxu0 (!%p218_p2), %v2391_v1  ;;  %v2414_v5 = vld [vmem:[%s2996_s3] sm:$0xff] (!%p218_p2)   ;;  %vm562_vm5 = vcmask (!%p218_p2), 261120   ;;  %vm1136_vm12 = vcmask (!%p218_p2), 1044480   ;;  %p267_p4 = scmp.lt.s32.totalorder (!%p218_p2), %s2380_s22, 1 }
   0x8   : > { %2075 = vmatprep.subr.bf16.mxu1 (!%p218_p2), %v2323_v2  ;;  %2131 = vmatprep.subr.bf16.mxu0 (!%p218_p2), %v2400_v3  ;;  %v2432_v7 = vld [vmem:[%s2995_s2] ss:$0 sm:$0xff] (!%p218_p2) }
   0xb   : > { %2076 = vmatpush3.bf16.msra.mxu1 (!%p218_p2), %v2323_v2  ;;  %2132 = vmatpush3.bf16.msra.mxu0 (!%p218_p2), %v2400_v3 }
   0xc   : > { %2101 = vmatprep.subr.bf16.mxu1 (!%p218_p2), %v2414_v5  ;;  %2157 = vmatprep.subr.bf16.mxu0 (!%p218_p2), %v2420_v6 }
   0xd   : > { %s3001_s25 = smov (!%p254_p3, %s253_s25), 23  ;;  %s3003_s22 = smov (!%p267_p4, %s2380_s22), 1 }
   0xe   : > { %s2001_s12 = sshll.u32 %s3001_s25, 4  ;;  %s1909_s25 = sshll.u32 %s3003_s22, 1 }
   0xf   : > { %s2427_s17 = scalar_lea.vmem %s2993_s0, %s2001_s12  ;;  %s2859_s11 = scalar_lea.vmem %s2998_s5, %s2001_s12 }
  0x10   : > { %v272_v8 = vld [vmem:[%s2427_s17] sm:$0xff]  ;;  %v273_v9 = vld [vmem:[%s2427_s17 + $0x8] sm:$0xff]  ;;  %v274_v10 = vld [vmem:[%s2427_s17 + $0x10] sm:$0xff]  ;;  %s270_s14 = scalar_lea.vmem %s2999_s6, %s1909_s25 }
  0x11   : > { %v303_v11 = vmul.f32 %v2408_v4, %v272_v8  ;;  %v304_v12 = vmul.f32 %v2408_v4, %v273_v9  ;;  %v275_v13 = vld [vmem:[%s2427_s17 + $0x18] sm:$0xff]  ;;  %v305_v14 = vmul.f32 %v2408_v4, %v274_v10  ;;  %v276_v15 = vld [vmem:[%s2427_s17 + $0x20] sm:$0xff]  ;;  %v277_v16 = vld [vmem:[%s2427_s17 + $0x28] sm:$0xff] }
  0x12   : > { %v306_v17 = vmul.f32 %v2408_v4, %v275_v13  ;;  %v307_v18 = vmul.f32 %v2408_v4, %v276_v15  ;;  %v308_v19 = vmul.f32 %v2408_v4, %v277_v16  ;;  %v278_v20 = vld [vmem:[%s2427_s17 + $0x30] sm:$0xff]  ;;  %v279_v21 = vld [vmem:[%s2427_s17 + $0x38] sm:$0xff]  ;;  %v280_v36 = vld [vmem:[%s2427_s17 + $0x40] sm:$0xff] }
  0x13   : > { %v334_v22 = vadd.f32 %v2432_v7, %v303_v11  ;;  %v335_v23 = vadd.f32 %v2432_v7, %v304_v12  ;;  %v336_v24 = vadd.f32 %v2432_v7, %v305_v14  ;;  %v309_v25 = vmul.f32 %v2408_v4, %v278_v20  ;;  %v281_v37 = vld [vmem:[%s2427_s17 + $0x48] sm:$0xff]  ;;  %v2327_v10 = vld [vmem:[%s2996_s3 + $0x38] sm:$0xff]   ;;  %v282_v15 = vld [vmem:[%s2427_s17 + $0x50] sm:$0xff] }
  0x14   : > { %v337_v26 = vadd.f32 %v2432_v7, %v306_v17  ;;  %v338_v27 = vadd.f32 %v2432_v7, %v307_v18  ;;  %v339_v28 = vadd.f32 %v2432_v7, %v308_v19  ;;  %v310_v29 = vmul.f32 %v2408_v4, %v279_v21  ;;  %v2328_v20 = vld [vmem:[%s2996_s3 + $0x8] sm:$0xff]  }
  0x15   : > { %vm358_vm3 = vcmp.ge.f32.partialorder %v334_v22, 0.0  ;;  %vm359_vm4 = vcmp.ge.f32.partialorder %v335_v23, 0.0  ;;  %v382_v30 = vmul.f32 0.01, %v334_v22  ;;  %v383_v31 = vmul.f32 0.01, %v335_v23 }
  0x16   : > { %vm360_vm6 = vcmp.ge.f32.partialorder %v336_v24, 0.0  ;;  %vm361_vm7 = vcmp.ge.f32.partialorder %v337_v26, 0.0  ;;  %v384_v32 = vmul.f32 0.01, %v336_v24  ;;  %v385_v33 = vmul.f32 0.01, %v337_v26 }
  0x17   : > { %v406_v34 = vsel %vm358_vm3, %v334_v22, %v382_v30  ;;  %v407_v35 = vsel %vm359_vm4, %v335_v23, %v383_v31  ;;  %vm362_vm8 = vcmp.ge.f32.partialorder %v338_v27, 0.0  ;;  %vm363_vm9 = vcmp.ge.f32.partialorder %v339_v28, 0.0  ;;  %v285_v30 = vld [vmem:[%s2427_s17 + $0x68] sm:$0xff] }
  0x18   : > { %v430_v38 = vpack.c.bf16 %v407_v35, %v406_v34  ;;  %v408_v39 = vsel %vm360_vm6, %v336_v24, %v384_v32  ;;  %v409_v40 = vsel %vm361_vm7, %v337_v26, %v385_v33  ;;  %v386_v41 = vmul.f32 0.01, %v338_v27  ;;  %v283_v24 = vld [vmem:[%s2427_s17 + $0x58] sm:$0xff] }
  0x19   : > { %v431_v42 = vpack.c.bf16 %v409_v40, %v408_v39  ;;  %v387_v43 = vmul.f32 0.01, %v339_v28  ;;  %v340_v44 = vadd.f32 %v2432_v7, %v309_v25  ;;  %v341_v45 = vadd.f32 %v2432_v7, %v310_v29  ;;  %v284_v25 = vld [vmem:[%s2427_s17 + $0x60] sm:$0xff] }
  0x1a   : > { %v2463_v46 = vrot.slane %v430_v38, 4  ;;  %v410_v47 = vsel %vm362_vm8, %v338_v27, %v386_v41  ;;  %v311_v48 = vmul.f32 %v2408_v4, %v280_v36  ;;  %v312_v49 = vmul.f32 %v2408_v4, %v281_v37 }
  0x1b   : > { %v2467_v50 = vrot.slane %v431_v42, 4  ;;  %v411_v51 = vsel %vm363_vm9, %v339_v28, %v387_v43  ;;  %vm364_vm10 = vcmp.ge.f32.partialorder %v340_v44, 0.0  ;;  %vm365_vm11 = vcmp.ge.f32.partialorder %v341_v45, 0.0 }
  0x1c   : > { %v2472_v52 = vsel %vm466_vm0, 0, %v2463_v46  ;;  %v510_v53 = vrot.slane %v2463_v46, 1  ;;  %v895_v54 = vrot.slane %v2463_v46, 2  ;;  %v432_v55 = vpack.c.bf16 %v411_v51, %v410_v47 }
  0x1d   : > { %v509_v56 = vrot.slane %v2472_v52, 1  ;;  %v894_v57 = vrot.slane %v2472_v52, 2  ;;  %v2480_v58 = vsel %vm466_vm0, 0, %v2467_v50  ;;  %v513_v59 = vrot.slane %v2467_v50, 1 }
  0x1e   : > { %v512_v60 = vrot.slane %v2480_v58, 1  ;;  %v897_v61 = vrot.slane %v2480_v58, 2  ;;  %v898_v62 = vrot.slane %v2467_v50, 2  ;;  %v2486_v63 = vrot.slane %v432_v55, 4 }
  0x1f   : > { %v511_v0 = vsel %vm508_vm1, %v509_v56, %v510_v53  ;;  %v896_v2 = vsel %vm893_vm2, %v894_v57, %v895_v54  ;;  %v388_v8 = vmul.f32 0.01, %v340_v44  ;;  %v389_v9 = vmul.f32 0.01, %v341_v45 }
  0x20   : > { %2077 = vmatprep.mubr.msk.bf16.mxu1 %vm562_vm5, %v511_v0  ;;  %2133 = vmatprep.mubr.msk.bf16.mxu0 %vm562_vm5, %v896_v2  ;;  %v514_v11 = vsel %vm508_vm1, %v512_v60, %v513_v59  ;;  %v899_v12 = vsel %vm893_vm2, %v897_v61, %v898_v62  ;;  %v2499_v13 = vsel %vm466_vm0, 0, %v2486_v63  ;;  %v516_v14 = vrot.slane %v2486_v63, 1  ;;  %v286_v0 = vld [vmem:[%s2427_s17 + $0x70] sm:$0xff] }
  0x21   : > { %2078 = vmatmul.mubr.msk.bf16.vlgmr.msra.gmra.mrb[0].mxu1 %vm562_vm5, %v514_v11  ;;  %2134 = vmatmul.mubr.msk.bf16.vlgmr.msra.gmra.mrb[0].mxu0 %vm562_vm5, %v899_v12  ;;  %v515_v16 = vrot.slane %v2499_v13, 1  ;;  %v900_v17 = vrot.slane %v2499_v13, 2  ;;  %v901_v18 = vrot.slane %v2486_v63, 2  ;;  %v412_v19 = vsel %vm364_vm10, %v340_v44, %v388_v8 }
  0x22   : > { %2102 = vmatpush3.bf16.msra.mxu1 %v2414_v5  ;;  %2158 = vmatpush3.bf16.msra.mxu0 %v2420_v6  ;;  %v413_v21 = vsel %vm365_vm11, %v341_v45, %v389_v9  ;;  %v342_v22 = vadd.f32 %v2432_v7, %v311_v48  ;;  %v343_v23 = vadd.f32 %v2432_v7, %v312_v49  ;;  %v1137_v26 = vrot.slane %v2472_v52, 3  ;;  %v2527_v6 = vld [vmem:[%s2996_s3 + $0x40] sm:$0xff]  }
  0x23   : > { %v517_v27 = vsel %vm508_vm1, %v515_v16, %v516_v14  ;;  %v902_v28 = vsel %vm893_vm2, %v900_v17, %v901_v18  ;;  %v433_v29 = vpack.c.bf16 %v413_v21, %v412_v19  ;;  %2159 = vmatprep.subr.bf16.mxu0 %v2327_v10  ;;  %v313_v5 = vmul.f32 %v2408_v4, %v282_v15 }
  0x24   : > { %2081 = vmatprep.mubr.msk.bf16.mxu1 %vm562_vm5, %v517_v27  ;;  %2137 = vmatprep.mubr.msk.bf16.mxu0 %vm562_vm5, %v902_v28  ;;  %vm366_vm13 = vcmp.ge.f32.partialorder %v342_v22, 0.0  ;;  %vm367_vm14 = vcmp.ge.f32.partialorder %v343_v23, 0.0  ;;  %v390_v31 = vmul.f32 0.01, %v342_v22  ;;  %v391_v32 = vmul.f32 0.01, %v343_v23 }
  0x25   : > { %v2531_v33 = vrot.slane %v433_v29, 4  ;;  %v314_v34 = vmul.f32 %v2408_v4, %v283_v24  ;;  %v344_v35 = vadd.f32 %v2432_v7, %v313_v5  ;;  %v315_v36 = vmul.f32 %v2408_v4, %v284_v25  ;;  %2103 = vmatprep.subr.bf16.mxu1 %v2328_v20 }
  0x26   : > { %2160 = vmatpush3.bf16.msra.mxu0 %v2327_v10  ;;  %v414_v37 = vsel %vm366_vm13, %v342_v22, %v390_v31  ;;  %v415_v38 = vsel %vm367_vm14, %v343_v23, %v391_v32  ;;  %v316_v39 = vmul.f32 %v2408_v4, %v285_v30  ;;  %v1138_v40 = vrot.slane %v2463_v46, 3  ;;  %2104 = vmatpush3.bf16.msra.mxu1 %v2328_v20  ;;  %v287_v10 = vld [vmem:[%s2427_s17 + $0x78] sm:$0xff] }
  0x27   : > { %v2540_v41 = vsel %vm466_vm0, 0, %v2531_v33  ;;  %v519_v42 = vrot.slane %v2531_v33, 1  ;;  %v904_v43 = vrot.slane %v2531_v33, 2  ;;  %v434_v44 = vpack.c.bf16 %v415_v38, %v414_v37  ;;  %2185 = vmatprep.subr.bf16.mxu0 %v2527_v6  ;;  %2213 = vmatprep.subr.bf16.mxu1 %v2391_v1  ;;  %v289_v38 = vld [vmem:[%s2427_s17 + $0x88] sm:$0xff] }
  0x28   : > { %v518_v45 = vrot.slane %v2540_v41, 1  ;;  %v903_v47 = vrot.slane %v2540_v41, 2  ;;  %v345_v48 = vadd.f32 %v2432_v7, %v314_v34  ;;  %vm368_vm15 = vcmp.ge.f32.partialorder %v344_v35, 0.0  ;;  %v288_v34 = vld [vmem:[%s2427_s17 + $0x80] sm:$0xff] }
  0x29   : > { %v2549_v49 = vrot.slane %v434_v44, 4  ;;  %v392_v51 = vmul.f32 0.01, %v344_v35  ;;  %v346_v53 = vadd.f32 %v2432_v7, %v315_v36  ;;  %v347_v54 = vadd.f32 %v2432_v7, %v316_v39  ;;  %v290_v44 = vld [vmem:[%s2427_s17 + $0x90] sm:$0xff] }
  0x2a   : > { %v520_v55 = vsel %vm508_vm1, %v518_v45, %v519_v42  ;;  %v905_v56 = vsel %vm893_vm2, %v903_v47, %v904_v43  ;;  %vm369_vm3 = vcmp.ge.f32.partialorder %v345_v48, 0.0  ;;  %v393_v57 = vmul.f32 0.01, %v345_v48  ;;  %v291_v45 = vld [vmem:[%s2427_s17 + $0x98] sm:$0xff] }
  0x2b   : > { %2082 = vmatmul.mubr.msk.bf16.gmra.mrb[4].mxu1 %vm562_vm5, %v520_v55  ;;  %2138 = vmatmul.mubr.msk.bf16.gmra.mrb[4].mxu0 %vm562_vm5, %v905_v56  ;;  %v2559_v59 = vsel %vm466_vm0, 0, %v2549_v49  ;;  %v522_v60 = vrot.slane %v2549_v49, 1  ;;  %v907_v61 = vrot.slane %v2549_v49, 2  ;;  %v416_v62 = vsel %vm368_vm15, %v344_v35, %v392_v51 }
  0x2c   : > { %v521_v2 = vrot.slane %v2559_v59, 1  ;;  %v906_v8 = vrot.slane %v2559_v59, 2  ;;  %v417_v9 = vsel %vm369_vm3, %v345_v48, %v393_v57  ;;  %vm370_vm4 = vcmp.ge.f32.partialorder %v346_v53, 0.0 }
  0x2d   : > { %v435_v11 = vpack.c.bf16 %v417_v9, %v416_v62  ;;  %vm371_vm6 = vcmp.ge.f32.partialorder %v347_v54, 0.0  ;;  %v394_v12 = vmul.f32 0.01, %v346_v53  ;;  %v395_v14 = vmul.f32 0.01, %v347_v54 }
  0x2e   : > { %v523_v15 = vsel %vm508_vm1, %v521_v2, %v522_v60  ;;  %v908_v16 = vsel %vm893_vm2, %v906_v8, %v907_v61  ;;  %v1139_v17 = vsel %vm1136_vm12, %v1137_v26, %v1138_v40  ;;  %v317_v18 = vmul.f32 %v2408_v4, %v286_v0 }
  0x2f   : > { %2085 = vmatprep.mubr.msk.bf16.mxu1 %vm562_vm5, %v523_v15  ;;  %2141 = vmatprep.mubr.msk.bf16.mxu0 %vm562_vm5, %v908_v16  ;;  %v2575_v19 = vrot.slane %v435_v11, 4  ;;  %v418_v20 = vsel %vm370_vm4, %v346_v53, %v394_v12  ;;  %v419_v21 = vsel %vm371_vm6, %v347_v54, %v395_v14  ;;  %v318_v22 = vmul.f32 %v2408_v4, %v287_v10  ;;  %v292_v15 = vld [vmem:[%s2427_s17 + $0xa0] sm:$0xff] }
  0x30   : > { %v436_v23 = vpack.c.bf16 %v419_v21, %v418_v20  ;;  %v348_v24 = vadd.f32 %v2432_v7, %v317_v18  ;;  %v1140_v25 = vrot.slane %v2480_v58, 3  ;;  %v1141_v26 = vrot.slane %v2467_v50, 3  ;;  %v293_v20 = vld [vmem:[%s2427_s17 + $0xa8] sm:$0xff] }
  0x31   : > { %v2583_v27 = vsel %vm466_vm0, 0, %v2575_v19  ;;  %v525_v28 = vrot.slane %v2575_v19, 1  ;;  %v910_v29 = vrot.slane %v2575_v19, 2  ;;  %v349_v5 = vadd.f32 %v2432_v7, %v318_v22 }
  0x32   : > { %v524_v30 = vrot.slane %v2583_v27, 1  ;;  %v909_v31 = vrot.slane %v2583_v27, 2  ;;  %v2590_v32 = vrot.slane %v436_v23, 4  ;;  %vm372_vm7 = vcmp.ge.f32.partialorder %v348_v24, 0.0  ;;  %v2330_v23 = vld [vmem:[%s2996_s3 + $0x48] sm:$0xff]  }
  0x33   : > { %vm373_vm8 = vcmp.ge.f32.partialorder %v349_v5, 0.0  ;;  %v396_v35 = vmul.f32 0.01, %v348_v24  ;;  %v397_v36 = vmul.f32 0.01, %v349_v5  ;;  %v1142_v37 = vsel %vm1136_vm12, %v1140_v25, %v1141_v26 }
  0x34   : > { %v526_v39 = vsel %vm508_vm1, %v524_v30, %v525_v28  ;;  %v911_v40 = vsel %vm893_vm2, %v909_v31, %v910_v29  ;;  %v2599_v42 = vsel %vm466_vm0, 0, %v2590_v32  ;;  %v528_v43 = vrot.slane %v2590_v32, 1 }
  0x35   : > { %2086 = vmatmul.mubr.msk.bf16.gmra.mrb[8].mxu1 %vm562_vm5, %v526_v39  ;;  %2142 = vmatmul.mubr.msk.bf16.gmra.mrb[8].mxu0 %vm562_vm5, %v911_v40  ;;  %v527_v47 = vrot.slane %v2599_v42, 1  ;;  %v420_v48 = vsel %vm372_vm7, %v348_v24, %v396_v35  ;;  %v421_v51 = vsel %vm373_vm8, %v349_v5, %v397_v36  ;;  %v319_v53 = vmul.f32 %v2408_v4, %v288_v34  ;;  %v294_v34 = vld [vmem:[%s2427_s17 + $0xb0] sm:$0xff]  ;;  %v295_v35 = vld [vmem:[%s2427_s17 + $0xb8] sm:$0xff] }
  0x36   : > { %2161 = vmatprep.mubr.msk.bf16.mxu0 %vm562_vm5, %v1139_v17  ;;  %v437_v54 = vpack.c.bf16 %v421_v51, %v420_v48  ;;  %v320_v55 = vmul.f32 %v2408_v4, %v289_v38  ;;  %v1143_v56 = vrot.slane %v2499_v13, 3  ;;  %v1144_v57 = vrot.slane %v2486_v63, 3 }
  0x37   : > { %v529_v60 = vsel %vm508_vm1, %v527_v47, %v528_v43  ;;  %v350_v61 = vadd.f32 %v2432_v7, %v319_v53  ;;  %v321_v62 = vmul.f32 %v2408_v4, %v290_v44  ;;  %v322_v0 = vmul.f32 %v2408_v4, %v291_v45 }
  0x38   : > { %2089 = vmatprep.mubr.msk.bf16.mxu1 %vm562_vm5, %v529_v60  ;;  %v2618_v2 = vrot.slane %v437_v54, 4  ;;  %v351_v8 = vadd.f32 %v2432_v7, %v320_v55  ;;  %v1145_v9 = vsel %vm1136_vm12, %v1143_v56, %v1144_v57  ;;  %v1146_v10 = vrot.slane %v2540_v41, 3 }
  0x39   : > { %vm374_vm9 = vcmp.ge.f32.partialorder %v350_v61, 0.0  ;;  %v398_v11 = vmul.f32 0.01, %v350_v61  ;;  %v352_v12 = vadd.f32 %v2432_v7, %v321_v62  ;;  %v353_v14 = vadd.f32 %v2432_v7, %v322_v0 }
  0x3a   : > { %v2628_v16 = vsel %vm466_vm0, 0, %v2618_v2  ;;  %v531_v17 = vrot.slane %v2618_v2, 1  ;;  %vm375_vm10 = vcmp.ge.f32.partialorder %v351_v8, 0.0  ;;  %v399_v18 = vmul.f32 0.01, %v351_v8 }
  0x3b   : > { %v530_v21 = vrot.slane %v2628_v16, 1  ;;  %v422_v22 = vsel %vm374_vm9, %v350_v61, %v398_v11  ;;  %vm376_vm11 = vcmp.ge.f32.partialorder %v352_v12, 0.0  ;;  %vm377_vm13 = vcmp.ge.f32.partialorder %v353_v14, 0.0 }
  0x3c   : > { %v423_v24 = vsel %vm375_vm10, %v351_v8, %v399_v18  ;;  %v400_v25 = vmul.f32 0.01, %v352_v12  ;;  %v401_v26 = vmul.f32 0.01, %v353_v14  ;;  %v1147_v28 = vrot.slane %v2531_v33, 3 }
  0x3d   : > { %v532_v29 = vsel %vm508_vm1, %v530_v21, %v531_v17  ;;  %2162 = vmatmul.mubr.msk.bf16.vlgmr.msra.gmra.mrb[0].mxu0 %vm562_vm5, %v1142_v37  ;;  %v438_v5 = vpack.c.bf16 %v423_v24, %v422_v22  ;;  %v323_v30 = vmul.f32 %v2408_v4, %v292_v15  ;;  %v324_v31 = vmul.f32 %v2408_v4, %v293_v20 }
  0x3e   : > { %2090 = vmatmul.mubr.msk.bf16.gmra.mrb[12].mxu1 %vm562_vm5, %v532_v29  ;;  %2186 = vmatpush3.bf16.msra.mxu0 %v2527_v6  ;;  %v424_v36 = vsel %vm376_vm11, %v352_v12, %v400_v25  ;;  %v425_v38 = vsel %vm377_vm13, %v353_v14, %v401_v26  ;;  %v1148_v39 = vsel %vm1136_vm12, %v1146_v10, %v1147_v28  ;;  %v1149_v40 = vrot.slane %v2559_v59, 3 }
  0x3f   : > { %v2649_v37 = vrot.slane %v438_v5, 4  ;;  %2165 = vmatprep.mubr.msk.bf16.mxu0 %vm562_vm5, %v1145_v9  ;;  %v439_v43 = vpack.c.bf16 %v425_v38, %v424_v36  ;;  %v354_v44 = vadd.f32 %v2432_v7, %v323_v30  ;;  %v355_v45 = vadd.f32 %v2432_v7, %v324_v31  ;;  %2187 = vmatprep.subr.bf16.mxu0 %v2330_v23 }
  0x40   : > { %v1150_v6 = vrot.slane %v2549_v49, 3  ;;  %v325_v47 = vmul.f32 %v2408_v4, %v294_v34  ;;  %v326_v48 = vmul.f32 %v2408_v4, %v295_v35  ;;  %v1152_v51 = vrot.slane %v2583_v27, 3 }
  0x41   : > { %v2660_v53 = vsel %vm466_vm0, 0, %v2649_v37  ;;  %v534_v54 = vrot.slane %v2649_v37, 1  ;;  %v2663_v55 = vrot.slane %v439_v43, 4  ;;  %vm378_vm14 = vcmp.ge.f32.partialorder %v354_v44, 0.0 }
  0x42   : > { %v533_v56 = vrot.slane %v2660_v53, 1  ;;  %vm379_vm15 = vcmp.ge.f32.partialorder %v355_v45, 0.0  ;;  %v402_v57 = vmul.f32 0.01, %v354_v44  ;;  %v403_v60 = vmul.f32 0.01, %v355_v45  ;;  %2188 = vmatpush3.bf16.msra.mxu0 %v2330_v23 }
  0x43   : > { %v2668_v4 = vsel %vm466_vm0, 0, %v2663_v55  ;;  %v537_v61 = vrot.slane %v2663_v55, 1  ;;  %v1151_v62 = vsel %vm1136_vm12, %v1149_v40, %v1150_v6  ;;  %v356_v0 = vadd.f32 %v2432_v7, %v325_v47 }
  0x44   : > { %v535_v8 = vsel %vm508_vm1, %v533_v56, %v534_v54  ;;  %v536_v9 = vrot.slane %v2668_v4, 1  ;;  %v426_v10 = vsel %vm378_vm14, %v354_v44, %v402_v57  ;;  %v427_v11 = vsel %vm379_vm15, %v355_v45, %v403_v60 }
  0x45   : > { %2093 = vmatprep.mubr.msk.bf16.mxu1 %vm562_vm5, %v535_v8  ;;  %2166 = vmatmul.mubr.msk.bf16.gmra.mrb[4].mxu0 %vm562_vm5, %v1148_v39  ;;  %v440_v12 = vpack.c.bf16 %v427_v11, %v426_v10  ;;  %v357_v14 = vadd.f32 %v2432_v7, %v326_v48  ;;  %vm380_vm3 = vcmp.ge.f32.partialorder %v356_v0, 0.0  ;;  %v404_v15 = vmul.f32 0.01, %v356_v0 }
  0x46   : > { %v538_v17 = vsel %vm508_vm1, %v536_v9, %v537_v61  ;;  %2169 = vmatprep.mubr.msk.bf16.mxu0 %vm562_vm5, %v1151_v62  ;;  %v1153_v18 = vrot.slane %v2575_v19, 3  ;;  %v1155_v20 = vrot.slane %v2599_v42, 3  ;;  %v1156_v21 = vrot.slane %v2590_v32, 3 }
  0x47   : > { %2094 = vmatmul.mubr.msk.bf16.gmra.mrb[16].mxu1 %vm562_vm5, %v538_v17  ;;  %v2684_v22 = vrot.slane %v440_v12, 4  ;;  %vm381_vm4 = vcmp.ge.f32.partialorder %v357_v14, 0.0  ;;  %v405_v23 = vmul.f32 0.01, %v357_v14  ;;  %v428_v24 = vsel %vm380_vm3, %v356_v0, %v404_v15 }
  0x48   : > { %v1158_v7 = vrot.slane %v2628_v16, 3  ;;  %v1159_v25 = vrot.slane %v2618_v2, 3  ;;  %v1154_v31 = vsel %vm1136_vm12, %v1152_v51, %v1153_v18  ;;  %v1157_v34 = vsel %vm1136_vm12, %v1155_v20, %v1156_v21 }
  0x49   : > { %v2690_v26 = vsel %vm466_vm0, 0, %v2684_v22  ;;  %v540_v28 = vrot.slane %v2684_v22, 1  ;;  %v429_v29 = vsel %vm381_vm4, %v357_v14, %v405_v23  ;;  %v1161_v36 = vrot.slane %v2660_v53, 3 }
  0x4a   : > { %v539_v5 = vrot.slane %v2690_v26, 1  ;;  %v441_v30 = vpack.c.bf16 %v429_v29, %v428_v24  ;;  %v1160_v35 = vsel %vm1136_vm12, %v1158_v7, %v1159_v25  ;;  %v1162_v38 = vrot.slane %v2649_v37, 3 }
  0x4b   : > { %v1164_v43 = vrot.slane %v2668_v4, 3  ;;  %v1380_v44 = vrot.slane %v2472_v52, 4  ;;  %v1165_v45 = vrot.slane %v2663_v55, 3  ;;  %v1167_v6 = vrot.slane %v2690_v26, 3 }
  0x4c   : > { %v541_v39 = vsel %vm508_vm1, %v539_v5, %v540_v28  ;;  %v2700_v40 = vrot.slane %v441_v30, 4  ;;  %v1381_v47 = vrot.slane %v2463_v46, 4  ;;  %v1383_v48 = vrot.slane %v2480_v58, 4 }
  0x4d   : > { %2097 = vmatprep.mubr.msk.bf16.mxu1 %vm562_vm5, %v541_v39  ;;  %2170 = vmatmul.mubr.msk.bf16.gmra.mrb[8].mxu0 %vm562_vm5, %v1154_v31  ;;  %v1168_v56 = vrot.slane %v2684_v22, 3  ;;  %v1384_v57 = vrot.slane %v2467_v50, 4  ;;  %v1163_v61 = vsel %vm1136_vm12, %v1161_v36, %v1162_v38  ;;  %v1386_v62 = vrot.slane %v2499_v13, 4 }
  0x4e   : > { %v2712_v51 = vsel %vm466_vm0, 0, %v2700_v40  ;;  %v543_v54 = vrot.slane %v2700_v40, 1  ;;  %2173 = vmatprep.mubr.msk.bf16.mxu0 %vm562_vm5, %v1157_v34  ;;  %v2721_v46 = vsel %vm466_vm0, %v1380_v44, %v1381_v47  ;;  %v1387_v8 = vrot.slane %v2486_v63, 4 }
  0x4f   : > { %v542_v60 = vrot.slane %v2712_v51, 1  ;;  %v2725_v0 = vsel %vm466_vm0, %v1383_v48, %v1384_v57  ;;  %v1389_v9 = vrot.slane %v2540_v41, 4  ;;  %v1390_v10 = vrot.slane %v2531_v33, 4 }
  0x50   : > { %v1166_v11 = vsel %vm1136_vm12, %v1164_v43, %v1165_v45  ;;  %v1392_v12 = vrot.slane %v2559_v59, 4  ;;  %v1393_v14 = vrot.slane %v2549_v49, 4  ;;  %v2736_v15 = vsel %vm466_vm0, %v1386_v62, %v1387_v8 }
  0x51   : > { %v544_v50 = vsel %vm508_vm1, %v542_v60, %v543_v54  ;;  %v2739_v17 = vsel %vm466_vm0, %v1389_v9, %v1390_v10  ;;  %v1395_v63 = vrot.slane %v2583_v27, 4  ;;  %v1396_v33 = vrot.slane %v2575_v19, 4  ;;  %v2852_v10 = vld [vmem:[%s2997_s4] ss:$0 sm:$0xff] }
  0x52   : > { %2098 = vmatmul.mubr.msk.bf16.gmra.mrb[20].mxu1 %vm562_vm5, %v544_v50  ;;  %v1394_v18 = vsel %vm466_vm0, %v1392_v12, %v1393_v14  ;;  %v912_v20 = vrot.slane %v2599_v42, 2  ;;  %v913_v49 = vrot.slane %v2590_v32, 2  ;;  %v1398_v21 = vrot.slane %v2599_v42, 4 }
  0x53   : > { %2105 = vmatprep.mubr.msk.bf16.mxu1 %vm562_vm5, %v2472_v52  ;;  %v1397_v23 = vsel %vm466_vm0, %v1395_v63, %v1396_v33  ;;  %v1399_v24 = vrot.slane %v2590_v32, 4  ;;  %v915_v7 = vrot.slane %v2628_v16, 2  ;;  %v916_v25 = vrot.slane %v2618_v2, 2 }
  0x54   : > { %v914_v52 = vsel %vm893_vm2, %v912_v20, %v913_v49  ;;  %v1401_v19 = vrot.slane %v2628_v16, 4  ;;  %v1402_v28 = vrot.slane %v2618_v2, 4  ;;  %v918_v29 = vrot.slane %v2660_v53, 2 }
  0x55   : > { %2174 = vmatmul.mubr.msk.bf16.gmra.mrb[12].mxu0 %vm562_vm5, %v1160_v35  ;;  %v1400_v5 = vsel %vm466_vm0, %v1398_v21, %v1399_v24  ;;  %v917_v32 = vsel %vm893_vm2, %v915_v7, %v916_v25  ;;  %v919_v30 = vrot.slane %v2649_v37, 2  ;;  %v1404_v31 = vrot.slane %v2660_v53, 4 }
  0x56   : > { %2177 = vmatprep.mubr.msk.bf16.mxu0 %vm562_vm5, %v1163_v61  ;;  %v1403_v34 = vsel %vm466_vm0, %v1401_v19, %v1402_v28  ;;  %v1405_v35 = vrot.slane %v2649_v37, 4  ;;  %v921_v36 = vrot.slane %v2668_v4, 2  ;;  %v922_v2 = vrot.slane %v2663_v55, 2 }
  0x57   : > { %v920_v38 = vsel %vm893_vm2, %v918_v29, %v919_v30  ;;  %v1407_v39 = vrot.slane %v2668_v4, 4  ;;  %v1408_v43 = vrot.slane %v2663_v55, 4  ;;  %v924_v44 = vrot.slane %v2690_v26, 2 }
  0x58   : > { %v1406_v45 = vsel %vm466_vm0, %v1404_v31, %v1405_v35  ;;  %v923_v47 = vsel %vm893_vm2, %v921_v36, %v922_v2  ;;  %v925_v48 = vrot.slane %v2684_v22, 2  ;;  %v1410_v37 = vrot.slane %v2690_v26, 4 }
  0x59   : > { %v1409_v54 = vsel %vm466_vm0, %v1407_v39, %v1408_v43  ;;  %v1411_v57 = vrot.slane %v2684_v22, 4  ;;  %v927_v60 = vrot.slane %v2712_v51, 2  ;;  %v928_v55 = vrot.slane %v2700_v40, 2 }
  0x5a   : > { %2106 = vmatmul.mubr.msk.bf16.vlgmr.msra.gmra.mrb[0].mxu1 %vm562_vm5, %v2480_v58  ;;  %v1169_v61 = vsel %vm1136_vm12, %v1167_v6, %v1168_v56  ;;  %v926_v62 = vsel %vm893_vm2, %v924_v44, %v925_v48  ;;  %v1413_v58 = vrot.slane %v2712_v51, 4  ;;  %v1414_v8 = vrot.slane %v2700_v40, 4 }
  0x5b   : > { %2215 = vmatpush3.bf16.msra.mxu1 %v2391_v1  ;;  %2109 = vmatprep.mubr.msk.bf16.mxu1 %vm562_vm5, %v2499_v13  ;;  %v1412_v22 = vsel %vm466_vm0, %v1410_v37, %v1411_v57  ;;  %v929_v9 = vsel %vm893_vm2, %v927_v60, %v928_v55  ;;  %v1170_v13 = vrot.slane %v2712_v51, 3  ;;  %v1171_v6 = vrot.slane %v2700_v40, 3 }
  0x5c   : > { %2214 = vmatprep.subr.bf16.mxu1 %v2400_v3  ;;  %v1415_v1 = vsel %vm466_vm0, %v1413_v58, %v1414_v8  ;;  %vm1807_vm0 = vcmask 1040384   ;;  %vm1809_vm1 = vcmask 254976  }
  0x5d   : > { %2178 = vmatmul.mubr.msk.bf16.gmra.mrb[16].mxu0 %vm562_vm5, %v1166_v11  ;;  %v1172_v56 = vsel %vm1136_vm12, %v1170_v13, %v1171_v6 }
  0x5e   : > { %2181 = vmatprep.mubr.msk.bf16.mxu0 %vm562_vm5, %v1169_v61 }
  0x5f   : > { %2216 = vmatpush3.bf16.msra.mxu1 %v2400_v3 }
  0x62   : > { %2110 = vmatmul.mubr.msk.bf16.gmra.mrb[4].mxu1 %vm562_vm5, %v2540_v41 }
  0x63   : > { %2113 = vmatprep.mubr.msk.bf16.mxu1 %vm562_vm5, %v2559_v59 }
  0x65   : > { %2182 = vmatmul.mubr.msk.bf16.gmra.mrb[20].mxu0 %vm562_vm5, %v1172_v56 }
  0x66   : > { %2189 = vmatprep.mubr.msk.bf16.mxu0 %vm562_vm5, %v2721_v46 }
  0x6a   : > { %2114 = vmatmul.mubr.msk.bf16.gmra.mrb[8].mxu1 %vm562_vm5, %v2583_v27 }
  0x6b   : > { %2117 = vmatprep.mubr.msk.bf16.mxu1 %vm562_vm5, %v2599_v42 }
  0x6d   : > { %2190 = vmatmul.mubr.msk.bf16.vlgmr.msra.gmra.mrb[0].mxu0 %vm562_vm5, %v2725_v0 }
  0x6e   : > { %2193 = vmatprep.mubr.msk.bf16.mxu0 %vm562_vm5, %v2736_v15 }
  0x72   : > { %2118 = vmatmul.mubr.msk.bf16.gmra.mrb[12].mxu1 %vm562_vm5, %v2628_v16 }
  0x73   : > { %2121 = vmatprep.mubr.msk.bf16.mxu1 %vm562_vm5, %v2660_v53 }
  0x75   : > { %2194 = vmatmul.mubr.msk.bf16.gmra.mrb[4].mxu0 %vm562_vm5, %v2739_v17 }
  0x76   : > { %2197 = vmatprep.mubr.msk.bf16.mxu0 %vm562_vm5, %v1394_v18 }
  0x7a   : > { %2122 = vmatmul.mubr.msk.bf16.gmra.mrb[16].mxu1 %vm562_vm5, %v2668_v4 }
  0x7b   : > { %2125 = vmatprep.mubr.msk.bf16.mxu1 %vm562_vm5, %v2690_v26 }
  0x7d   : > { %2198 = vmatmul.mubr.msk.bf16.gmra.mrb[8].mxu0 %vm562_vm5, %v1397_v23 }
  0x7e   : > { %2201 = vmatprep.mubr.msk.bf16.mxu0 %vm562_vm5, %v1400_v5 }
  0x82   : > { %2126 = vmatmul.mubr.msk.bf16.gmra.mrb[20].mxu1 %vm562_vm5, %v2712_v51 }
  0x83   : > { %2145 = vmatprep.mubr.msk.bf16.mxu1 %vm562_vm5, %v914_v52 }
  0x85   : > { %2202 = vmatmul.mubr.msk.bf16.gmra.mrb[12].mxu0 %vm562_vm5, %v1403_v34 }
  0x86   : > { %2205 = vmatprep.mubr.msk.bf16.mxu0 %vm562_vm5, %v1406_v45 }
  0x8a   : > { %2146 = vmatmul.mubr.msk.bf16.vlgmr.msra.gmra.mrb[12].mxu1 %vm562_vm5, %v917_v32 }
  0x8b   : > { %2149 = vmatprep.mubr.msk.bf16.mxu1 %vm562_vm5, %v920_v38 }
  0x8d   : > { %2206 = vmatmul.mubr.msk.bf16.gmra.mrb[16].mxu0 %vm562_vm5, %v1409_v54 }
  0x8e   : > { %2209 = vmatprep.mubr.msk.bf16.mxu0 %vm562_vm5, %v1412_v22 }
  0x92   : > { %2150 = vmatmul.mubr.msk.bf16.gmra.mrb[16].mxu1 %vm562_vm5, %v923_v47 }
  0x93   : > { %2153 = vmatprep.mubr.msk.bf16.mxu1 %vm562_vm5, %v926_v62 }
  0x95   : > { %2210 = vmatmul.mubr.msk.bf16.gmra.mrb[20].mxu0 %vm562_vm5, %v1415_v1 }
  0x9a   : > { %2154 = vmatmul.mubr.msk.bf16.gmra.mrb[20].mxu1 %vm562_vm5, %v929_v9 }
 0x12d   : > { %v2107_v3 = vpop.f32.mrb[0].mxu1 }
 0x12e   : > { %v798_v41 = vpop.f32.mrb[1].mxu1 }
 0x12f   : > { %v2108_v59 = vpop.f32.mrb[2].mxu1 }
 0x130   : > { %v801_v27 = vpop.f32.mrb[3].mxu1 }
 0x135   : > { %v2111_v42 = vpop.f32.mrb[4].mxu1 }
 0x136   : > { %v814_v16 = vpop.f32.mrb[5].mxu1 }
 0x137   : > { %v2112_v53 = vpop.f32.mrb[6].mxu1 }
 0x138   : > { %v817_v4 = vpop.f32.mrb[7].mxu1 }
 0x13d   : > { %v2841_v26 = vpop.f32.mrb[8].mxu1 }
 0x13e   : > { %v2843_v40 = vpop.f32.mrb[9].mxu1 }
 0x13f   : > { %v2845_v51 = vpop.f32.mrb[10].mxu1 }
 0x140   : > { %v2847_v46 = vpop.f32.mrb[11].mxu1  ;;  %v2191_v0 = vpop.f32.mrb[0].mxu0 }
 0x141   : > { %v2217_v50 = vadd.f32 %v2191_v0, %v2107_v3  ;;  %v1503_v11 = vpop.f32.mrb[1].mxu0 }
 0x142   : > { %v2218_v12 = vadd.f32 %v1503_v11, %v798_v41  ;;  %v2192_v14 = vpop.f32.mrb[2].mxu0 }
 0x143   : > { %v1631_v15 = vadd.f32 %v2217_v50, %v2852_v10  ;;  %v2219_v17 = vadd.f32 %v2192_v14, %v2108_v59  ;;  %v1506_v63 = vpop.f32.mrb[3].mxu0 }
 0x144   : > { %v1629_v33 = vadd.f32 %v2218_v12, %v2852_v10  ;;  %v2220_v18 = vadd.f32 %v1506_v63, %v801_v27 }
 0x145   : > { %1655 = vst.msk [vmem:[%s2859_s11 + $0x10] sm:$0xff] %vm562_vm5, %v1631_v15  ;;  %v1632_v20 = vadd.f32 %v2219_v17, %v2852_v10  ;;  %v1732_v23 = vmul.f32 %v1631_v15, %v1631_v15  ;;  %v1680_v32 = vsel %vm562_vm5, %v1631_v15, 0.0 }
 0x146   : > { %1653 = vst.msk [vmem:[%s2859_s11] sm:$0xff] %vm562_vm5, %v1629_v33  ;;  %v1730_v49 = vmul.f32 %v1629_v33, %v1629_v33  ;;  %v1630_v21 = vadd.f32 %v2220_v18, %v2852_v10  ;;  %v1677_v24 = vsel %vm562_vm5, %v1629_v33, 0.0 }
 0x147   : > { %1656 = vst.msk [vmem:[%s2859_s11 + $0x18] sm:$0xff] %vm562_vm5, %v1632_v20  ;;  %v1733_v19 = vmul.f32 %v1632_v20, %v1632_v20  ;;  %v1757_v44 = vsel %vm562_vm5, %v1732_v23, 0.0  ;;  %v1682_v45 = vsel %vm562_vm5, %v1632_v20, 0.0 }
 0x148   : > { %1654 = vst.msk [vmem:[%s2859_s11 + $0x8] sm:$0xff] %vm562_vm5, %v1630_v21  ;;  %v1678_v7 = vsel %vm562_vm5, %v1630_v21, 0.0  ;;  %v1731_v25 = vmul.f32 %v1630_v21, %v1630_v21  ;;  %v2195_v52 = vpop.f32.mrb[4].mxu0  ;;  %v1754_v30 = vsel %vm562_vm5, %v1730_v49, 0.0 }
 0x149   : > { %v1679_v28 = vadd.f32 %v1678_v7, %v1677_v24  ;;  %v2221_v29 = vadd.f32 %v2195_v52, %v2111_v42  ;;  %v1519_v5 = vpop.f32.mrb[5].mxu0  ;;  %v1759_v37 = vsel %vm562_vm5, %v1733_v19, 0.0 }
 0x14a   : > { %v1755_v31 = vsel %vm562_vm5, %v1731_v25, 0.0  ;;  %v2222_v34 = vadd.f32 %v1519_v5, %v814_v16  ;;  %v2196_v35 = vpop.f32.mrb[6].mxu0 }
 0x14b   : > { %v1681_v36 = vadd.f32 %v1680_v32, %v1679_v28  ;;  %v1756_v2 = vadd.f32 %v1755_v31, %v1754_v30  ;;  %v1635_v38 = vadd.f32 %v2221_v29, %v2852_v10  ;;  %v2223_v39 = vadd.f32 %v2196_v35, %v2112_v53  ;;  %v1522_v43 = vpop.f32.mrb[7].mxu0 }
 0x14c   : > { %v1633_v47 = vadd.f32 %v2222_v34, %v2852_v10  ;;  %v2224_v48 = vadd.f32 %v1522_v43, %v817_v4 }
 0x14d   : > { %v1758_v54 = vadd.f32 %v1757_v44, %v1756_v2  ;;  %1659 = vst.msk [vmem:[%s2859_s11 + $0x30] sm:$0xff] %vm562_vm5, %v1635_v38  ;;  %v1683_v57 = vadd.f32 %v1682_v45, %v1681_v36  ;;  %v1636_v61 = vadd.f32 %v2223_v39, %v2852_v10  ;;  %v1736_v22 = vmul.f32 %v1635_v38, %v1635_v38 }
 0x14e   : > { %1657 = vst.msk [vmem:[%s2859_s11 + $0x20] sm:$0xff] %vm562_vm5, %v1633_v47  ;;  %v1684_v60 = vsel %vm562_vm5, %v1633_v47, 0.0  ;;  %v1734_v55 = vmul.f32 %v1633_v47, %v1633_v47  ;;  %v1634_v62 = vadd.f32 %v2224_v48, %v2852_v10  ;;  %v1688_v27 = vsel %vm562_vm5, %v1635_v38, 0.0 }
 0x14f   : > { %v1685_v58 = vadd.f32 %v1684_v60, %v1683_v57  ;;  %v1760_v8 = vadd.f32 %v1759_v37, %v1758_v54  ;;  %1660 = vst.msk [vmem:[%s2859_s11 + $0x38] sm:$0xff] %vm562_vm5, %v1636_v61  ;;  %v1737_v42 = vmul.f32 %v1636_v61, %v1636_v61 }
 0x150   : > { %v1761_v9 = vsel %vm562_vm5, %v1734_v55, 0.0  ;;  %1658 = vst.msk [vmem:[%s2859_s11 + $0x28] sm:$0xff] %vm562_vm5, %v1634_v62  ;;  %v1686_v1 = vsel %vm562_vm5, %v1634_v62, 0.0  ;;  %v2199_v13 = vpop.f32.mrb[8].mxu0  ;;  %v1735_v3 = vmul.f32 %v1634_v62, %v1634_v62 }
 0x151   : > { %v1762_v6 = vadd.f32 %v1761_v9, %v1760_v8  ;;  %v1687_v56 = vadd.f32 %v1686_v1, %v1685_v58  ;;  %v2225_v41 = vadd.f32 %v2199_v13, %v2841_v26  ;;  %v1535_v59 = vpop.f32.mrb[9].mxu0  ;;  %v1690_v26 = vsel %vm562_vm5, %v1636_v61, 0.0 }
 0x152   : > { %v2226_v16 = vadd.f32 %v1535_v59, %v2843_v40  ;;  %v2200_v53 = vpop.f32.mrb[10].mxu0  ;;  %v1763_v0 = vsel %vm562_vm5, %v1735_v3, 0.0  ;;  %v1765_v40 = vsel %vm562_vm5, %v1736_v22, 0.0  ;;  %v1767_v21 = vsel %vm562_vm5, %v1737_v42, 0.0 }
 0x153   : > { %v1689_v4 = vadd.f32 %v1688_v27, %v1687_v56  ;;  %v1639_v50 = vadd.f32 %v2225_v41, %v2852_v10  ;;  %v2227_v11 = vadd.f32 %v2200_v53, %v2845_v51  ;;  %v1538_v12 = vpop.f32.mrb[11].mxu0  ;;  %v1764_v14 = vadd.f32 %v1763_v0, %v1762_v6 }
 0x154   : > { %v1637_v15 = vadd.f32 %v2226_v16, %v2852_v10  ;;  %v2228_v17 = vadd.f32 %v1538_v12, %v2847_v46 }
 0x155   : > { %1663 = vst.msk [vmem:[%s2859_s11 + $0x50] sm:$0xff] %vm562_vm5, %v1639_v50  ;;  %v1691_v63 = vadd.f32 %v1690_v26, %v1689_v4  ;;  %v1640_v33 = vadd.f32 %v2227_v11, %v2852_v10  ;;  %v1766_v18 = vadd.f32 %v1765_v40, %v1764_v14  ;;  %v1740_v19 = vmul.f32 %v1639_v50, %v1639_v50 }
 0x156   : > { %1661 = vst.msk [vmem:[%s2859_s11 + $0x40] sm:$0xff] %vm562_vm5, %v1637_v15  ;;  %v1692_v51 = vsel %vm562_vm5, %v1637_v15, 0.0  ;;  %v1738_v20 = vmul.f32 %v1637_v15, %v1637_v15  ;;  %v1638_v49 = vadd.f32 %v2228_v17, %v2852_v10  ;;  %v1696_v5 = vsel %vm562_vm5, %v1639_v50, 0.0 }
 0x157   : > { %v1693_v23 = vadd.f32 %v1692_v51, %v1691_v63  ;;  %1664 = vst.msk [vmem:[%s2859_s11 + $0x58] sm:$0xff] %vm562_vm5, %v1640_v33  ;;  %v1768_v46 = vadd.f32 %v1767_v21, %v1766_v18  ;;  %v1741_v34 = vmul.f32 %v1640_v33, %v1640_v33  ;;  %v1698_v2 = vsel %vm562_vm5, %v1640_v33, 0.0 }
 0x158   : > { %v1769_v24 = vsel %vm562_vm5, %v1738_v20, 0.0  ;;  %1662 = vst.msk [vmem:[%s2859_s11 + $0x48] sm:$0xff] %vm562_vm5, %v1638_v49  ;;  %v1694_v7 = vsel %vm562_vm5, %v1638_v49, 0.0  ;;  %v1739_v25 = vmul.f32 %v1638_v49, %v1638_v49  ;;  %v2203_v52 = vpop.f32.mrb[12].mxu0  ;;  %v1773_v39 = vsel %vm562_vm5, %v1740_v19, 0.0 }
 0x159   : > { %v1695_v28 = vadd.f32 %v1694_v7, %v1693_v23  ;;  %v1551_v29 = vpop.f32.mrb[13].mxu0  ;;  %v1770_v32 = vadd.f32 %v1769_v24, %v1768_v46  ;;  %v1775_v37 = vsel %vm562_vm5, %v1741_v34, 0.0 }
 0x15a   : > { %v1771_v30 = vsel %vm562_vm5, %v1739_v25, 0.0  ;;  %v2204_v31 = vpop.f32.mrb[14].mxu0 }
 0x15b   : > { %v1697_v35 = vadd.f32 %v1696_v5, %v1695_v28  ;;  %v1554_v36 = vpop.f32.mrb[15].mxu0  ;;  %v1772_v38 = vadd.f32 %v1771_v30, %v1770_v32 }
 0x15d   : > { %v2147_v43 = vpop.f32.mrb[12].mxu1  ;;  %v1699_v44 = vadd.f32 %v1698_v2, %v1697_v35  ;;  %v1774_v45 = vadd.f32 %v1773_v39, %v1772_v38 }
 0x15e   : > { %v2229_v47 = vadd.f32 %v2203_v52, %v2147_v43  ;;  %v1065_v48 = vpop.f32.mrb[13].mxu1 }
 0x15f   : > { %v2230_v54 = vadd.f32 %v1551_v29, %v1065_v48  ;;  %v2148_v57 = vpop.f32.mrb[14].mxu1  ;;  %v1776_v55 = vadd.f32 %v1775_v37, %v1774_v45 }
 0x160   : > { %v1643_v60 = vadd.f32 %v2229_v47, %v2852_v10  ;;  %v2231_v61 = vadd.f32 %v2204_v31, %v2148_v57  ;;  %v1068_v62 = vpop.f32.mrb[15].mxu1  ;;  %v2207_v58 = vpop.f32.mrb[16].mxu0 }
 0x161   : > { %v1641_v8 = vadd.f32 %v2230_v54, %v2852_v10  ;;  %v2232_v22 = vadd.f32 %v1554_v36, %v1068_v62  ;;  %v1567_v9 = vpop.f32.mrb[17].mxu0 }
 0x162   : > { %1667 = vst.msk [vmem:[%s2859_s11 + $0x70] sm:$0xff] %vm562_vm5, %v1643_v60  ;;  %v1644_v1 = vadd.f32 %v2231_v61, %v2852_v10  ;;  %v2208_v13 = vpop.f32.mrb[18].mxu0  ;;  %v1744_v27 = vmul.f32 %v1643_v60, %v1643_v60  ;;  %v1704_v14 = vsel %vm562_vm5, %v1643_v60, 0.0 }
 0x163   : > { %1665 = vst.msk [vmem:[%s2859_s11 + $0x60] sm:$0xff] %vm562_vm5, %v1641_v8  ;;  %v1700_v6 = vsel %vm562_vm5, %v1641_v8, 0.0  ;;  %v1742_v56 = vmul.f32 %v1641_v8, %v1641_v8  ;;  %v1642_v3 = vadd.f32 %v2232_v22, %v2852_v10  ;;  %v1570_v41 = vpop.f32.mrb[19].mxu0 }
 0x164   : > { %v1701_v59 = vadd.f32 %v1700_v6, %v1699_v44  ;;  %1668 = vst.msk [vmem:[%s2859_s11 + $0x78] sm:$0xff] %vm562_vm5, %v1644_v1  ;;  %v1745_v50 = vmul.f32 %v1644_v1, %v1644_v1  ;;  %v1781_v21 = vsel %vm562_vm5, %v1744_v27, 0.0  ;;  %v1706_v23 = vsel %vm562_vm5, %v1644_v1, 0.0 }
 0x165   : > { %v1777_v42 = vsel %vm562_vm5, %v1742_v56, 0.0  ;;  %1666 = vst.msk [vmem:[%s2859_s11 + $0x68] sm:$0xff] %vm562_vm5, %v1642_v3  ;;  %v1702_v16 = vsel %vm562_vm5, %v1642_v3, 0.0  ;;  %v1743_v53 = vmul.f32 %v1642_v3, %v1642_v3  ;;  %v2151_v4 = vpop.f32.mrb[16].mxu1 }
 0x166   : > { %v1778_v0 = vadd.f32 %v1777_v42, %v1776_v55  ;;  %v1703_v11 = vadd.f32 %v1702_v16, %v1701_v59  ;;  %v2233_v12 = vadd.f32 %v2207_v58, %v2151_v4  ;;  %v1081_v26 = vpop.f32.mrb[17].mxu1  ;;  %v1783_v25 = vsel %vm562_vm5, %v1745_v50, 0.0 }
 0x167   : > { %v1779_v15 = vsel %vm562_vm5, %v1743_v53, 0.0  ;;  %v2234_v17 = vadd.f32 %v1567_v9, %v1081_v26  ;;  %v2152_v40 = vpop.f32.mrb[18].mxu1 }
 0x168   : > { %v1705_v63 = vadd.f32 %v1704_v14, %v1703_v11  ;;  %v1780_v33 = vadd.f32 %v1779_v15, %v1778_v0  ;;  %v1647_v18 = vadd.f32 %v2233_v12, %v2852_v10  ;;  %v2235_v51 = vadd.f32 %v2208_v13, %v2152_v40  ;;  %v1084_v20 = vpop.f32.mrb[19].mxu1  ;;  %v2211_v49 = vpop.f32.mrb[20].mxu0 }
 0x169   : > { %v1645_v46 = vadd.f32 %v2234_v17, %v2852_v10  ;;  %v2236_v24 = vadd.f32 %v1570_v41, %v1084_v20  ;;  %v1583_v7 = vpop.f32.mrb[21].mxu0 }
 0x16a   : > { %v1782_v52 = vadd.f32 %v1781_v21, %v1780_v33  ;;  %1671 = vst.msk [vmem:[%s2859_s11 + $0x90] sm:$0xff] %vm562_vm5, %v1647_v18  ;;  %v1707_v19 = vadd.f32 %v1706_v23, %v1705_v63  ;;  %v2212_v28 = vpop.f32.mrb[22].mxu0  ;;  %v1648_v32 = vadd.f32 %v2235_v51, %v2852_v10  ;;  %v1748_v36 = vmul.f32 %v1647_v18, %v1647_v18 }
 0x16b   : > { %1669 = vst.msk [vmem:[%s2859_s11 + $0x80] sm:$0xff] %vm562_vm5, %v1645_v46  ;;  %v1708_v29 = vsel %vm562_vm5, %v1645_v46, 0.0  ;;  %v1746_v5 = vmul.f32 %v1645_v46, %v1645_v46  ;;  %v1646_v30 = vadd.f32 %v2236_v24, %v2852_v10  ;;  %v1586_v31 = vpop.f32.mrb[23].mxu0  ;;  %v1712_v37 = vsel %vm562_vm5, %v1647_v18, 0.0 }
 0x16c   : > { %v1709_v34 = vadd.f32 %v1708_v29, %v1707_v19  ;;  %v1784_v35 = vadd.f32 %v1783_v25, %v1782_v52  ;;  %1672 = vst.msk [vmem:[%s2859_s11 + $0x98] sm:$0xff] %vm562_vm5, %v1648_v32  ;;  %v1749_v54 = vmul.f32 %v1648_v32, %v1648_v32  ;;  %v1714_v22 = vsel %vm562_vm5, %v1648_v32, 0.0 }
 0x16d   : > { %v1785_v2 = vsel %vm562_vm5, %v1746_v5, 0.0  ;;  %1670 = vst.msk [vmem:[%s2859_s11 + $0x88] sm:$0xff] %vm562_vm5, %v1646_v30  ;;  %v1710_v38 = vsel %vm562_vm5, %v1646_v30, 0.0  ;;  %v2155_v39 = vpop.f32.mrb[20].mxu1  ;;  %v1747_v45 = vmul.f32 %v1646_v30, %v1646_v30  ;;  %v1789_v6 = vsel %vm562_vm5, %v1748_v36, 0.0 }
 0x16e   : > { %v1786_v43 = vadd.f32 %v1785_v2, %v1784_v35  ;;  %v1711_v44 = vadd.f32 %v1710_v38, %v1709_v34  ;;  %v2237_v47 = vadd.f32 %v2211_v49, %v2155_v39  ;;  %v1097_v48 = vpop.f32.mrb[21].mxu1  ;;  %v1791_v16 = vsel %vm562_vm5, %v1749_v54, 0.0 }
 0x16f   : > { %v2238_v57 = vadd.f32 %v1583_v7, %v1097_v48  ;;  %v2156_v60 = vpop.f32.mrb[22].mxu1  ;;  %v1787_v61 = vsel %vm562_vm5, %v1747_v45, 0.0 }
 0x170   : > { %v1713_v55 = vadd.f32 %v1712_v37, %v1711_v44  ;;  %v1651_v62 = vadd.f32 %v2237_v47, %v2852_v10  ;;  %v2239_v58 = vadd.f32 %v2212_v28, %v2156_v60  ;;  %v1100_v8 = vpop.f32.mrb[23].mxu1  ;;  %v1788_v9 = vadd.f32 %v1787_v61, %v1786_v43 }
 0x171   : > { %v1649_v1 = vadd.f32 %v2238_v57, %v2852_v10  ;;  %v2240_v13 = vadd.f32 %v1586_v31, %v1100_v8 }
 0x172   : > { %1675 = vst.msk [vmem:[%s2859_s11 + $0xb0] sm:$0xff] %vm562_vm5, %v1651_v62  ;;  %v1715_v56 = vadd.f32 %v1714_v22, %v1713_v55  ;;  %v1652_v3 = vadd.f32 %v2239_v58, %v2852_v10  ;;  %v1790_v41 = vadd.f32 %v1789_v6, %v1788_v9  ;;  %v1752_v12 = vmul.f32 %v1651_v62, %v1651_v62 }
 0x173   : > { %1673 = vst.msk [vmem:[%s2859_s11 + $0xa0] sm:$0xff] %vm562_vm5, %v1649_v1  ;;  %v1716_v59 = vsel %vm562_vm5, %v1649_v1, 0.0  ;;  %v1750_v27 = vmul.f32 %v1649_v1, %v1649_v1  ;;  %v1650_v42 = vadd.f32 %v2240_v13, %v2852_v10  ;;  %v1720_v14 = vsel %vm562_vm5, %v1651_v62, 0.0 }
 0x174   : > { %v1717_v53 = vadd.f32 %v1716_v59, %v1715_v56  ;;  %1676 = vst.msk [vmem:[%s2859_s11 + $0xb8] sm:$0xff] %vm562_vm5, %v1652_v3  ;;  %v1792_v4 = vadd.f32 %v1791_v16, %v1790_v41  ;;  %v1753_v17 = vmul.f32 %v1652_v3, %v1652_v3  ;;  %v1722_v63 = vsel %vm562_vm5, %v1652_v3, 0.0 }
 0x175   : > { %v1793_v0 = vsel %vm562_vm5, %v1750_v27, 0.0  ;;  %1674 = vst.msk [vmem:[%s2859_s11 + $0xa8] sm:$0xff] %vm562_vm5, %v1650_v42  ;;  %v1718_v50 = vsel %vm562_vm5, %v1650_v42, 0.0  ;;  %v1751_v11 = vmul.f32 %v1650_v42, %v1650_v42  ;;  %v1797_v18 = vsel %vm562_vm5, %v1752_v12, 0.0 }
 0x176   : > { %v1719_v26 = vadd.f32 %v1718_v50, %v1717_v53  ;;  %v1794_v15 = vadd.f32 %v1793_v0, %v1792_v4  ;;  %v1799_v49 = vsel %vm562_vm5, %v1753_v17, 0.0 }
 0x177   : > { %v1795_v10 = vsel %vm562_vm5, %v1751_v11, 0.0 }
 0x178   : > { %v1721_v40 = vadd.f32 %v1720_v14, %v1719_v26  ;;  %v1796_v33 = vadd.f32 %v1795_v10, %v1794_v15 }
 0x17a   : > { %v1723_v51 = vadd.f32 %v1722_v63, %v1721_v40  ;;  %v1798_v20 = vadd.f32 %v1797_v18, %v1796_v33 }
 0x17c   : > { %v1724_v21 = vrot.slane %v1723_v51, 4  ;;  %v1800_v23 = vadd.f32 %v1799_v49, %v1798_v20 }
 0x17e   : > { %v1725_v46 = vadd.f32 %v1724_v21, %v1723_v51  ;;  %v1801_v24 = vrot.slane %v1800_v23, 4 }
 0x180   : > { %v1726_v7 = vrot.slane %v1725_v46, 2  ;;  %v1802_v25 = vadd.f32 %v1801_v24, %v1800_v23 }
 0x182   : > { %v1727_v52 = vadd.f32 %v1726_v7, %v1725_v46  ;;  %v1803_v19 = vrot.slane %v1802_v25, 2 }
 0x184   : > { %v1728_v28 = vrot.slane %v1727_v52, 1  ;;  %v1804_v29 = vadd.f32 %v1803_v19, %v1802_v25 }
 0x186   : > { %v1805_v5 = vrot.slane %v1804_v29, 1  ;;  %v1729_v32 = vadd.f32 %v1728_v28, %v1727_v52 }
 0x188   : > { %v1806_v30 = vadd.f32 %v1805_v5, %v1804_v29 }
 0x18a   : > { %v1808_v31 = vsel %vm1807_vm0, %v1729_v32, %v1806_v30 }
 0x18b   : > { %1810 = vst.msk [vmem:[%s270_s14] sm:$0x3] %vm1809_vm1, %v1808_v31 }
 0x18c PF: > { %s17_s21 = sadd.s32 1, %s2337_s21  }
 0x18d   : > { %p14_p5 = scmp.ge.s32.totalorder %s17_s21, 4  }
 0x18f   :  { %16 = sbr.rel (!%p14_p5) target bundleno = 1 (0x1), region = 86 }

// kernel: encoder_forward.7
= control target key start
LH: loop header
LB: loop body
LE: loop exit
PB: predicated region body
PF: predicated region fallthrough
CT: control target
= control target key end

     0   :  { %s2741_s24 = smov 0   ;;  %s3625_s0 = inlined_call_operand.vmem [shape: bf16[24,16,12], index: 0, kind: input, shape index: {}]   ;;  %s3626_s1 = inlined_call_operand.vmem [shape: bf16[5,12,32], index: 1, kind: input, shape index: {}]   ;;  %s3627_s2 = inlined_call_operand.vmem [shape: f32[1,32], index: 2, kind: input, shape index: {}]   ;;  %s3628_s3 = inlined_call_operand.vmem [shape: bf16[12,32], index: 3, kind: input, shape index: {}]   ;;  %s3629_s4 = inlined_call_operand.vmem [shape: f32[1,32], index: 4, kind: input, shape index: {}]   ;;  %s3630_s5 = inlined_call_operand.vmem [shape: f32[24,16,32], index: 5, kind: output, shape index: {0}]   ;;  %s3631_s6 = inlined_call_operand.vmem [shape: f32[24,16,32], index: 6, kind: output, shape index: {1}]   ;;  %s3632_s7 = inlined_call_operand.vmem [shape: f32[2,2,32], index: 7, kind: output, shape index: {2}]  }
   0x1 LB: > { %s2747_s25 = sadd.s32 4294967295, %s2699_s24   ;;  %p2218_p0 = scmp.ge.s32.totalorder %s2699_s24, 1  ;;  %s2699_s24 = sphi %s2741_s24, %s18_s24  }
   0x2   : > { %p244_p1 = scmp.lt.s32.totalorder %s2699_s24, 3 }
   0x4   : > { %p245_p2 = pnand %p2218_p0, %p244_p1 }
   0x6   : > { %248 = sbr.rel (%p245_p2) target bundleno = 406 (0x196), region = 40 }
   0xd   : > { %vm604_vm0 = vcmask 1045504   ;;  %s288_s26 = smul.u32 12, %s2747_s25  ;;  %v2675_v0 = vld [vmem:[%s3626_s1 + $0x10] sm:$0x3f]   ;;  %v2677_v2 = vld [vmem:[%s3626_s1 + $0x18] sm:$0x3f]  }
   0xe   : > { %2663 = vmatprep.subr.msk.bf16.mxu0 %vm604_vm0, %v2675_v0  ;;  %v992_v1 = vsel %vm604_vm0, %v2675_v0, 0  ;;  %v2678_v3 = vld [vmem:[%s3626_s1 + $0x8] sm:$0x3f]   ;;  %v2684_v5 = vld [vmem:[%s3626_s1] sm:$0x3f]   ;;  %vm410_vm1 = vcmask 1041408  }
   0xf   : > { %p289_p3 = scmp.lt.s32.totalorder %s288_s26, 23  ;;  %2462 = vmatpush3.bf16.msra.mxu0 %v992_v1  ;;  %2661 = vmatprep.subr.msk.bf16.mxu1 %vm604_vm0, %v2678_v3  ;;  %v606_v4 = vsel %vm604_vm0, %v2678_v3, 0  ;;  %vm910_vm2 = vcmask 1046528   ;;  %vm567_vm3 = vcmask 97280   ;;  %v1301_v19 = vsel %vm604_vm0, %v2677_v2, 0  ;;  %p309_p4 = scmp.lt.s32.totalorder %s2747_s25, 1 }
  0x10   : > { %2664 = vmatprep.subr.msk.bf16.mxu0 %vm604_vm0, %v2677_v2  ;;  %2410 = vmatpush3.bf16.msra.mxu1 %v606_v4  ;;  %vm438_vm4 = vsmask.f32 7424  ;;  %v767_v37 = vsel %vm604_vm0, %v2684_v5, 0  ;;  %vm1147_vm5 = vsmask.f32 6400  ;;  %vm1906_vm6 = vcmask 261120  }
  0x11   : > { %s3700_s26 = smov (!%p289_p3, %s288_s26), 23  ;;  %2662 = vmatprep.subr.msk.bf16.mxu1 %vm604_vm0, %v2684_v5  ;;  %s3702_s25 = smov (!%p309_p4, %s2747_s25), 1  ;;  %vm2085_vm7 = vcmask 1040384   ;;  %vm2087_vm8 = vcmask 254976  }
  0x12   : > { %s2328_s10 = sshll.u32 %s3700_s26, 3  ;;  %s2329_s20 = sshll.u32 %s3700_s26, 4 }
  0x13   : > { %s2775_s15 = scalar_lea.vmem %s3625_s0, %s2328_s10  ;;  %s3394_s28 = scalar_lea.vmem %s3630_s5, %s2329_s20 }
  0x14   : > { %v2778_v6 = vld [vmem:[%s2775_s15] sm:$0xff]   ;;  %v2782_v7 = vld [vmem:[%s2775_s15 + $0x8] sm:$0xff]   ;;  %v2788_v9 = vld [vmem:[%s2775_s15 + $0x10] sm:$0xff]   ;;  %s3409_s9 = scalar_lea.vmem %s3631_s6, %s2329_s20  ;;  %s2225_s10 = sshll.u32 %s3702_s25, 1 }
  0x15   : > { %v2785_v8 = vrot.slane %v2778_v6, 6  ;;  %v2791_v10 = vrot.slane %v2782_v7, 6  ;;  %v2800_v14 = vrot.slane %v2788_v9, 6  ;;  %v2818_v26 = vld [vmem:[%s2775_s15 + $0x18] sm:$0xff]   ;;  %v2830_v31 = vld [vmem:[%s2775_s15 + $0x20] sm:$0xff]   ;;  %v2850_v42 = vld [vmem:[%s2775_s15 + $0x28] sm:$0xff]   ;;  %s312_s13 = scalar_lea.vmem %s3632_s7, %s2225_s10 }
  0x16   : > { %v2845_v39 = vrot.slane %v2818_v26, 6  ;;  %v2856_v46 = vrot.slane %v2830_v31, 6  ;;  %v2887_v62 = vrot.slane %v2850_v42, 6  ;;  %v2890_v63 = vld [vmem:[%s2775_s15 + $0x30] sm:$0xff]   ;;  %v2899_v4 = vld [vmem:[%s2775_s15 + $0x38] sm:$0xff]  }
  0x17   : > { %v2795_v11 = vsel %vm410_vm1, 0, %v2785_v8  ;;  %v912_v12 = vrot.slane %v2785_v8, 1  ;;  %v445_v13 = vshll.u32 %v2785_v8, 16  ;;  %v2805_v16 = vsel %vm410_vm1, 0, %v2791_v10 }
  0x18   : > { %v911_v15 = vrot.slane %v2795_v11, 1  ;;  %v915_v17 = vrot.slane %v2791_v10, 1  ;;  %v914_v18 = vrot.slane %v2805_v16, 1  ;;  %v439_v20 = vshrl.u32 %v2795_v11, 16 }
  0x19   : > { %v441_v21 = vshll.u32 %v2795_v11, 16  ;;  %v447_v23 = vrot.slane %v445_v13, 1  ;;  %v449_v24 = vshrl.u32 %v2805_v16, 16  ;;  %v451_v25 = vshll.u32 %v2805_v16, 16 }
  0x1a   : > { %v913_v22 = vsel %vm910_vm2, %v911_v15, %v912_v12  ;;  %v916_v27 = vsel %vm910_vm2, %v914_v18, %v915_v17  ;;  %v455_v29 = vshll.u32 %v2791_v10, 16  ;;  %v2827_v30 = vsel %vm410_vm1, 0, %v2800_v14 }
  0x1b   : > { %2463 = vmatprep.mubr.msk.bf16.mxu0 %vm567_vm3, %v913_v22  ;;  %v443_v28 = vrot.slane %v441_v21, 1  ;;  %v453_v32 = vrot.slane %v451_v25, 1  ;;  %v917_v33 = vrot.slane %v2827_v30, 1  ;;  %v918_v36 = vrot.slane %v2800_v14, 1 }
  0x1c   : > { %2464 = vmatmul.mubr.msk.bf16.vlgmr.msra.gmra.mrb[0].mxu0 %vm567_vm3, %v916_v27  ;;  %v457_v35 = vrot.slane %v455_v29, 1  ;;  %v3654_v40 = vshrl.u32 %v2827_v30, 16  ;;  %v3653_v41 = vshll.u32 %v2827_v30, 16  ;;  %v3652_v45 = vshll.u32 %v2800_v14, 16  ;;  %v2919_v27 = vld [vmem:[%s3626_s1 + $0x20] sm:$0x3f]  }
  0x1d   : > { %2488 = vmatpush3.bf16.msra.mxu0 %v1301_v19  ;;  %v444_v34 = vor.u32 %v443_v28, %v439_v20  ;;  %v454_v38 = vor.u32 %v453_v32, %v449_v24  ;;  %v919_v44 = vsel %vm910_vm2, %v917_v33, %v918_v36  ;;  %v2863_v48 = vsel %vm410_vm1, 0, %v2845_v39 }
  0x1e   : > { %2467 = vmatprep.mubr.msk.bf16.mxu0 %vm567_vm3, %v919_v44  ;;  %v921_v49 = vrot.slane %v2845_v39, 1  ;;  %v463_v50 = vrot.slane %v3653_v41, 1  ;;  %v920_v51 = vrot.slane %v2863_v48, 1  ;;  %v467_v52 = vrot.slane %v3652_v45, 1  ;;  %2665 = vmatprep.subr.msk.bf16.mxu0 %vm604_vm0, %v2919_v27 }
  0x1f   : > { %v448_v43 = vsel %vm438_vm4, %v444_v34, %v447_v23  ;;  %v458_v47 = vsel %vm438_vm4, %v454_v38, %v457_v35  ;;  %v3651_v53 = vshrl.u32 %v2863_v48, 16  ;;  %v3648_v54 = vshll.u32 %v2863_v48, 16 }
  0x20   : > { %2411 = vmatprep.mubr.msk.bf16.mxu1 %vm567_vm3, %v448_v43  ;;  %v464_v55 = vor.u32 %v463_v50, %v3654_v40  ;;  %v3647_v56 = vshll.u32 %v2845_v39, 16  ;;  %v2879_v57 = vsel %vm410_vm1, 0, %v2856_v46  ;;  %v924_v58 = vrot.slane %v2856_v46, 1  ;;  %v2940_v43 = vld [vmem:[%s3628_s3] sm:$0x3f]  }
  0x21   : > { %2412 = vmatmul.mubr.msk.bf16.vlgmr.msra.gmra.mrb[0].mxu1 %vm567_vm3, %v458_v47  ;;  %v922_v59 = vsel %vm910_vm2, %v920_v51, %v921_v49  ;;  %v473_v60 = vrot.slane %v3648_v54, 1  ;;  %v923_v61 = vrot.slane %v2879_v57, 1  ;;  %v3644_v2 = vshrl.u32 %v2879_v57, 16 }
  0x22   : > { %2436 = vmatpush3.bf16.msra.mxu1 %v767_v37  ;;  %v468_v0 = vsel %vm438_vm4, %v464_v55, %v467_v52  ;;  %v477_v1 = vrot.slane %v3647_v56, 1  ;;  %v3643_v3 = vshll.u32 %v2879_v57, 16  ;;  %v2907_v15 = vsel %vm410_vm1, 0, %v2887_v62 }
  0x23   : > { %2415 = vmatprep.mubr.msk.bf16.mxu1 %vm567_vm3, %v468_v0  ;;  %v474_v5 = vor.u32 %v473_v60, %v3651_v53  ;;  %v925_v12 = vsel %vm910_vm2, %v923_v61, %v924_v58  ;;  %v927_v17 = vrot.slane %v2887_v62, 1  ;;  %v926_v18 = vrot.slane %v2907_v15, 1  ;;  %v2963_v60 = vld [vmem:[%s2775_s15 + $0x48] sm:$0xff]   ;;  %2666 = vmatprep.subr.msk.bf16.mxu1 %vm604_vm0, %v2940_v43 }
  0x24   : > { %2468 = vmatmul.mubr.msk.bf16.gmra.mrb[4].mxu0 %vm567_vm3, %v922_v59  ;;  %v483_v19 = vrot.slane %v3643_v3, 1  ;;  %v3640_v22 = vshll.u32 %v2856_v46, 16  ;;  %v3639_v23 = vshrl.u32 %v2907_v15, 16  ;;  %v3638_v32 = vshll.u32 %v2907_v15, 16  ;;  %v2960_v59 = vld [vmem:[%s2775_s15 + $0x40] sm:$0xff]  }
  0x25   : > { %2471 = vmatprep.mubr.msk.bf16.mxu0 %vm567_vm3, %v925_v12  ;;  %v478_v28 = vsel %vm438_vm4, %v474_v5, %v477_v1  ;;  %v3636_v33 = vshll.u32 %v2887_v62, 16  ;;  %v2925_v34 = vrot.slane %v2890_v63, 6  ;;  %v928_v35 = vsel %vm910_vm2, %v926_v18, %v927_v17 }
  0x26   : > { %v484_v36 = vor.u32 %v483_v19, %v3644_v2  ;;  %v487_v37 = vrot.slane %v3640_v22, 1  ;;  %v2933_v38 = vrot.slane %v2899_v4, 6  ;;  %v493_v44 = vrot.slane %v3638_v32, 1  ;;  %v2978_v19 = vld [vmem:[%s2775_s15 + $0x50] sm:$0xff]  }
  0x27   : > { %v497_v47 = vrot.slane %v3636_v33, 1  ;;  %v2949_v49 = vsel %vm410_vm1, 0, %v2925_v34  ;;  %v930_v50 = vrot.slane %v2925_v34, 1  ;;  %v3634_v17 = vshll.u32 %v2925_v34, 16  ;;  %3665 = vst [vmem:[#allocation2_spill] sm:$0xff] %v2978_v19 }
  0x28   : > { %v488_v51 = vsel %vm438_vm4, %v484_v36, %v487_v37  ;;  %v929_v52 = vrot.slane %v2949_v49, 1  ;;  %v2956_v55 = vsel %vm410_vm1, 0, %v2933_v38  ;;  %v933_v58 = vrot.slane %v2933_v38, 1 }
  0x29   : > { %2416 = vmatmul.mubr.msk.bf16.gmra.mrb[4].mxu1 %vm567_vm3, %v478_v28  ;;  %v494_v61 = vor.u32 %v493_v44, %v3639_v23  ;;  %v932_v0 = vrot.slane %v2956_v55, 1  ;;  %v3637_v1 = vshrl.u32 %v2949_v49, 16  ;;  %v3633_v5 = vshll.u32 %v2949_v49, 16 }
  0x2a   : > { %2419 = vmatprep.mubr.msk.bf16.mxu1 %vm567_vm3, %v488_v51  ;;  %v931_v12 = vsel %vm910_vm2, %v929_v52, %v930_v50  ;;  %v3635_v18 = vshll.u32 %v2956_v55, 16  ;;  %v3642_v37 = vshrl.u32 %v2956_v55, 16  ;;  %v3641_v44 = vshll.u32 %v2933_v38, 16  ;;  %v2997_v52 = vld [vmem:[%s2775_s15 + $0x58] sm:$0xff]  }
  0x2b   : > { %v498_v28 = vsel %vm438_vm4, %v494_v61, %v497_v47  ;;  %v503_v36 = vrot.slane %v3633_v5, 1  ;;  %v2991_v51 = vrot.slane %v2960_v59, 6  ;;  %v2994_v47 = vrot.slane %v2963_v60, 6  ;;  %3666 = vst [vmem:[#allocation3_spill] sm:$0xff] %v2997_v52 }
  0x2c   : > { %2472 = vmatmul.mubr.msk.bf16.gmra.mrb[8].mxu0 %vm567_vm3, %v928_v35  ;;  %v507_v35 = vrot.slane %v3634_v17, 1  ;;  %v513_v50 = vrot.slane %v3635_v18, 1  ;;  %v934_v61 = vsel %vm910_vm2, %v932_v0, %v933_v58  ;;  %v3012_v33 = vrot.slane %v2978_v19, 6 }
  0x2d   : > { %2475 = vmatprep.mubr.msk.bf16.mxu0 %vm567_vm3, %v931_v12  ;;  %v504_v12 = vor.u32 %v503_v36, %v3637_v1  ;;  %v3004_v5 = vsel %vm410_vm1, 0, %v2991_v51  ;;  %v936_v17 = vrot.slane %v2991_v51, 1  ;;  %v3009_v18 = vsel %vm410_vm1, 0, %v2994_v47 }
  0x2e   : > { %v514_v0 = vor.u32 %v513_v50, %v3642_v37  ;;  %v517_v36 = vrot.slane %v3641_v44, 1  ;;  %v935_v1 = vrot.slane %v3004_v5, 1  ;;  %v3650_v32 = vshrl.u32 %v3004_v5, 16 }
  0x2f   : > { %v508_v58 = vsel %vm438_vm4, %v504_v12, %v507_v35  ;;  %v3645_v23 = vshll.u32 %v3004_v5, 16  ;;  %v3646_v22 = vshll.u32 %v2991_v51, 16  ;;  %v938_v50 = vrot.slane %v3009_v18, 1 }
  0x30   : > { %v937_v35 = vsel %vm910_vm2, %v935_v1, %v936_v17  ;;  %v3649_v12 = vshll.u32 %v3009_v18, 16  ;;  %v939_v44 = vrot.slane %v2994_v47, 1  ;;  %v3039_v3 = vsel %vm410_vm1, 0, %v3012_v33 }
  0x31   : > { %2420 = vmatmul.mubr.msk.bf16.gmra.mrb[8].mxu1 %vm567_vm3, %v498_v28  ;;  %v3026_v28 = vrot.slane %v2997_v52, 6  ;;  %v527_v37 = vrot.slane %v3646_v22, 1  ;;  %v518_v1 = vsel %vm438_vm4, %v514_v0, %v517_v36  ;;  %v3659_v17 = vshrl.u32 %v3009_v18, 16 }
  0x32   : > { %2423 = vmatprep.mubr.msk.bf16.mxu1 %vm567_vm3, %v508_v58  ;;  %v523_v58 = vrot.slane %v3645_v23, 1  ;;  %v3658_v2 = vshll.u32 %v2994_v47, 16  ;;  %v941_v22 = vrot.slane %v3039_v3, 1  ;;  %v942_v56 = vrot.slane %v3012_v33, 1 }
  0x33   : > { %v3053_v54 = vsel %vm410_vm1, 0, %v3026_v28  ;;  %v3657_v0 = vshrl.u32 %v3039_v3, 16  ;;  %v3656_v36 = vshll.u32 %v3039_v3, 16  ;;  %v940_v53 = vsel %vm910_vm2, %v938_v50, %v939_v44 }
  0x34   : > { %2476 = vmatmul.mubr.msk.bf16.gmra.mrb[12].mxu0 %vm567_vm3, %v934_v61  ;;  %v533_v61 = vrot.slane %v3649_v12, 1  ;;  %v524_v23 = vor.u32 %v523_v58, %v3650_v32  ;;  %v1154_v12 = vrot.slane %v445_v13, 2  ;;  %v3655_v32 = vshll.u32 %v3012_v33, 16 }
  0x35   : > { %2479 = vmatprep.mubr.msk.bf16.mxu0 %vm567_vm3, %v937_v35  ;;  %v1148_v35 = vrot.slane %v439_v20, 1  ;;  %v537_v45 = vrot.slane %v3658_v2, 1  ;;  %v543_v41 = vrot.slane %v3656_v36, 1  ;;  %v3660_v40 = vshll.u32 %v3053_v54, 16 }
  0x36   : > { %v528_v58 = vsel %vm438_vm4, %v524_v23, %v527_v37  ;;  %v534_v13 = vor.u32 %v533_v61, %v3659_v17  ;;  %v943_v20 = vsel %vm910_vm2, %v941_v22, %v942_v56  ;;  %v1149_v23 = vrot.slane %v441_v21, 2 }
  0x37   : > { %v1151_v37 = vshrl.u32 %v2785_v8, 16  ;;  %v544_v44 = vor.u32 %v543_v41, %v3657_v0  ;;  %v547_v50 = vrot.slane %v3655_v32, 1  ;;  %v944_v56 = vrot.slane %v3053_v54, 1 }
  0x38   : > { %v945_v21 = vrot.slane %v3026_v28, 1  ;;  %v3662_v41 = vshrl.u32 %v3053_v54, 16  ;;  %v553_v61 = vrot.slane %v3660_v40, 1  ;;  %v3661_v32 = vshll.u32 %v3026_v28, 16 }
  0x39   : > { %2424 = vmatmul.mubr.msk.bf16.gmra.mrb[12].mxu1 %vm567_vm3, %v518_v1  ;;  %v1160_v1 = vshrl.u32 %v2791_v10, 16  ;;  %v1153_v22 = vrot.slane %v1151_v37, 1  ;;  %v538_v36 = vsel %vm438_vm4, %v534_v13, %v537_v45  ;;  %v1158_v37 = vrot.slane %v451_v25, 2 }
  0x3a   : > { %2427 = vmatprep.mubr.msk.bf16.mxu1 %vm567_vm3, %v528_v58  ;;  %v1157_v58 = vrot.slane %v449_v24, 1  ;;  %v1150_v24 = vor.u32 %v1149_v23, %v1148_v35  ;;  %v548_v2 = vsel %vm438_vm4, %v544_v44, %v547_v50  ;;  %v946_v40 = vsel %vm910_vm2, %v944_v56, %v945_v21 }
  0x3b   : > { %v1155_v0 = vor.u32 %v1154_v12, %v1153_v22  ;;  %v1162_v17 = vrot.slane %v1160_v1, 1  ;;  %v554_v45 = vor.u32 %v553_v61, %v3662_v41  ;;  %v557_v12 = vrot.slane %v3661_v32, 1 }
  0x3c   : > { %2480 = vmatmul.mubr.msk.bf16.gmra.mrb[16].mxu0 %vm567_vm3, %v940_v53  ;;  %v1169_v53 = vshrl.u32 %v2800_v14, 16  ;;  %v3667_v35 = vshrl.u32 %v2827_v30, 16  ;;  %v1159_v1 = vor.u32 %v1158_v37, %v1157_v58  ;;  %v1178_v22 = vshrl.u32 %v2845_v39, 16 }
  0x3d   : > { %2483 = vmatprep.mubr.msk.bf16.mxu0 %vm567_vm3, %v943_v20  ;;  %v1163_v20 = vrot.slane %v455_v29, 2  ;;  %v1156_v25 = vsel %vm1147_vm5, %v1150_v24, %v1155_v0  ;;  %v3668_v29 = vshll.u32 %v2827_v30, 16  ;;  %v1187_v21 = vshrl.u32 %v2856_v46, 16 }
  0x3e   : > { %v1166_v13 = vrot.slane %v3667_v35, 1  ;;  %v1171_v44 = vrot.slane %v1169_v53, 1  ;;  %v1196_v61 = vshrl.u32 %v2887_v62, 16  ;;  %v558_v24 = vsel %vm438_vm4, %v554_v45, %v557_v12 }
  0x3f   : > { %v1167_v23 = vrot.slane %v3668_v29, 2  ;;  %v1164_v56 = vor.u32 %v1163_v20, %v1162_v17  ;;  %v3671_v58 = vshll.u32 %v2863_v48, 16  ;;  %v1180_v20 = vrot.slane %v1178_v22, 1 }
  0x40   : > { %v1189_v41 = vrot.slane %v1187_v21, 1  ;;  %v3675_v45 = vshll.u32 %v2856_v46, 16  ;;  %v1538_v21 = vsel %vm604_vm0, %v2919_v27, 0 }
  0x41   : > { %2428 = vmatmul.mubr.msk.bf16.gmra.mrb[16].mxu1 %vm567_vm3, %v538_v36  ;;  %v3669_v36 = vshll.u32 %v2800_v14, 16  ;;  %v1168_v53 = vor.u32 %v1167_v23, %v1166_v13  ;;  %v1176_v17 = vrot.slane %v3671_v58, 2  ;;  %v1165_v37 = vsel %vm1147_vm5, %v1159_v1, %v1164_v56 }
  0x42   : > { %2431 = vmatprep.mubr.msk.bf16.mxu1 %vm567_vm3, %v548_v2  ;;  %v3670_v2 = vshrl.u32 %v2863_v48, 16  ;;  %v1190_v12 = vrot.slane %v3675_v45, 2  ;;  %v3676_v13 = vshrl.u32 %v2907_v15, 16  ;;  %v1198_v1 = vrot.slane %v1196_v61, 1 }
  0x43   : > { %v1172_v50 = vrot.slane %v3669_v36, 2  ;;  %v3678_v56 = vshll.u32 %v2887_v62, 16  ;;  %v1205_v58 = vshrl.u32 %v2925_v34, 16  ;;  %v3680_v61 = vshll.u32 %v2949_v49, 16 }
  0x44   : > { %2484 = vmatmul.mubr.msk.bf16.gmra.mrb[20].mxu0 %vm567_vm3, %v946_v40  ;;  %v1175_v0 = vrot.slane %v3670_v2, 1  ;;  %v3672_v40 = vshll.u32 %v2845_v39, 16  ;;  %v3674_v2 = vshll.u32 %v2879_v57, 16  ;;  %v1193_v23 = vrot.slane %v3676_v13, 1 }
  0x45   : > { %2489 = vmatprep.mubr.msk.bf16.mxu0 %vm567_vm3, %v1156_v25  ;;  %v1173_v35 = vor.u32 %v1172_v50, %v1171_v44  ;;  %v3673_v25 = vshrl.u32 %v2879_v57, 16  ;;  %v3677_v44 = vshll.u32 %v2907_v15, 16  ;;  %v1199_v22 = vrot.slane %v3678_v56, 2 }
  0x46   : > { %v1181_v29 = vrot.slane %v3672_v40, 2  ;;  %v1185_v32 = vrot.slane %v3674_v2, 2  ;;  %v1203_v13 = vrot.slane %v3680_v61, 2  ;;  %v1191_v56 = vor.u32 %v1190_v12, %v1189_v41 }
  0x47   : > { %v1184_v36 = vrot.slane %v3673_v25, 1  ;;  %v1194_v50 = vrot.slane %v3677_v44, 2  ;;  %v1174_v40 = vsel %vm1147_vm5, %v1168_v53, %v1173_v35  ;;  %v1177_v25 = vor.u32 %v1176_v17, %v1175_v0 }
  0x48   : > { %v1182_v2 = vor.u32 %v1181_v29, %v1180_v20  ;;  %v1200_v52 = vor.u32 %v1199_v22, %v1198_v1  ;;  %v1207_v19 = vrot.slane %v1205_v58, 1  ;;  %v3681_v53 = vshll.u32 %v2925_v34, 16 }
  0x49   : > { %2432 = vmatmul.mubr.msk.bf16.gmra.mrb[20].mxu1 %vm567_vm3, %v558_v24  ;;  %v3679_v24 = vshrl.u32 %v2949_v49, 16  ;;  %v1186_v44 = vor.u32 %v1185_v32, %v1184_v36  ;;  %v1195_v27 = vor.u32 %v1194_v50, %v1193_v23  ;;  %v1214_v35 = vshrl.u32 %v2933_v38, 16 }
  0x4a   : > { %2437 = vmatprep.mubr.msk.bf16.mxu1 %vm567_vm3, %v2795_v11  ;;  %v1208_v0 = vrot.slane %v3681_v53, 2  ;;  %v1183_v17 = vsel %vm1147_vm5, %v1177_v25, %v1182_v2  ;;  %v1775_v29 = vsel %vm604_vm0, %v2940_v43, 0  ;;  %v3682_v41 = vshrl.u32 %v2956_v55, 16 }
  0x4b   : > { %v1202_v45 = vrot.slane %v3679_v24, 1  ;;  %v1192_v32 = vsel %vm1147_vm5, %v1186_v44, %v1191_v56  ;;  %v3683_v36 = vshll.u32 %v2956_v55, 16  ;;  %v3684_v23 = vshll.u32 %v2933_v38, 16 }
  0x4c   : > { %2490 = vmatmul.mubr.msk.bf16.vlgmr.msra.gmra.mrb[0].mxu0 %vm567_vm3, %v1165_v37  ;;  %v3160_v37 = vrot.slane %v3682_v41, 1  ;;  %v1201_v1 = vsel %vm1147_vm5, %v1195_v27, %v1200_v52  ;;  %v1209_v43 = vor.u32 %v1208_v0, %v1207_v19  ;;  %v3685_v22 = vshrl.u32 %v3004_v5, 16 }
  0x4d   : > { %2514 = vmatpush3.bf16.msra.mxu0 %v1538_v21  ;;  %2493 = vmatprep.mubr.msk.bf16.mxu0 %vm567_vm3, %v1174_v40  ;;  %v1204_v20 = vor.u32 %v1203_v13, %v1202_v45  ;;  %v3164_v12 = vrot.slane %v3683_v36, 2  ;;  %v3168_v50 = vrot.slane %v3684_v23, 2  ;;  %v1457_v21 = vrot.slane %v2795_v11, 2 }
  0x4e   : > { %v3175_v58 = vrot.slane %v3685_v22, 1  ;;  %v1216_v40 = vrot.slane %v1214_v35, 1  ;;  %v3686_v25 = vshll.u32 %v3004_v5, 16  ;;  %v1458_v24 = vrot.slane %v2785_v8, 2 }
  0x4f   : > { %v1460_v45 = vrot.slane %v2805_v16, 2  ;;  %v1461_v19 = vrot.slane %v2791_v10, 2  ;;  %v1463_v52 = vrot.slane %v2827_v30, 2  ;;  %v1464_v61 = vrot.slane %v2800_v14, 2 }
  0x50   : > { %v1221_v2 = vrot.slane %v3686_v25, 2  ;;  %v1466_v11 = vrot.slane %v2863_v48, 2  ;;  %v1223_v13 = vshrl.u32 %v2991_v51, 16  ;;  %v3687_v44 = vshll.u32 %v2991_v51, 16 }
  0x51   : > { %2438 = vmatmul.mubr.msk.bf16.vlgmr.msra.gmra.mrb[0].mxu1 %vm567_vm3, %v2805_v16  ;;  %v3193_v27 = vsel %vm604_vm0, %v1457_v21, %v1458_v24  ;;  %v1467_v8 = vrot.slane %v2845_v39, 2  ;;  %v3198_v10 = vsel %vm604_vm0, %v1460_v45, %v1461_v19  ;;  %v3201_v14 = vsel %vm604_vm0, %v1463_v52, %v1464_v61 }
  0x52   : > { %2441 = vmatprep.mubr.msk.bf16.mxu1 %vm567_vm3, %v2827_v30  ;;  %2540 = vmatpush3.bf16.msra.mxu1 %v1775_v29  ;;  %v1226_v56 = vrot.slane %v3687_v44, 2  ;;  %v1469_v16 = vrot.slane %v2879_v57, 2  ;;  %v1470_v30 = vrot.slane %v2856_v46, 2  ;;  %v1210_v53 = vsel %vm1147_vm5, %v1204_v20, %v1209_v43 }
  0x53   : > { %v3207_v0 = vsel %vm604_vm0, %v1466_v11, %v1467_v8  ;;  %v1472_v35 = vrot.slane %v2907_v15, 2  ;;  %v1473_v39 = vrot.slane %v2887_v62, 2  ;;  %v1475_v29 = vrot.slane %v2949_v49, 2 }
  0x54   : > { %2494 = vmatmul.mubr.msk.bf16.gmra.mrb[4].mxu0 %vm567_vm3, %v1183_v17  ;;  %v3212_v17 = vsel %vm604_vm0, %v1469_v16, %v1470_v30  ;;  %v1478_v41 = vrot.slane %v2956_v55, 2  ;;  %v1479_v20 = vrot.slane %v2933_v38, 2  ;;  %v1481_v36 = vrot.slane %v3004_v5, 2 }
  0x55   : > { %2497 = vmatprep.mubr.msk.bf16.mxu0 %vm567_vm3, %v1192_v32  ;;  %v1476_v32 = vrot.slane %v2925_v34, 2  ;;  %v3218_v46 = vsel %vm604_vm0, %v1472_v35, %v1473_v39  ;;  %v1482_v23 = vrot.slane %v2991_v51, 2  ;;  %v1484_v43 = vrot.slane %v3009_v18, 2 }
  0x56   : > { %v1485_v34 = vrot.slane %v2994_v47, 2  ;;  %v1487_v22 = vrot.slane %v3039_v3, 2  ;;  %v1225_v38 = vrot.slane %v1223_v13, 1  ;;  %v3234_v21 = vsel %vm604_vm0, %v1478_v41, %v1479_v20 }
  0x57   : > { %v3226_v62 = vsel %vm604_vm0, %v1475_v29, %v1476_v32  ;;  %v3237_v51 = vsel %vm604_vm0, %v1481_v36, %v1482_v23  ;;  %v1218_v45 = vor.u32 %v3168_v50, %v1216_v40  ;;  %v1232_v19 = vshrl.u32 %v2994_v47, 16 }
  0x58   : > { %v3241_v25 = vsel %vm604_vm0, %v1484_v43, %v1485_v34  ;;  %v1222_v52 = vor.u32 %v1221_v2, %v3175_v58  ;;  %v1227_v61 = vor.u32 %v1226_v56, %v1225_v38  ;;  %v1241_v11 = vshrl.u32 %v3012_v33, 16 }
  0x59   : > { %2442 = vmatmul.mubr.msk.bf16.gmra.mrb[4].mxu1 %vm567_vm3, %v2863_v48  ;;  %v1488_v48 = vrot.slane %v3012_v33, 2  ;;  %v3688_v13 = vshrl.u32 %v3009_v18, 16  ;;  %v3689_v44 = vshll.u32 %v3009_v18, 16  ;;  %v3690_v50 = vshll.u32 %v2994_v47, 16 }
  0x5a   : > { %2445 = vmatprep.mubr.msk.bf16.mxu1 %vm567_vm3, %v2879_v57  ;;  %v1213_v57 = vor.u32 %v3164_v12, %v3160_v37  ;;  %v1234_v12 = vrot.slane %v1232_v19, 1  ;;  %v3691_v58 = vshrl.u32 %v3039_v3, 16  ;;  %v1228_v56 = vsel %vm1147_vm5, %v1222_v52, %v1227_v61 }
  0x5b   : > { %v3245_v24 = vsel %vm604_vm0, %v1487_v22, %v1488_v48  ;;  %v1230_v8 = vrot.slane %v3689_v44, 2  ;;  %v1235_v40 = vrot.slane %v3690_v50, 2  ;;  %v3692_v16 = vshll.u32 %v3039_v3, 16 }
  0x5c   : > { %2498 = vmatmul.mubr.msk.bf16.gmra.mrb[8].mxu0 %vm567_vm3, %v1201_v1  ;;  %v1229_v1 = vrot.slane %v3688_v13, 1  ;;  %v1219_v37 = vsel %vm1147_vm5, %v1213_v57, %v1218_v45  ;;  %v1238_v2 = vrot.slane %v3691_v58, 1  ;;  %v1250_v29 = vshrl.u32 %v3026_v28, 16 }
  0x5d   : > { %2501 = vmatprep.mubr.msk.bf16.mxu0 %vm567_vm3, %v1210_v53  ;;  %v1239_v30 = vrot.slane %v3692_v16, 2  ;;  %v1243_v53 = vrot.slane %v1241_v11, 1  ;;  %v1236_v39 = vor.u32 %v1235_v40, %v1234_v12  ;;  %v3696_v34 = vshll.u32 %v3026_v28, 16  ;;  %v3389_v11 = vld [vmem:[%s3627_s2] ss:$0 sm:$0xff] }
  0x5e   : > { %v1231_v47 = vor.u32 %v1230_v8, %v1229_v1  ;;  %v1252_v43 = vrot.slane %v1250_v29, 1  ;;  %v3400_v40 = vld [vmem:[%s3629_s4] ss:$0 sm:$0xff] }
  0x5f   : > { %v1240_v32 = vor.u32 %v1239_v30, %v1238_v2  ;;  %v1253_v22 = vrot.slane %v3696_v34, 2 }
  0x60   : > { %v1237_v36 = vsel %vm1147_vm5, %v1231_v47, %v1236_v39 }
  0x61   : > { %2446 = vmatmul.mubr.msk.bf16.gmra.mrb[8].mxu1 %vm567_vm3, %v2907_v15  ;;  %v3693_v15 = vshll.u32 %v3012_v33, 16  ;;  %v3695_v33 = vshll.u32 %v3053_v54, 16 }
  0x62   : > { %2449 = vmatprep.mubr.msk.bf16.mxu1 %vm567_vm3, %v2949_v49  ;;  %v3694_v49 = vshrl.u32 %v3053_v54, 16 }
  0x63   : > { %v1244_v35 = vrot.slane %v3693_v15, 2  ;;  %v1248_v23 = vrot.slane %v3695_v33, 2 }
  0x64   : > { %2502 = vmatmul.mubr.msk.bf16.gmra.mrb[12].mxu0 %vm567_vm3, %v1219_v37  ;;  %v1247_v20 = vrot.slane %v3694_v49, 1 }
  0x65   : > { %2505 = vmatprep.mubr.msk.bf16.mxu0 %vm567_vm3, %v1228_v56  ;;  %v1245_v41 = vor.u32 %v1244_v35, %v1243_v53 }
  0x66   : > { %v1249_v48 = vor.u32 %v1248_v23, %v1247_v20 }
  0x67   : > { %v1246_v38 = vsel %vm1147_vm5, %v1240_v32, %v1245_v41 }
  0x69   : > { %2450 = vmatmul.mubr.msk.bf16.gmra.mrb[12].mxu1 %vm567_vm3, %v2956_v55  ;;  %v1254_v55 = vor.u32 %v1253_v22, %v1252_v43 }
  0x6a   : > { %2453 = vmatprep.mubr.msk.bf16.mxu1 %vm567_vm3, %v3004_v5 }
  0x6b   : > { %v1255_v57 = vsel %vm1147_vm5, %v1249_v48, %v1254_v55 }
  0x6c   : > { %2506 = vmatmul.mubr.msk.bf16.gmra.mrb[16].mxu0 %vm567_vm3, %v1237_v36 }
  0x6d   : > { %2509 = vmatprep.mubr.msk.bf16.mxu0 %vm567_vm3, %v1246_v38 }
  0x71   : > { %2454 = vmatmul.mubr.msk.bf16.gmra.mrb[16].mxu1 %vm567_vm3, %v3009_v18 }
  0x72   : > { %2457 = vmatprep.mubr.msk.bf16.mxu1 %vm567_vm3, %v3039_v3 }
  0x74   : > { %2510 = vmatmul.mubr.msk.bf16.gmra.mrb[20].mxu0 %vm567_vm3, %v1255_v57 }
  0x75   : > { %2515 = vmatprep.mubr.msk.bf16.mxu0 %vm567_vm3, %v3193_v27 }
  0x79   : > { %2458 = vmatmul.mubr.msk.bf16.gmra.mrb[20].mxu1 %vm567_vm3, %v3053_v54 }
  0x7a   : > { %2541 = vmatprep.mubr.msk.bf16.mxu1 %vm567_vm3, %v2778_v6  ;;  %v1490_v6 = vrot.slane %v3053_v54, 2 }
  0x7c   : > { %2516 = vmatmul.mubr.msk.bf16.vlgmr.msra.gmra.mrb[0].mxu0 %vm567_vm3, %v3198_v10 }
  0x7d   : > { %2519 = vmatprep.mubr.msk.bf16.mxu0 %vm567_vm3, %v3201_v14 }
  0x81   : > { %2542 = vmatmul.mubr.msk.bf16.vlgmr.msra.gmra.mrb[24].mxu1 %vm567_vm3, %v2782_v7  ;;  %v1491_v7 = vrot.slane %v3026_v28, 2 }
  0x82   : > { %2545 = vmatprep.mubr.msk.bf16.mxu1 %vm567_vm3, %v2788_v9 }
  0x83   : > { %v1492_v9 = vsel %vm604_vm0, %v1490_v6, %v1491_v7 }
  0x84   : > { %2520 = vmatmul.mubr.msk.bf16.gmra.mrb[4].mxu0 %vm567_vm3, %v3207_v0 }
  0x85   : > { %2523 = vmatprep.mubr.msk.bf16.mxu0 %vm567_vm3, %v3212_v17 }
  0x89   : > { %2546 = vmatmul.mubr.msk.bf16.gmra.mrb[28].mxu1 %vm567_vm3, %v2818_v26  ;;  %v3697_v26 = vld [vmem:[#allocation2_spill] sm:$0xff] }
  0x8a   : > { %2549 = vmatprep.mubr.msk.bf16.mxu1 %vm567_vm3, %v2830_v31  ;;  %v3698_v31 = vld [vmem:[#allocation3_spill] sm:$0xff] }
  0x8c   : > { %2524 = vmatmul.mubr.msk.bf16.gmra.mrb[8].mxu0 %vm567_vm3, %v3218_v46 }
  0x8d   : > { %2527 = vmatprep.mubr.msk.bf16.mxu0 %vm567_vm3, %v3226_v62 }
  0x91   : > { %2550 = vmatmul.mubr.msk.bf16.gmra.mrb[32].mxu1 %vm567_vm3, %v2850_v42 }
  0x92   : > { %2553 = vmatprep.mubr.msk.bf16.mxu1 %vm567_vm3, %v2890_v63 }
  0x94   : > { %2528 = vmatmul.mubr.msk.bf16.gmra.mrb[12].mxu0 %vm567_vm3, %v3234_v21 }
  0x95   : > { %2531 = vmatprep.mubr.msk.bf16.mxu0 %vm567_vm3, %v3237_v51 }
  0x99   : > { %2554 = vmatmul.mubr.msk.bf16.gmra.mrb[36].mxu1 %vm567_vm3, %v2899_v4 }
  0x9a   : > { %2557 = vmatprep.mubr.msk.bf16.mxu1 %vm567_vm3, %v2960_v59 }
  0x9c   : > { %2532 = vmatmul.mubr.msk.bf16.gmra.mrb[16].mxu0 %vm567_vm3, %v3241_v25 }
  0x9d   : > { %2535 = vmatprep.mubr.msk.bf16.mxu0 %vm567_vm3, %v3245_v24 }
  0xa1   : > { %2558 = vmatmul.mubr.msk.bf16.gmra.mrb[40].mxu1 %vm567_vm3, %v2963_v60 }
  0xa2   : > { %2561 = vmatprep.mubr.msk.bf16.mxu1 %vm567_vm3, %v3697_v26 }
  0xa4   : > { %2536 = vmatmul.mubr.msk.bf16.gmra.mrb[20].mxu0 %vm567_vm3, %v1492_v9 }
  0xa9   : > { %2562 = vmatmul.mubr.msk.bf16.gmra.mrb[44].mxu1 %vm567_vm3, %v3698_v31 }
 0x124   : > { %v2439_v42 = vpop.f32.mrb[0].mxu1 }
 0x125   : > { %v803_v63 = vpop.f32.mrb[1].mxu1 }
 0x126   : > { %v2440_v3 = vpop.f32.mrb[2].mxu1 }
 0x127   : > { %v806_v4 = vpop.f32.mrb[3].mxu1 }
 0x12c   : > { %v2443_v54 = vpop.f32.mrb[4].mxu1 }
 0x12d   : > { %v3347_v59 = vpop.f32.mrb[5].mxu1 }
 0x12e   : > { %v3349_v5 = vpop.f32.mrb[6].mxu1 }
 0x12f   : > { %v3351_v18 = vpop.f32.mrb[7].mxu1 }
 0x134   : > { %v3353_v60 = vpop.f32.mrb[8].mxu1 }
 0x135   : > { %v3355_v28 = vpop.f32.mrb[9].mxu1 }
 0x136   : > { %v3357_v27 = vpop.f32.mrb[10].mxu1 }
 0x137   : > { %v3359_v10 = vpop.f32.mrb[11].mxu1 }
 0x13c   : > { %v3361_v14 = vpop.f32.mrb[12].mxu1 }
 0x13d   : > { %v3363_v0 = vpop.f32.mrb[13].mxu1 }
 0x13e   : > { %v3365_v17 = vpop.f32.mrb[14].mxu1 }
 0x13f   : > { %v3367_v46 = vpop.f32.mrb[15].mxu1 }
 0x144   : > { %v3369_v62 = vpop.f32.mrb[16].mxu1 }
 0x145   : > { %v3371_v21 = vpop.f32.mrb[17].mxu1 }
 0x146   : > { %v3373_v51 = vpop.f32.mrb[18].mxu1 }
 0x147   : > { %v3375_v25 = vpop.f32.mrb[19].mxu1 }
 0x14c   : > { %v3377_v24 = vpop.f32.mrb[20].mxu1 }
 0x14d   : > { %v3379_v45 = vpop.f32.mrb[21].mxu1 }
 0x14e   : > { %v3381_v19 = vpop.f32.mrb[22].mxu1 }
 0x14f   : > { %v3384_v52 = vpop.f32.mrb[23].mxu1  ;;  %v2517_v61 = vpop.f32.mrb[0].mxu0 }
 0x150   : > { %v2565_v13 = vadd.f32 %v2517_v61, %v2439_v42  ;;  %v1574_v1 = vpop.f32.mrb[1].mxu0 }
 0x151   : > { %v2566_v44 = vadd.f32 %v1574_v1, %v803_v63  ;;  %v2518_v8 = vpop.f32.mrb[2].mxu0 }
 0x152   : > { %v1702_v37 = vadd.f32 %v2565_v13, %v3389_v11  ;;  %v2567_v12 = vadd.f32 %v2518_v8, %v2440_v3  ;;  %v1577_v50 = vpop.f32.mrb[3].mxu0 }
 0x153   : > { %v1700_v58 = vadd.f32 %v2566_v44, %v3389_v11  ;;  %v2568_v2 = vadd.f32 %v1577_v50, %v806_v4 }
 0x154   : > { %1909 = vst.msk [vmem:[%s3394_s28 + $0x10] sm:$0xff] %vm1906_vm6, %v1702_v37  ;;  %v1703_v56 = vadd.f32 %v2567_v12, %v3389_v11  ;;  %v2543_v16 = vpop.f32.mrb[24].mxu1  ;;  %v2010_v47 = vmul.f32 %v1702_v37, %v1702_v37  ;;  %v1958_v48 = vsel %vm1906_vm6, %v1702_v37, 0.0 }
 0x155   : > { %1907 = vst.msk [vmem:[%s3394_s28] sm:$0xff] %vm1906_vm6, %v1700_v58  ;;  %v2008_v30 = vmul.f32 %v1700_v58, %v1700_v58  ;;  %v1701_v53 = vadd.f32 %v2568_v2, %v3389_v11  ;;  %v1820_v15 = vadd.f32 %v2543_v16, %v3400_v40  ;;  %v1811_v35 = vpop.f32.mrb[25].mxu1  ;;  %v1955_v32 = vsel %vm1906_vm6, %v1700_v58, 0.0 }
 0x156   : > { %1910 = vst.msk [vmem:[%s3394_s28 + $0x18] sm:$0xff] %vm1906_vm6, %v1703_v56  ;;  %v1812_v39 = vadd.f32 %v3400_v40, %v1811_v35  ;;  %v2544_v29 = vpop.f32.mrb[26].mxu1  ;;  %v2011_v23 = vmul.f32 %v1703_v56, %v1703_v56  ;;  %v2035_v3 = vsel %vm1906_vm6, %v2010_v47, 0.0  ;;  %v1960_v4 = vsel %vm1906_vm6, %v1703_v56, 0.0 }
 0x157   : > { %1908 = vst.msk [vmem:[%s3394_s28 + $0x8] sm:$0xff] %vm1906_vm6, %v1701_v53  ;;  %v1956_v41 = vsel %vm1906_vm6, %v1701_v53, 0.0  ;;  %v2009_v49 = vmul.f32 %v1701_v53, %v1701_v53  ;;  %v2521_v20 = vpop.f32.mrb[4].mxu0  ;;  %1933 = vst.msk [vmem:[%s3409_s9 + $0x10] sm:$0xff] %vm1906_vm6, %v1820_v15  ;;  %v1823_v36 = vadd.f32 %v2544_v29, %v3400_v40  ;;  %v1814_v33 = vpop.f32.mrb[27].mxu1  ;;  %v2032_v55 = vsel %vm1906_vm6, %v2008_v30, 0.0 }
 0x158   : > { %v1957_v43 = vadd.f32 %v1956_v41, %v1955_v32  ;;  %v2569_v34 = vadd.f32 %v2521_v20, %v2443_v54  ;;  %v1590_v22 = vpop.f32.mrb[5].mxu0  ;;  %1931 = vst.msk [vmem:[%s3409_s9] sm:$0xff] %vm1906_vm6, %v1812_v39  ;;  %v1815_v38 = vadd.f32 %v3400_v40, %v1814_v33  ;;  %v2037_v61 = vsel %vm1906_vm6, %v2011_v23, 0.0 }
 0x159   : > { %v2033_v57 = vsel %vm1906_vm6, %v2009_v49, 0.0  ;;  %v2570_v6 = vadd.f32 %v1590_v22, %v3347_v59  ;;  %v2522_v7 = vpop.f32.mrb[6].mxu0  ;;  %1934 = vst.msk [vmem:[%s3409_s9 + $0x18] sm:$0xff] %vm1906_vm6, %v1823_v36 }
 0x15a   : > { %v1959_v9 = vadd.f32 %v1958_v48, %v1957_v43  ;;  %v2034_v26 = vadd.f32 %v2033_v57, %v2032_v55  ;;  %v1706_v31 = vadd.f32 %v2569_v34, %v3389_v11  ;;  %v2571_v42 = vadd.f32 %v2522_v7, %v3349_v5  ;;  %v1593_v63 = vpop.f32.mrb[7].mxu0  ;;  %1932 = vst.msk [vmem:[%s3409_s9 + $0x8] sm:$0xff] %vm1906_vm6, %v1815_v38 }
 0x15b   : > { %v1704_v54 = vadd.f32 %v2570_v6, %v3389_v11  ;;  %v2572_v59 = vadd.f32 %v1593_v63, %v3351_v18 }
 0x15c   : > { %v2036_v13 = vadd.f32 %v2035_v3, %v2034_v26  ;;  %1913 = vst.msk [vmem:[%s3394_s28 + $0x30] sm:$0xff] %vm1906_vm6, %v1706_v31  ;;  %v1961_v1 = vadd.f32 %v1960_v4, %v1959_v9  ;;  %v2547_v44 = vpop.f32.mrb[28].mxu1  ;;  %v1707_v37 = vadd.f32 %v2571_v42, %v3389_v11  ;;  %v1966_v18 = vsel %vm1906_vm6, %v1706_v31, 0.0 }
 0x15d   : > { %1911 = vst.msk [vmem:[%s3394_s28 + $0x20] sm:$0xff] %vm1906_vm6, %v1704_v54  ;;  %v1962_v5 = vsel %vm1906_vm6, %v1704_v54, 0.0  ;;  %v2012_v8 = vmul.f32 %v1704_v54, %v1704_v54  ;;  %v1705_v12 = vadd.f32 %v2572_v59, %v3389_v11  ;;  %v1827_v50 = vpop.f32.mrb[29].mxu1  ;;  %v1836_v56 = vadd.f32 %v2547_v44, %v3400_v40 }
 0x15e   : > { %v1963_v58 = vadd.f32 %v1962_v5, %v1961_v1  ;;  %v2038_v2 = vadd.f32 %v2037_v61, %v2036_v13  ;;  %v2548_v16 = vpop.f32.mrb[30].mxu1  ;;  %v2014_v30 = vmul.f32 %v1706_v31, %v1706_v31  ;;  %1914 = vst.msk [vmem:[%s3394_s28 + $0x38] sm:$0xff] %vm1906_vm6, %v1707_v37  ;;  %v2015_v15 = vmul.f32 %v1707_v37, %v1707_v37 }
 0x15f   : > { %v2039_v53 = vsel %vm1906_vm6, %v2012_v8, 0.0  ;;  %1912 = vst.msk [vmem:[%s3394_s28 + $0x28] sm:$0xff] %vm1906_vm6, %v1705_v12  ;;  %v1964_v35 = vsel %vm1906_vm6, %v1705_v12, 0.0  ;;  %v2525_v47 = vpop.f32.mrb[8].mxu0  ;;  %v1830_v39 = vpop.f32.mrb[31].mxu1  ;;  %v2013_v41 = vmul.f32 %v1705_v12, %v1705_v12  ;;  %1937 = vst.msk [vmem:[%s3409_s9 + $0x30] sm:$0xff] %vm1906_vm6, %v1836_v56  ;;  %v1828_v43 = vadd.f32 %v3400_v40, %v1827_v50 }
 0x160   : > { %v2040_v29 = vadd.f32 %v2039_v53, %v2038_v2  ;;  %v1965_v32 = vadd.f32 %v1964_v35, %v1963_v58  ;;  %v2573_v49 = vadd.f32 %v2525_v47, %v3353_v60  ;;  %v1606_v20 = vpop.f32.mrb[9].mxu0  ;;  %v1968_v36 = vsel %vm1906_vm6, %v1707_v37, 0.0 }
 0x161   : > { %v2574_v33 = vadd.f32 %v1606_v20, %v3355_v28  ;;  %v2526_v23 = vpop.f32.mrb[10].mxu0  ;;  %v1839_v34 = vadd.f32 %v2548_v16, %v3400_v40  ;;  %v2041_v38 = vsel %vm1906_vm6, %v2013_v41, 0.0  ;;  %1935 = vst.msk [vmem:[%s3409_s9 + $0x20] sm:$0xff] %vm1906_vm6, %v1828_v43  ;;  %v1831_v7 = vadd.f32 %v3400_v40, %v1830_v39 }
 0x162   : > { %v1967_v22 = vadd.f32 %v1966_v18, %v1965_v32  ;;  %v1710_v60 = vadd.f32 %v2573_v49, %v3389_v11  ;;  %v2575_v48 = vadd.f32 %v2526_v23, %v3357_v27  ;;  %v1609_v55 = vpop.f32.mrb[11].mxu0  ;;  %v2042_v57 = vadd.f32 %v2041_v38, %v2040_v29 }
 0x163   : > { %v1708_v6 = vadd.f32 %v2574_v33, %v3389_v11  ;;  %v2576_v28 = vadd.f32 %v1609_v55, %v3359_v10  ;;  %1938 = vst.msk [vmem:[%s3409_s9 + $0x38] sm:$0xff] %vm1906_vm6, %v1839_v34  ;;  %v2043_v9 = vsel %vm1906_vm6, %v2014_v30, 0.0  ;;  %v2045_v26 = vsel %vm1906_vm6, %v2015_v15, 0.0  ;;  %1936 = vst.msk [vmem:[%s3409_s9 + $0x28] sm:$0xff] %vm1906_vm6, %v1831_v7 }
 0x164   : > { %1917 = vst.msk [vmem:[%s3394_s28 + $0x50] sm:$0xff] %vm1906_vm6, %v1710_v60  ;;  %v1969_v27 = vadd.f32 %v1968_v36, %v1967_v22  ;;  %v1711_v31 = vadd.f32 %v2575_v48, %v3389_v11  ;;  %v2551_v42 = vpop.f32.mrb[32].mxu1  ;;  %v2044_v63 = vadd.f32 %v2043_v9, %v2042_v57  ;;  %v1974_v59 = vsel %vm1906_vm6, %v1710_v60, 0.0 }
 0x165   : > { %1915 = vst.msk [vmem:[%s3394_s28 + $0x40] sm:$0xff] %vm1906_vm6, %v1708_v6  ;;  %v1970_v10 = vsel %vm1906_vm6, %v1708_v6, 0.0  ;;  %v2016_v3 = vmul.f32 %v1708_v6, %v1708_v6  ;;  %v1709_v4 = vadd.f32 %v2576_v28, %v3389_v11  ;;  %v1843_v54 = vpop.f32.mrb[33].mxu1  ;;  %v2018_v61 = vmul.f32 %v1710_v60, %v1710_v60 }
 0x166   : > { %v1971_v13 = vadd.f32 %v1970_v10, %v1969_v27  ;;  %1918 = vst.msk [vmem:[%s3394_s28 + $0x58] sm:$0xff] %vm1906_vm6, %v1711_v31  ;;  %v1976_v1 = vsel %vm1906_vm6, %v1711_v31, 0.0  ;;  %v2552_v44 = vpop.f32.mrb[34].mxu1  ;;  %v2046_v5 = vadd.f32 %v2045_v26, %v2044_v63  ;;  %v2019_v58 = vmul.f32 %v1711_v31, %v1711_v31 }
 0x167   : > { %v2047_v8 = vsel %vm1906_vm6, %v2016_v3, 0.0  ;;  %1916 = vst.msk [vmem:[%s3394_s28 + $0x48] sm:$0xff] %vm1906_vm6, %v1709_v4  ;;  %v1972_v37 = vsel %vm1906_vm6, %v1709_v4, 0.0  ;;  %v2017_v12 = vmul.f32 %v1709_v4, %v1709_v4  ;;  %v2529_v50 = vpop.f32.mrb[12].mxu0  ;;  %v1846_v18 = vpop.f32.mrb[35].mxu1  ;;  %v1852_v30 = vadd.f32 %v2551_v42, %v3400_v40 }
 0x168   : > { %v1973_v2 = vadd.f32 %v1972_v37, %v1971_v13  ;;  %v2577_v56 = vadd.f32 %v2529_v50, %v3361_v14  ;;  %v1622_v16 = vpop.f32.mrb[13].mxu0  ;;  %v2048_v53 = vadd.f32 %v2047_v8, %v2046_v5  ;;  %v1844_v39 = vadd.f32 %v3400_v40, %v1843_v54 }
 0x169   : > { %v2049_v15 = vsel %vm1906_vm6, %v2017_v12, 0.0  ;;  %v2578_v35 = vadd.f32 %v1622_v16, %v3363_v0  ;;  %v2530_v47 = vpop.f32.mrb[14].mxu0  ;;  %1941 = vst.msk [vmem:[%s3409_s9 + $0x50] sm:$0xff] %vm1906_vm6, %v1852_v30  ;;  %v1855_v49 = vadd.f32 %v2552_v44, %v3400_v40  ;;  %v1847_v33 = vadd.f32 %v3400_v40, %v1846_v18 }
 0x16a   : > { %v1975_v29 = vadd.f32 %v1974_v59, %v1973_v2  ;;  %v1714_v32 = vadd.f32 %v2577_v56, %v3389_v11  ;;  %v2579_v41 = vadd.f32 %v2530_v47, %v3365_v17  ;;  %v1625_v14 = vpop.f32.mrb[15].mxu0  ;;  %v2050_v20 = vadd.f32 %v2049_v15, %v2048_v53  ;;  %1939 = vst.msk [vmem:[%s3409_s9 + $0x40] sm:$0xff] %vm1906_vm6, %v1844_v39 }
 0x16b   : > { %v1712_v36 = vadd.f32 %v2578_v35, %v3389_v11  ;;  %v2580_v0 = vadd.f32 %v1625_v14, %v3367_v46  ;;  %v2051_v23 = vsel %vm1906_vm6, %v2018_v61, 0.0  ;;  %v2053_v17 = vsel %vm1906_vm6, %v2019_v58, 0.0  ;;  %1942 = vst.msk [vmem:[%s3409_s9 + $0x58] sm:$0xff] %vm1906_vm6, %v1855_v49  ;;  %1940 = vst.msk [vmem:[%s3409_s9 + $0x48] sm:$0xff] %vm1906_vm6, %v1847_v33 }
 0x16c   : > { %1921 = vst.msk [vmem:[%s3394_s28 + $0x70] sm:$0xff] %vm1906_vm6, %v1714_v32  ;;  %v1977_v43 = vadd.f32 %v1976_v1, %v1975_v29  ;;  %v1715_v34 = vadd.f32 %v2579_v41, %v3389_v11  ;;  %v2555_v22 = vpop.f32.mrb[36].mxu1  ;;  %v2052_v38 = vadd.f32 %v2051_v23, %v2050_v20  ;;  %v1982_v57 = vsel %vm1906_vm6, %v1714_v32, 0.0 }
 0x16d   : > { %1919 = vst.msk [vmem:[%s3394_s28 + $0x60] sm:$0xff] %vm1906_vm6, %v1712_v36  ;;  %v1978_v46 = vsel %vm1906_vm6, %v1712_v36, 0.0  ;;  %v2020_v60 = vmul.f32 %v1712_v36, %v1712_v36  ;;  %v1713_v48 = vadd.f32 %v2580_v0, %v3389_v11  ;;  %v1859_v55 = vpop.f32.mrb[37].mxu1  ;;  %v2022_v6 = vmul.f32 %v1714_v32, %v1714_v32 }
 0x16e   : > { %v1979_v28 = vadd.f32 %v1978_v46, %v1977_v43  ;;  %1922 = vst.msk [vmem:[%s3394_s28 + $0x78] sm:$0xff] %vm1906_vm6, %v1715_v34  ;;  %v1984_v7 = vsel %vm1906_vm6, %v1715_v34, 0.0  ;;  %v2556_v9 = vpop.f32.mrb[38].mxu1  ;;  %v2054_v26 = vadd.f32 %v2053_v17, %v2052_v38  ;;  %v2023_v3 = vmul.f32 %v1715_v34, %v1715_v34 }
 0x16f   : > { %v2055_v27 = vsel %vm1906_vm6, %v2020_v60, 0.0  ;;  %1920 = vst.msk [vmem:[%s3394_s28 + $0x68] sm:$0xff] %vm1906_vm6, %v1713_v48  ;;  %v1980_v31 = vsel %vm1906_vm6, %v1713_v48, 0.0  ;;  %v2021_v42 = vmul.f32 %v1713_v48, %v1713_v48  ;;  %v2533_v63 = vpop.f32.mrb[16].mxu0  ;;  %v1862_v10 = vpop.f32.mrb[39].mxu1  ;;  %v1868_v61 = vadd.f32 %v2555_v22, %v3400_v40 }
 0x170   : > { %v1981_v4 = vadd.f32 %v1980_v31, %v1979_v28  ;;  %v2581_v54 = vadd.f32 %v2533_v63, %v3369_v62  ;;  %v1638_v59 = vpop.f32.mrb[17].mxu0  ;;  %v2056_v13 = vadd.f32 %v2055_v27, %v2054_v26  ;;  %v1860_v8 = vadd.f32 %v3400_v40, %v1859_v55 }
 0x171   : > { %v2057_v1 = vsel %vm1906_vm6, %v2021_v42, 0.0  ;;  %v2582_v44 = vadd.f32 %v1638_v59, %v3371_v21  ;;  %v2534_v5 = vpop.f32.mrb[18].mxu0  ;;  %1945 = vst.msk [vmem:[%s3409_s9 + $0x70] sm:$0xff] %vm1906_vm6, %v1868_v61  ;;  %v1871_v18 = vadd.f32 %v2556_v9, %v3400_v40  ;;  %v1863_v56 = vadd.f32 %v3400_v40, %v1862_v10 }
 0x172   : > { %v1983_v37 = vadd.f32 %v1982_v57, %v1981_v4  ;;  %v1718_v12 = vadd.f32 %v2581_v54, %v3389_v11  ;;  %v2583_v50 = vadd.f32 %v2534_v5, %v3373_v51  ;;  %v1641_v62 = vpop.f32.mrb[19].mxu0  ;;  %v2058_v58 = vadd.f32 %v2057_v1, %v2056_v13  ;;  %1943 = vst.msk [vmem:[%s3409_s9 + $0x60] sm:$0xff] %vm1906_vm6, %v1860_v8 }
 0x173   : > { %v1716_v2 = vadd.f32 %v2582_v44, %v3389_v11  ;;  %v2584_v21 = vadd.f32 %v1641_v62, %v3375_v25  ;;  %v2059_v16 = vsel %vm1906_vm6, %v2022_v6, 0.0  ;;  %v2061_v51 = vsel %vm1906_vm6, %v2023_v3, 0.0  ;;  %1946 = vst.msk [vmem:[%s3409_s9 + $0x78] sm:$0xff] %vm1906_vm6, %v1871_v18  ;;  %1944 = vst.msk [vmem:[%s3409_s9 + $0x68] sm:$0xff] %vm1906_vm6, %v1863_v56 }
 0x174   : > { %1925 = vst.msk [vmem:[%s3394_s28 + $0x90] sm:$0xff] %vm1906_vm6, %v1718_v12  ;;  %v1985_v30 = vadd.f32 %v1984_v7, %v1983_v37  ;;  %v1719_v53 = vadd.f32 %v2583_v50, %v3389_v11  ;;  %v2559_v15 = vpop.f32.mrb[40].mxu1  ;;  %v2060_v35 = vadd.f32 %v2059_v16, %v2058_v58  ;;  %v1990_v32 = vsel %vm1906_vm6, %v1718_v12, 0.0 }
 0x175   : > { %1923 = vst.msk [vmem:[%s3394_s28 + $0x80] sm:$0xff] %vm1906_vm6, %v1716_v2  ;;  %v1986_v25 = vsel %vm1906_vm6, %v1716_v2, 0.0  ;;  %v2024_v47 = vmul.f32 %v1716_v2, %v1716_v2  ;;  %v1717_v39 = vadd.f32 %v2584_v21, %v3389_v11  ;;  %v1875_v29 = vpop.f32.mrb[41].mxu1  ;;  %v2026_v41 = vmul.f32 %v1718_v12, %v1718_v12 }
 0x176   : > { %v1987_v14 = vadd.f32 %v1986_v25, %v1985_v30  ;;  %1926 = vst.msk [vmem:[%s3394_s28 + $0x98] sm:$0xff] %vm1906_vm6, %v1719_v53  ;;  %v1992_v49 = vsel %vm1906_vm6, %v1719_v53, 0.0  ;;  %v2560_v20 = vpop.f32.mrb[42].mxu1  ;;  %v2062_v36 = vadd.f32 %v2061_v51, %v2060_v35  ;;  %v2027_v34 = vmul.f32 %v1719_v53, %v1719_v53 }
 0x177   : > { %v2063_v0 = vsel %vm1906_vm6, %v2024_v47, 0.0  ;;  %1924 = vst.msk [vmem:[%s3394_s28 + $0x88] sm:$0xff] %vm1906_vm6, %v1717_v39  ;;  %v1988_v33 = vsel %vm1906_vm6, %v1717_v39, 0.0  ;;  %v2025_v23 = vmul.f32 %v1717_v39, %v1717_v39  ;;  %v2537_v17 = vpop.f32.mrb[20].mxu0  ;;  %v1878_v43 = vpop.f32.mrb[43].mxu1  ;;  %v1884_v60 = vadd.f32 %v2559_v15, %v3400_v40 }
 0x178   : > { %v1989_v22 = vadd.f32 %v1988_v33, %v1987_v14  ;;  %v2585_v38 = vadd.f32 %v2537_v17, %v3377_v24  ;;  %v1654_v46 = vpop.f32.mrb[21].mxu0  ;;  %v2064_v48 = vadd.f32 %v2063_v0, %v2062_v36  ;;  %v1876_v28 = vadd.f32 %v3400_v40, %v1875_v29 }
 0x179   : > { %v2065_v55 = vsel %vm1906_vm6, %v2025_v23, 0.0  ;;  %v2586_v57 = vadd.f32 %v1654_v46, %v3379_v45  ;;  %v2538_v6 = vpop.f32.mrb[22].mxu0  ;;  %1949 = vst.msk [vmem:[%s3409_s9 + $0x90] sm:$0xff] %vm1906_vm6, %v1884_v60  ;;  %v1887_v27 = vadd.f32 %v2560_v20, %v3400_v40  ;;  %v1879_v63 = vadd.f32 %v3400_v40, %v1878_v43 }
 0x17a   : > { %v1991_v7 = vadd.f32 %v1990_v32, %v1989_v22  ;;  %v1722_v9 = vadd.f32 %v2585_v38, %v3389_v11  ;;  %v2587_v26 = vadd.f32 %v2538_v6, %v3381_v19  ;;  %v1657_v24 = vpop.f32.mrb[23].mxu0  ;;  %v2066_v31 = vadd.f32 %v2065_v55, %v2064_v48  ;;  %1947 = vst.msk [vmem:[%s3409_s9 + $0x80] sm:$0xff] %vm1906_vm6, %v1876_v28 }
 0x17b   : > { %v1720_v42 = vadd.f32 %v2586_v57, %v3389_v11  ;;  %v2588_v45 = vadd.f32 %v1657_v24, %v3384_v52  ;;  %v2067_v10 = vsel %vm1906_vm6, %v2026_v41, 0.0  ;;  %1950 = vst.msk [vmem:[%s3409_s9 + $0x98] sm:$0xff] %vm1906_vm6, %v1887_v27  ;;  %1948 = vst.msk [vmem:[%s3409_s9 + $0x88] sm:$0xff] %vm1906_vm6, %v1879_v63  ;;  %v2069_v1 = vsel %vm1906_vm6, %v2027_v34, 0.0 }
 0x17c   : > { %1929 = vst.msk [vmem:[%s3394_s28 + $0xb0] sm:$0xff] %vm1906_vm6, %v1722_v9  ;;  %v1993_v19 = vadd.f32 %v1992_v49, %v1991_v7  ;;  %v1723_v3 = vadd.f32 %v2587_v26, %v3389_v11  ;;  %v2563_v4 = vpop.f32.mrb[44].mxu1  ;;  %v2068_v54 = vadd.f32 %v2067_v10, %v2066_v31  ;;  %v1998_v44 = vsel %vm1906_vm6, %v1722_v9, 0.0 }
 0x17d   : > { %1927 = vst.msk [vmem:[%s3394_s28 + $0xa0] sm:$0xff] %vm1906_vm6, %v1720_v42  ;;  %v1994_v52 = vsel %vm1906_vm6, %v1720_v42, 0.0  ;;  %v2028_v59 = vmul.f32 %v1720_v42, %v1720_v42  ;;  %v1721_v61 = vadd.f32 %v2588_v45, %v3389_v11  ;;  %v1891_v13 = vpop.f32.mrb[45].mxu1  ;;  %v2030_v18 = vmul.f32 %v1722_v9, %v1722_v9 }
 0x17e   : > { %v1995_v5 = vadd.f32 %v1994_v52, %v1993_v19  ;;  %1930 = vst.msk [vmem:[%s3394_s28 + $0xb8] sm:$0xff] %vm1906_vm6, %v1723_v3  ;;  %v2564_v8 = vpop.f32.mrb[46].mxu1  ;;  %v2070_v37 = vadd.f32 %v2069_v1, %v2068_v54  ;;  %v1900_v2 = vadd.f32 %v2563_v4, %v3400_v40  ;;  %v1892_v21 = vadd.f32 %v3400_v40, %v1891_v13 }
 0x17f   : > { %v2071_v12 = vsel %vm1906_vm6, %v2028_v59, 0.0  ;;  %1928 = vst.msk [vmem:[%s3394_s28 + $0xa8] sm:$0xff] %vm1906_vm6, %v1721_v61  ;;  %v1996_v11 = vsel %vm1906_vm6, %v1721_v61, 0.0  ;;  %v2029_v50 = vmul.f32 %v1721_v61, %v1721_v61  ;;  %v1894_v62 = vpop.f32.mrb[47].mxu1  ;;  %v1903_v51 = vadd.f32 %v2564_v8, %v3400_v40 }
 0x180   : > { %v1997_v58 = vadd.f32 %v1996_v11, %v1995_v5  ;;  %v2072_v56 = vadd.f32 %v2071_v12, %v2070_v37  ;;  %v1895_v30 = vadd.f32 %v3400_v40, %v1894_v62  ;;  %v2031_v53 = vmul.f32 %v1723_v3, %v1723_v3  ;;  %1953 = vst.msk [vmem:[%s3409_s9 + $0xb0] sm:$0xff] %vm1906_vm6, %v1900_v2 }
 0x181   : > { %v2073_v16 = vsel %vm1906_vm6, %v2029_v50, 0.0  ;;  %1951 = vst.msk [vmem:[%s3409_s9 + $0xa0] sm:$0xff] %vm1906_vm6, %v1892_v21  ;;  %v2000_v35 = vsel %vm1906_vm6, %v1723_v3, 0.0  ;;  %1954 = vst.msk [vmem:[%s3409_s9 + $0xb8] sm:$0xff] %vm1906_vm6, %v1903_v51  ;;  %v2075_v47 = vsel %vm1906_vm6, %v2030_v18, 0.0 }
 0x182   : > { %v1999_v15 = vadd.f32 %v1998_v44, %v1997_v58  ;;  %v2074_v25 = vadd.f32 %v2073_v16, %v2072_v56  ;;  %1952 = vst.msk [vmem:[%s3409_s9 + $0xa8] sm:$0xff] %vm1906_vm6, %v1895_v30  ;;  %v2077_v40 = vsel %vm1906_vm6, %v2031_v53, 0.0 }
 0x184   : > { %v2001_v39 = vadd.f32 %v2000_v35, %v1999_v15  ;;  %v2076_v29 = vadd.f32 %v2075_v47, %v2074_v25 }
 0x186   : > { %v2002_v32 = vrot.slane %v2001_v39, 4  ;;  %v2078_v41 = vadd.f32 %v2077_v40, %v2076_v29 }
 0x188   : > { %v2003_v14 = vadd.f32 %v2002_v32, %v2001_v39  ;;  %v2079_v49 = vrot.slane %v2078_v41, 4 }
 0x18a   : > { %v2004_v20 = vrot.slane %v2003_v14, 2  ;;  %v2080_v36 = vadd.f32 %v2079_v49, %v2078_v41 }
 0x18c   : > { %v2005_v0 = vadd.f32 %v2004_v20, %v2003_v14  ;;  %v2081_v33 = vrot.slane %v2080_v36, 2 }
 0x18e   : > { %v2006_v23 = vrot.slane %v2005_v0, 1  ;;  %v2082_v17 = vadd.f32 %v2081_v33, %v2080_v36 }
 0x190   : > { %v2083_v43 = vrot.slane %v2082_v17, 1  ;;  %v2007_v34 = vadd.f32 %v2006_v23, %v2005_v0 }
 0x192   : > { %v2084_v22 = vadd.f32 %v2083_v43, %v2082_v17 }
 0x194   : > { %v2086_v38 = vsel %vm2085_vm7, %v2007_v34, %v2084_v22 }
 0x195   : > { %2088 = vst.msk [vmem:[%s312_s13] sm:$0x3] %vm2087_vm8, %v2086_v38 }
 0x196 PF: > { %s18_s24 = sadd.s32 1, %s2699_s24  }
 0x197   : > { %p15_p5 = scmp.ge.s32.totalorder %s18_s24, 4  }
 0x199   :  { %17 = sbr.rel (!%p15_p5) target bundleno = 1 (0x1), region = 98 }

// kernel: encoder_forward.9
= control target key start
LH: loop header
LB: loop body
LE: loop exit
PB: predicated region body
PF: predicated region fallthrough
CT: control target
= control target key end

     0   :  { %s1817_s21 = smov 0   ;;  %s2474_s0 = inlined_call_operand.vmem [shape: f32[24,16,32], index: 0, kind: input, shape index: {}]   ;;  %s2475_s1 = inlined_call_operand.vmem [shape: f32[1,32], index: 1, kind: input, shape index: {}]   ;;  %s2476_s2 = inlined_call_operand.vmem [shape: f32[1,32], index: 2, kind: input, shape index: {}]   ;;  %s2477_s3 = inlined_call_operand.vmem [shape: f32[24,16,32], index: 3, kind: input, shape index: {}]   ;;  %s2478_s4 = inlined_call_operand.vmem [shape: bf16[32,33], index: 4, kind: input, shape index: {}]   ;;  %s2479_s5 = inlined_call_operand.vmem [shape: f32[1,33], index: 5, kind: input, shape index: {}]   ;;  %s2480_s6 = inlined_call_operand.vmem [shape: f32[24,1,32], index: 6, kind: output, shape index: {}]  }
   0x1 LB: > { %s1616_s22 = sadd.s32 4294967295, %s1780_s21   ;;  %p1620_p0 = scmp.ge.s32.totalorder %s1780_s21, 1  ;;  %s1780_s21 = sphi %s1817_s21, %s16_s21  }
   0x2   : > { %p226_p1 = scmp.lt.s32.totalorder %s1780_s21, 3 }
   0x4   : > { %p227_p2 = pnand %p1620_p0, %p226_p1 }
   0x6   : > { %230 = sbr.rel (%p227_p2) target bundleno = 576 (0x240), region = 44 }
   0xd   : > { %v1700_v0 = vld [vmem:[%s2478_s4] sm:$0xff]   ;;  %s262_s25 = smul.u32 12, %s1616_s22  ;;  %v682_v1 = vlaneseq  ;;  %v1701_v2 = vld [vmem:[%s2478_s4 + $0x8] sm:$0xff]   ;;  %vm512_vm0 = vcmask 1046528   ;;  %vm621_vm1 = vcmask 1040384   ;;  %vm822_vm6 = vcmask 261120  }
   0xe   : > { %1660 = vmatprep.subr.bf16.mxu0 %v1700_v0  ;;  %1688 = vmatprep.subr.bf16.mxu1 %v1700_v0  ;;  %v1838_v5 = vld [vmem:[%s2475_s1] ss:$0 sm:$0xff] }
   0xf   : > { %p263_p3 = scmp.lt.s32.totalorder %s262_s25, 23  ;;  %1661 = vmatpush3.bf16.msra.mxu0 %v1700_v0  ;;  %1690 = vmatpush3.bf16.msra.mxu1 %v1700_v0  ;;  %v683_v3 = vshrl.u32 %v682_v1, 7  ;;  %v1855_v8 = vld [vmem:[%s2476_s2] ss:$0 sm:$0xff] }
  0x10   : > { %1662 = vmatprep.subr.bf16.mxu0 %v1701_v2  ;;  %1689 = vmatprep.subr.bf16.mxu1 %v1701_v2 }
  0x11   : > { %s2498_s25 = smov (!%p263_p3, %s262_s25), 23  ;;  %v684_v4 = vadd.s32 8, %v683_v3  ;;  %v689_v9 = vand.u32 1, %v683_v3 }
  0x12   : > { %s1644_s28 = sshll.u32 %s2498_s25, 4  ;;  %s2364_s19 = scalar_lea.vmem %s2480_s6, %s2498_s25 }
  0x13   : > { %1663 = vmatpush3.bf16.msra.mxu0 %v1701_v2  ;;  %1691 = vmatpush3.bf16.msra.mxu1 %v1701_v2  ;;  %s1843_s9 = scalar_lea.vmem %s2474_s0, %s1644_s28  ;;  %s1848_s12 = scalar_lea.vmem %s2477_s3, %s1644_s28  ;;  %v696_v10 = vand.u32 1, %v684_v4  ;;  %vm1872_vm2 = vcmp.eq.s32.totalorder %v689_v9, 0 }
  0x14   : > { %v282_v6 = vld [vmem:[%s1843_s9] sm:$0xff]  ;;  %v283_v7 = vld [vmem:[%s1843_s9 + $0x8] sm:$0xff]  ;;  %v284_v19 = vld [vmem:[%s1843_s9 + $0x10] sm:$0xff] }
  0x15   : > { %v313_v11 = vmul.f32 %v1838_v5, %v282_v6  ;;  %v314_v12 = vmul.f32 %v1838_v5, %v283_v7  ;;  %v294_v13 = vld [vmem:[%s1843_s9 + $0x60] sm:$0xff]  ;;  %v295_v14 = vld [vmem:[%s1843_s9 + $0x68] sm:$0xff]  ;;  %v285_v24 = vld [vmem:[%s1843_s9 + $0x18] sm:$0xff]  ;;  %v315_v25 = vmul.f32 %v1838_v5, %v284_v19  ;;  %vm1876_vm3 = vcmp.eq.s32.totalorder %v696_v10, 0 }
  0x16   : > { %v368_v15 = vld [vmem:[%s1848_s12] sm:$0xff]  ;;  %v369_v16 = vld [vmem:[%s1848_s12 + $0x8] sm:$0xff]  ;;  %v325_v17 = vmul.f32 %v1838_v5, %v294_v13  ;;  %v326_v18 = vmul.f32 %v1838_v5, %v295_v14  ;;  %v316_v30 = vmul.f32 %v1838_v5, %v285_v24  ;;  %v296_v31 = vld [vmem:[%s1843_s9 + $0x70] sm:$0xff] }
  0x17   : > { %v344_v20 = vadd.f32 %v1855_v8, %v313_v11  ;;  %v345_v21 = vadd.f32 %v1855_v8, %v314_v12  ;;  %v380_v22 = vld [vmem:[%s1848_s12 + $0x60] sm:$0xff]  ;;  %v381_v23 = vld [vmem:[%s1848_s12 + $0x68] sm:$0xff]  ;;  %v297_v32 = vld [vmem:[%s1843_s9 + $0x78] sm:$0xff]  ;;  %v346_v35 = vadd.f32 %v1855_v8, %v315_v25  ;;  %v327_v36 = vmul.f32 %v1838_v5, %v296_v31 }
  0x18   : > { %v356_v28 = vadd.f32 %v1855_v8, %v325_v17  ;;  %v357_v29 = vadd.f32 %v1855_v8, %v326_v18  ;;  %v347_v39 = vadd.f32 %v1855_v8, %v316_v30  ;;  %v370_v40 = vld [vmem:[%s1848_s12 + $0x10] sm:$0xff]  ;;  %v371_v41 = vld [vmem:[%s1848_s12 + $0x18] sm:$0xff]  ;;  %v328_v42 = vmul.f32 %v1838_v5, %v297_v32  ;;  %v286_v25 = vld [vmem:[%s1843_s9 + $0x20] sm:$0xff] }
  0x19   : > { %v392_v33 = vadd.f32 %v368_v15, %v344_v20  ;;  %v393_v34 = vadd.f32 %v369_v16, %v345_v21  ;;  %v394_v49 = vadd.f32 %v370_v40, %v346_v35  ;;  %v382_v20 = vld [vmem:[%s1848_s12 + $0x70] sm:$0xff]  ;;  %v358_v24 = vadd.f32 %v1855_v8, %v327_v36  ;;  %v383_v35 = vld [vmem:[%s1848_s12 + $0x78] sm:$0xff]  ;;  %v287_v40 = vld [vmem:[%s1843_s9 + $0x28] sm:$0xff] }
  0x1a   : > { %v404_v37 = vadd.f32 %v380_v22, %v356_v28  ;;  %v405_v38 = vadd.f32 %v381_v23, %v357_v29  ;;  %v395_v50 = vadd.f32 %v371_v41, %v347_v39  ;;  %v317_v41 = vmul.f32 %v1838_v5, %v286_v25 }
  0x1b   : > { %vm416_vm4 = vcmp.ge.f32.partialorder %v392_v33, 0.0  ;;  %vm417_vm5 = vcmp.ge.f32.partialorder %v393_v34, 0.0  ;;  %v440_v43 = vmul.f32 0.01, %v392_v33  ;;  %v441_v44 = vmul.f32 0.01, %v393_v34 }
  0x1c   : > { %vm428_vm7 = vcmp.ge.f32.partialorder %v404_v37, 0.0  ;;  %vm429_vm8 = vcmp.ge.f32.partialorder %v405_v38, 0.0  ;;  %v452_v45 = vmul.f32 0.01, %v404_v37  ;;  %v453_v46 = vmul.f32 0.01, %v405_v38 }
  0x1d   : > { %v464_v47 = vsel %vm416_vm4, %v392_v33, %v440_v43  ;;  %v465_v48 = vsel %vm417_vm5, %v393_v34, %v441_v44  ;;  %vm418_vm9 = vcmp.ge.f32.partialorder %v394_v49, 0.0  ;;  %vm419_vm10 = vcmp.ge.f32.partialorder %v395_v50, 0.0  ;;  %v288_v43 = vld [vmem:[%s1843_s9 + $0x30] sm:$0xff] }
  0x1e   : > { %v513_v51 = vrot.slane %v464_v47, 1  ;;  %v514_v52 = vrot.slane %v465_v48, 1  ;;  %v597_v53 = vrot.slane %v465_v48, 7  ;;  %v622_v54 = vrot.slane %v464_v47, 7 }
  0x1f   : > { %v476_v55 = vsel %vm428_vm7, %v404_v37, %v452_v45  ;;  %v477_v56 = vsel %vm429_vm8, %v405_v38, %v453_v46  ;;  %v442_v10 = vmul.f32 0.01, %v394_v49  ;;  %v443_v11 = vmul.f32 0.01, %v395_v50 }
  0x20   : > { %v515_v57 = vsel %vm512_vm0, %v513_v51, %v514_v52  ;;  %v585_v58 = vsel %vm512_vm0, %v514_v52, %v513_v51  ;;  %v623_v59 = vsel %vm621_vm1, %v622_v54, %v597_v53  ;;  %v670_v60 = vsel %vm621_vm1, %v597_v53, %v622_v54  ;;  %v289_v54 = vld [vmem:[%s1843_s9 + $0x38] sm:$0xff] }
  0x21   : > { %v711_v61 = vmax.f32 %v464_v47, %v515_v57  ;;  %v712_v62 = vmax.f32 %v465_v48, %v585_v58  ;;  %v735_v63 = vmax.f32 %v464_v47, %v670_v60  ;;  %v736_v0 = vmax.f32 %v465_v48, %v623_v59  ;;  %v373_v59 = vld [vmem:[%s1848_s12 + $0x28] sm:$0xff] }
  0x22   : > { %v531_v2 = vrot.slane %v476_v55, 1  ;;  %v532_v3 = vrot.slane %v477_v56, 1  ;;  %v603_v4 = vrot.slane %v477_v56, 7  ;;  %v634_v6 = vrot.slane %v476_v55, 7 }
  0x23   : > { %v763_v7 = vsel %vm1872_vm2, %v711_v61, %v735_v63  ;;  %v764_v9 = vsel %vm1876_vm3, %v712_v62, %v736_v0  ;;  %v466_v22 = vsel %vm418_vm9, %v394_v49, %v442_v10  ;;  %v467_v23 = vsel %vm419_vm10, %v395_v50, %v443_v11  ;;  %v372_v50 = vld [vmem:[%s1848_s12 + $0x20] sm:$0xff] }
  0x24   : > { %v787_v12 = vpack.c.bf16 %v764_v9, %v763_v7  ;;  %v533_v13 = vsel %vm512_vm0, %v531_v2, %v532_v3  ;;  %v591_v14 = vsel %vm512_vm0, %v532_v3, %v531_v2  ;;  %v635_v15 = vsel %vm621_vm1, %v634_v6, %v603_v4  ;;  %v298_v0 = vld [vmem:[%s1843_s9 + $0x80] sm:$0xff] }
  0x25   : > { %v676_v16 = vsel %vm621_vm1, %v603_v4, %v634_v6  ;;  %v723_v17 = vmax.f32 %v476_v55, %v533_v13  ;;  %v724_v18 = vmax.f32 %v477_v56, %v591_v14  ;;  %v748_v19 = vmax.f32 %v477_v56, %v635_v15  ;;  %v374_v14 = vld [vmem:[%s1848_s12 + $0x30] sm:$0xff] }
  0x26   : > { %1664 = vmatprep.mubr.msk.bf16.mxu0 %vm822_vm6, %v787_v12  ;;  %v747_v21 = vmax.f32 %v476_v55, %v676_v16  ;;  %v516_v29 = vrot.slane %v466_v22, 1  ;;  %v517_v30 = vrot.slane %v467_v23, 1  ;;  %v598_v31 = vrot.slane %v467_v23, 7 }
  0x27   : > { %v776_v28 = vsel %vm1876_vm3, %v724_v18, %v748_v19  ;;  %v624_v33 = vrot.slane %v466_v22, 7  ;;  %v359_v34 = vadd.f32 %v1855_v8, %v328_v42  ;;  %v406_v37 = vadd.f32 %v382_v20, %v358_v24  ;;  %v375_v24 = vld [vmem:[%s1848_s12 + $0x38] sm:$0xff] }
  0x28   : > { %v775_v32 = vsel %vm1872_vm2, %v723_v17, %v747_v21  ;;  %v518_v36 = vsel %vm512_vm0, %v516_v29, %v517_v30  ;;  %v586_v39 = vsel %vm512_vm0, %v517_v30, %v516_v29  ;;  %v318_v52 = vmul.f32 %v1838_v5, %v287_v40  ;;  %v299_v30 = vld [vmem:[%s1843_s9 + $0x88] sm:$0xff] }
  0x29   : > { %v793_v38 = vpack.c.bf16 %v776_v28, %v775_v32  ;;  %v625_v44 = vsel %vm621_vm1, %v624_v33, %v598_v31  ;;  %v671_v45 = vsel %vm621_vm1, %v598_v31, %v624_v33  ;;  %v713_v46 = vmax.f32 %v466_v22, %v518_v36 }
  0x2a   : > { %v714_v47 = vmax.f32 %v467_v23, %v586_v39  ;;  %v737_v42 = vmax.f32 %v466_v22, %v671_v45  ;;  %v738_v48 = vmax.f32 %v467_v23, %v625_v44  ;;  %v407_v49 = vadd.f32 %v383_v35, %v359_v34  ;;  %v300_v35 = vld [vmem:[%s1843_s9 + $0x90] sm:$0xff] }
  0x2b   : > { %1676 = vmatprep.mubr.msk.bf16.mxu1 %vm822_vm6, %v793_v38  ;;  %vm430_vm11 = vcmp.ge.f32.partialorder %v406_v37, 0.0  ;;  %v454_v51 = vmul.f32 0.01, %v406_v37  ;;  %v348_v53 = vadd.f32 %v1855_v8, %v317_v41  ;;  %v319_v55 = vmul.f32 %v1838_v5, %v288_v43 }
  0x2c   : > { %v765_v56 = vsel %vm1872_vm2, %v713_v46, %v737_v42  ;;  %v766_v57 = vsel %vm1876_vm3, %v714_v47, %v738_v48  ;;  %vm431_vm12 = vcmp.ge.f32.partialorder %v407_v49, 0.0  ;;  %v455_v58 = vmul.f32 0.01, %v407_v49  ;;  %v384_v46 = vld [vmem:[%s1848_s12 + $0x80] sm:$0xff] }
  0x2d   : > { %v788_v60 = vpack.c.bf16 %v766_v57, %v765_v56  ;;  %v478_v61 = vsel %vm430_vm11, %v406_v37, %v454_v51  ;;  %v349_v62 = vadd.f32 %v1855_v8, %v318_v52  ;;  %v396_v63 = vadd.f32 %v372_v50, %v348_v53 }
  0x2e   : > { %v479_v2 = vsel %vm431_vm12, %v407_v49, %v455_v58  ;;  %v534_v3 = vrot.slane %v478_v61, 1  ;;  %v636_v4 = vrot.slane %v478_v61, 7  ;;  %v320_v6 = vmul.f32 %v1838_v5, %v289_v54 }
  0x2f   : > { %1665 = vmatmul.mubr.msk.bf16.vlgmr.msra.gmra.mrb[0].mxu0 %vm822_vm6, %v788_v60  ;;  %v535_v7 = vrot.slane %v479_v2, 1  ;;  %v604_v9 = vrot.slane %v479_v2, 7  ;;  %v397_v10 = vadd.f32 %v373_v59, %v349_v62  ;;  %vm420_vm13 = vcmp.ge.f32.partialorder %v396_v63, 0.0 }
  0x30   : > { %v444_v11 = vmul.f32 0.01, %v396_v63  ;;  %v350_v12 = vadd.f32 %v1855_v8, %v319_v55  ;;  %v351_v13 = vadd.f32 %v1855_v8, %v320_v6  ;;  %v329_v15 = vmul.f32 %v1838_v5, %v298_v0  ;;  %v385_v55 = vld [vmem:[%s1848_s12 + $0x88] sm:$0xff] }
  0x31   : > { %v536_v16 = vsel %vm512_vm0, %v534_v3, %v535_v7  ;;  %v592_v17 = vsel %vm512_vm0, %v535_v7, %v534_v3  ;;  %v637_v18 = vsel %vm621_vm1, %v636_v4, %v604_v9  ;;  %v677_v19 = vsel %vm621_vm1, %v604_v9, %v636_v4 }
  0x32   : > { %v725_v20 = vmax.f32 %v478_v61, %v536_v16  ;;  %v726_v21 = vmax.f32 %v479_v2, %v592_v17  ;;  %v749_v22 = vmax.f32 %v478_v61, %v677_v19  ;;  %v750_v23 = vmax.f32 %v479_v2, %v637_v18 }
  0x33   : > { %vm421_vm14 = vcmp.ge.f32.partialorder %v397_v10, 0.0  ;;  %v445_v25 = vmul.f32 0.01, %v397_v10  ;;  %v468_v28 = vsel %vm420_vm13, %v396_v63, %v444_v11  ;;  %v398_v29 = vadd.f32 %v374_v14, %v350_v12  ;;  %v290_v11 = vld [vmem:[%s1843_s9 + $0x40] sm:$0xff] }
  0x34   : > { %v777_v31 = vsel %vm1872_vm2, %v725_v20, %v749_v22  ;;  %v778_v32 = vsel %vm1876_vm3, %v726_v21, %v750_v23  ;;  %v519_v33 = vrot.slane %v468_v28, 1  ;;  %v626_v34 = vrot.slane %v468_v28, 7  ;;  %v386_v22 = vld [vmem:[%s1848_s12 + $0x90] sm:$0xff]  ;;  %v291_v23 = vld [vmem:[%s1843_s9 + $0x48] sm:$0xff] }
  0x35   : > { %v794_v37 = vpack.c.bf16 %v778_v32, %v777_v31  ;;  %v469_v38 = vsel %vm421_vm14, %v397_v10, %v445_v25  ;;  %v399_v36 = vadd.f32 %v375_v24, %v351_v13  ;;  %vm422_vm15 = vcmp.ge.f32.partialorder %v398_v29, 0.0  ;;  %v301_v10 = vld [vmem:[%s1843_s9 + $0x98] sm:$0xff] }
  0x36   : > { %v520_v39 = vrot.slane %v469_v38, 1  ;;  %v599_v40 = vrot.slane %v469_v38, 7  ;;  %v446_v41 = vmul.f32 0.01, %v398_v29  ;;  %v330_v43 = vmul.f32 %v1838_v5, %v299_v30 }
  0x37   : > { %1677 = vmatmul.mubr.msk.bf16.vlgmr.msra.gmra.mrb[0].mxu1 %vm822_vm6, %v794_v37  ;;  %vm423_vm4 = vcmp.ge.f32.partialorder %v399_v36, 0.0  ;;  %v447_v44 = vmul.f32 0.01, %v399_v36  ;;  %v360_v45 = vadd.f32 %v1855_v8, %v329_v15  ;;  %v331_v47 = vmul.f32 %v1838_v5, %v300_v35  ;;  %v387_v37 = vld [vmem:[%s1848_s12 + $0x98] sm:$0xff] }
  0x38   : > { %v521_v42 = vsel %vm512_vm0, %v519_v33, %v520_v39  ;;  %v587_v48 = vsel %vm512_vm0, %v520_v39, %v519_v33  ;;  %v627_v49 = vsel %vm621_vm1, %v626_v34, %v599_v40  ;;  %v672_v50 = vsel %vm621_vm1, %v599_v40, %v626_v34 }
  0x39   : > { %v715_v51 = vmax.f32 %v468_v28, %v521_v42  ;;  %v716_v52 = vmax.f32 %v469_v38, %v587_v48  ;;  %v739_v53 = vmax.f32 %v468_v28, %v672_v50  ;;  %v740_v54 = vmax.f32 %v469_v38, %v627_v49 }
  0x3a   : > { %v470_v56 = vsel %vm422_vm15, %v398_v29, %v446_v41  ;;  %v471_v57 = vsel %vm423_vm4, %v399_v36, %v447_v44  ;;  %v361_v58 = vadd.f32 %v1855_v8, %v330_v43  ;;  %v408_v59 = vadd.f32 %v384_v46, %v360_v45  ;;  %v376_v45 = vld [vmem:[%s1848_s12 + $0x40] sm:$0xff]  ;;  %v292_v46 = vld [vmem:[%s1843_s9 + $0x50] sm:$0xff] }
  0x3b   : > { %v767_v60 = vsel %vm1872_vm2, %v715_v51, %v739_v53  ;;  %v768_v61 = vsel %vm1876_vm3, %v716_v52, %v740_v54  ;;  %v522_v62 = vrot.slane %v470_v56, 1  ;;  %v523_v63 = vrot.slane %v471_v57, 1  ;;  %v377_v53 = vld [vmem:[%s1848_s12 + $0x48] sm:$0xff] }
  0x3c   : > { %v789_v0 = vpack.c.bf16 %v768_v61, %v767_v60  ;;  %v600_v2 = vrot.slane %v471_v57, 7  ;;  %v628_v3 = vrot.slane %v470_v56, 7  ;;  %v409_v4 = vadd.f32 %v385_v55, %v361_v58 }
  0x3d   : > { %v524_v6 = vsel %vm512_vm0, %v522_v62, %v523_v63  ;;  %v588_v7 = vsel %vm512_vm0, %v523_v63, %v522_v62  ;;  %vm432_vm5 = vcmp.ge.f32.partialorder %v408_v59, 0.0  ;;  %v456_v9 = vmul.f32 0.01, %v408_v59 }
  0x3e   : > { %1668 = vmatprep.mubr.msk.bf16.mxu0 %vm822_vm6, %v789_v0  ;;  %v629_v12 = vsel %vm621_vm1, %v628_v3, %v600_v2  ;;  %v673_v13 = vsel %vm621_vm1, %v600_v2, %v628_v3  ;;  %v717_v14 = vmax.f32 %v470_v56, %v524_v6  ;;  %v718_v15 = vmax.f32 %v471_v57, %v588_v7  ;;  %v378_v2 = vld [vmem:[%s1848_s12 + $0x50] sm:$0xff]  ;;  %v302_v3 = vld [vmem:[%s1843_s9 + $0xa0] sm:$0xff] }
  0x3f   : > { %v741_v16 = vmax.f32 %v470_v56, %v673_v13  ;;  %v742_v17 = vmax.f32 %v471_v57, %v629_v12  ;;  %vm433_vm7 = vcmp.ge.f32.partialorder %v409_v4, 0.0  ;;  %v457_v18 = vmul.f32 0.01, %v409_v4  ;;  %v293_v57 = vld [vmem:[%s1843_s9 + $0x58] sm:$0xff] }
  0x40   : > { %v480_v19 = vsel %vm432_vm5, %v408_v59, %v456_v9  ;;  %v332_v20 = vmul.f32 %v1838_v5, %v301_v10  ;;  %v362_v21 = vadd.f32 %v1855_v8, %v331_v47  ;;  %v321_v24 = vmul.f32 %v1838_v5, %v290_v11 }
  0x41   : > { %v769_v25 = vsel %vm1872_vm2, %v717_v14, %v741_v16  ;;  %v770_v28 = vsel %vm1876_vm3, %v718_v15, %v742_v17  ;;  %v481_v29 = vsel %vm433_vm7, %v409_v4, %v457_v18  ;;  %v537_v30 = vrot.slane %v480_v19, 1  ;;  %v379_v15 = vld [vmem:[%s1848_s12 + $0x58] sm:$0xff] }
  0x42   : > { %v790_v31 = vpack.c.bf16 %v770_v28, %v769_v25  ;;  %v538_v32 = vrot.slane %v481_v29, 1  ;;  %v605_v33 = vrot.slane %v481_v29, 7  ;;  %v638_v34 = vrot.slane %v480_v19, 7 }
  0x43   : > { %v363_v35 = vadd.f32 %v1855_v8, %v332_v20  ;;  %v410_v38 = vadd.f32 %v386_v22, %v362_v21  ;;  %v322_v36 = vmul.f32 %v1838_v5, %v291_v23  ;;  %v352_v39 = vadd.f32 %v1855_v8, %v321_v24 }
  0x44   : > { %1669 = vmatmul.mubr.msk.bf16.gmra.mrb[4].mxu0 %vm822_vm6, %v790_v31  ;;  %v539_v40 = vsel %vm512_vm0, %v537_v30, %v538_v32  ;;  %v593_v41 = vsel %vm512_vm0, %v538_v32, %v537_v30  ;;  %v639_v43 = vsel %vm621_vm1, %v638_v34, %v605_v33  ;;  %v678_v44 = vsel %vm621_vm1, %v605_v33, %v638_v34 }
  0x45   : > { %v727_v47 = vmax.f32 %v480_v19, %v539_v40  ;;  %v728_v42 = vmax.f32 %v481_v29, %v593_v41  ;;  %v751_v48 = vmax.f32 %v480_v19, %v678_v44  ;;  %v752_v49 = vmax.f32 %v481_v29, %v639_v43 }
  0x46   : > { %v411_v50 = vadd.f32 %v387_v37, %v363_v35  ;;  %vm434_vm8 = vcmp.ge.f32.partialorder %v410_v38, 0.0  ;;  %v458_v51 = vmul.f32 0.01, %v410_v38  ;;  %v353_v52 = vadd.f32 %v1855_v8, %v322_v36  ;;  %v303_v36 = vld [vmem:[%s1843_s9 + $0xa8] sm:$0xff] }
  0x47   : > { %v779_v54 = vsel %vm1872_vm2, %v727_v47, %v751_v48  ;;  %v780_v55 = vsel %vm1876_vm3, %v728_v42, %v752_v49  ;;  %v400_v56 = vadd.f32 %v376_v45, %v352_v39  ;;  %v323_v58 = vmul.f32 %v1838_v5, %v292_v46  ;;  %v388_v42 = vld [vmem:[%s1848_s12 + $0xa0] sm:$0xff] }
  0x48   : > { %v795_v59 = vpack.c.bf16 %v780_v55, %v779_v54  ;;  %vm435_vm9 = vcmp.ge.f32.partialorder %v411_v50, 0.0  ;;  %v459_v60 = vmul.f32 0.01, %v411_v50  ;;  %v482_v61 = vsel %vm434_vm8, %v410_v38, %v458_v51 }
  0x49   : > { %v540_v62 = vrot.slane %v482_v61, 1  ;;  %v640_v63 = vrot.slane %v482_v61, 7  ;;  %v401_v0 = vadd.f32 %v377_v53, %v353_v52  ;;  %vm424_vm10 = vcmp.ge.f32.partialorder %v400_v56, 0.0  ;;  %v304_v52 = vld [vmem:[%s1843_s9 + $0xb0] sm:$0xff] }
  0x4a   : > { %1680 = vmatprep.mubr.msk.bf16.mxu1 %vm822_vm6, %v795_v59  ;;  %v483_v4 = vsel %vm435_vm9, %v411_v50, %v459_v60  ;;  %v448_v6 = vmul.f32 0.01, %v400_v56  ;;  %v324_v7 = vmul.f32 %v1838_v5, %v293_v57  ;;  %v354_v9 = vadd.f32 %v1855_v8, %v323_v58  ;;  %v389_v57 = vld [vmem:[%s1848_s12 + $0xa8] sm:$0xff]  ;;  %v305_v58 = vld [vmem:[%s1843_s9 + $0xb8] sm:$0xff] }
  0x4b   : > { %v541_v10 = vrot.slane %v483_v4, 1  ;;  %v606_v11 = vrot.slane %v483_v4, 7  ;;  %vm425_vm11 = vcmp.ge.f32.partialorder %v401_v0, 0.0  ;;  %v449_v12 = vmul.f32 0.01, %v401_v0 }
  0x4c   : > { %v472_v13 = vsel %vm424_vm10, %v400_v56, %v448_v6  ;;  %v355_v14 = vadd.f32 %v1855_v8, %v324_v7  ;;  %v402_v16 = vadd.f32 %v378_v2, %v354_v9  ;;  %v333_v17 = vmul.f32 %v1838_v5, %v302_v3 }
  0x4d   : > { %v542_v18 = vsel %vm512_vm0, %v540_v62, %v541_v10  ;;  %v594_v19 = vsel %vm512_vm0, %v541_v10, %v540_v62  ;;  %v641_v20 = vsel %vm621_vm1, %v640_v63, %v606_v11  ;;  %v679_v21 = vsel %vm621_vm1, %v606_v11, %v640_v63 }
  0x4e   : > { %v729_v22 = vmax.f32 %v482_v61, %v542_v18  ;;  %v730_v23 = vmax.f32 %v483_v4, %v594_v19  ;;  %v753_v24 = vmax.f32 %v482_v61, %v679_v21  ;;  %v754_v25 = vmax.f32 %v483_v4, %v641_v20 }
  0x4f   : > { %v473_v28 = vsel %vm425_vm11, %v401_v0, %v449_v12  ;;  %v525_v29 = vrot.slane %v472_v13, 1  ;;  %v630_v30 = vrot.slane %v472_v13, 7  ;;  %v403_v31 = vadd.f32 %v379_v15, %v355_v14 }
  0x50   : > { %v781_v32 = vsel %vm1872_vm2, %v729_v22, %v753_v24  ;;  %v782_v33 = vsel %vm1876_vm3, %v730_v23, %v754_v25  ;;  %v526_v34 = vrot.slane %v473_v28, 1  ;;  %v601_v35 = vrot.slane %v473_v28, 7  ;;  %v391_v23 = vld [vmem:[%s1848_s12 + $0xb8] sm:$0xff] }
  0x51   : > { %v796_v37 = vpack.c.bf16 %v782_v33, %v781_v32  ;;  %vm426_vm12 = vcmp.ge.f32.partialorder %v402_v16, 0.0  ;;  %vm427_vm13 = vcmp.ge.f32.partialorder %v403_v31, 0.0  ;;  %v450_v38 = vmul.f32 0.01, %v402_v16 }
  0x52   : > { %v527_v39 = vsel %vm512_vm0, %v525_v29, %v526_v34  ;;  %v589_v40 = vsel %vm512_vm0, %v526_v34, %v525_v29  ;;  %v631_v41 = vsel %vm621_vm1, %v630_v30, %v601_v35  ;;  %v674_v43 = vsel %vm621_vm1, %v601_v35, %v630_v30 }
  0x53   : > { %1681 = vmatmul.mubr.msk.bf16.gmra.mrb[4].mxu1 %vm822_vm6, %v796_v37  ;;  %v719_v44 = vmax.f32 %v472_v13, %v527_v39  ;;  %v720_v45 = vmax.f32 %v473_v28, %v589_v40  ;;  %v743_v46 = vmax.f32 %v472_v13, %v674_v43  ;;  %v744_v47 = vmax.f32 %v473_v28, %v631_v41 }
  0x54   : > { %v451_v48 = vmul.f32 0.01, %v403_v31  ;;  %v474_v49 = vsel %vm426_vm12, %v402_v16, %v450_v38  ;;  %v334_v50 = vmul.f32 %v1838_v5, %v303_v36  ;;  %v364_v51 = vadd.f32 %v1855_v8, %v333_v17  ;;  %v390_v16 = vld [vmem:[%s1848_s12 + $0xb0] sm:$0xff] }
  0x55   : > { %v771_v53 = vsel %vm1872_vm2, %v719_v44, %v743_v46  ;;  %v772_v54 = vsel %vm1876_vm3, %v720_v45, %v744_v47  ;;  %v528_v55 = vrot.slane %v474_v49, 1  ;;  %v632_v56 = vrot.slane %v474_v49, 7 }
  0x56   : > { %v791_v59 = vpack.c.bf16 %v772_v54, %v771_v53  ;;  %v475_v60 = vsel %vm427_vm13, %v403_v31, %v451_v48  ;;  %v365_v61 = vadd.f32 %v1855_v8, %v334_v50  ;;  %v412_v62 = vadd.f32 %v388_v42, %v364_v51 }
  0x57   : > { %v529_v63 = vrot.slane %v475_v60, 1  ;;  %v602_v0 = vrot.slane %v475_v60, 7  ;;  %v335_v2 = vmul.f32 %v1838_v5, %v304_v52  ;;  %v336_v6 = vmul.f32 %v1838_v5, %v305_v58 }
  0x58   : > { %1672 = vmatprep.mubr.msk.bf16.mxu0 %vm822_vm6, %v791_v59  ;;  %v413_v3 = vadd.f32 %v389_v57, %v365_v61  ;;  %vm436_vm14 = vcmp.ge.f32.partialorder %v412_v62, 0.0  ;;  %v460_v4 = vmul.f32 0.01, %v412_v62 }
  0x59   : > { %v530_v7 = vsel %vm512_vm0, %v528_v55, %v529_v63  ;;  %v590_v9 = vsel %vm512_vm0, %v529_v63, %v528_v55  ;;  %v633_v10 = vsel %vm621_vm1, %v632_v56, %v602_v0  ;;  %v675_v11 = vsel %vm621_vm1, %v602_v0, %v632_v56  ;;  %v2078_v63 = vld [vmem:[%s2479_s5] ss:$0 sm:$0xff] }
  0x5a   : > { %v721_v12 = vmax.f32 %v474_v49, %v530_v7  ;;  %v722_v13 = vmax.f32 %v475_v60, %v590_v9  ;;  %v745_v14 = vmax.f32 %v474_v49, %v675_v11  ;;  %v746_v15 = vmax.f32 %v475_v60, %v633_v10 }
  0x5b   : > { %vm437_vm15 = vcmp.ge.f32.partialorder %v413_v3, 0.0  ;;  %v461_v17 = vmul.f32 0.01, %v413_v3  ;;  %v484_v18 = vsel %vm436_vm14, %v412_v62, %v460_v4  ;;  %v366_v19 = vadd.f32 %v1855_v8, %v335_v2 }
  0x5c   : > { %v773_v5 = vsel %vm1872_vm2, %v721_v12, %v745_v14  ;;  %v774_v20 = vsel %vm1876_vm3, %v722_v13, %v746_v15  ;;  %v543_v21 = vrot.slane %v484_v18, 1  ;;  %v642_v22 = vrot.slane %v484_v18, 7 }
  0x5d   : > { %v792_v24 = vpack.c.bf16 %v774_v20, %v773_v5  ;;  %v485_v25 = vsel %vm437_vm15, %v413_v3, %v461_v17  ;;  %v367_v28 = vadd.f32 %v1855_v8, %v336_v6  ;;  %v414_v29 = vadd.f32 %v390_v16, %v366_v19 }
  0x5e   : > { %v544_v30 = vrot.slane %v485_v25, 1  ;;  %v607_v31 = vrot.slane %v485_v25, 7  ;;  %v2073_v62 = vand.u32 127, %v682_v1 }
  0x5f   : > { %1673 = vmatmul.mubr.msk.bf16.gmra.mrb[8].mxu0 %vm822_vm6, %v792_v24  ;;  %v415_v32 = vadd.f32 %v391_v23, %v367_v28  ;;  %vm438_vm4 = vcmp.ge.f32.partialorder %v414_v29, 0.0  ;;  %v462_v33 = vmul.f32 0.01, %v414_v29 }
  0x60   : > { %v545_v34 = vsel %vm512_vm0, %v543_v21, %v544_v30  ;;  %v595_v35 = vsel %vm512_vm0, %v544_v30, %v543_v21  ;;  %v643_v37 = vsel %vm621_vm1, %v642_v22, %v607_v31  ;;  %v680_v38 = vsel %vm621_vm1, %v607_v31, %v642_v22 }
  0x61   : > { %v731_v36 = vmax.f32 %v484_v18, %v545_v34  ;;  %v732_v39 = vmax.f32 %v485_v25, %v595_v35  ;;  %v755_v40 = vmax.f32 %v484_v18, %v680_v38  ;;  %v756_v8 = vmax.f32 %v485_v25, %v643_v37 }
  0x62   : > { %vm439_vm5 = vcmp.ge.f32.partialorder %v415_v32, 0.0  ;;  %v463_v41 = vmul.f32 0.01, %v415_v32  ;;  %v486_v43 = vsel %vm438_vm4, %v414_v29, %v462_v33 }
  0x63   : > { %v783_v44 = vsel %vm1872_vm2, %v731_v36, %v755_v40  ;;  %v784_v45 = vsel %vm1876_vm3, %v732_v39, %v756_v8  ;;  %v546_v46 = vrot.slane %v486_v43, 1  ;;  %v644_v47 = vrot.slane %v486_v43, 7 }
  0x64   : > { %v797_v42 = vpack.c.bf16 %v784_v45, %v783_v44  ;;  %v487_v48 = vsel %vm439_vm5, %v415_v32, %v463_v41 }
  0x65   : > { %v547_v49 = vrot.slane %v487_v48, 1  ;;  %v608_v50 = vrot.slane %v487_v48, 7 }
  0x66   : > { %1684 = vmatprep.mubr.msk.bf16.mxu1 %vm822_vm6, %v797_v42 }
  0x67   : > { %v548_v51 = vsel %vm512_vm0, %v546_v46, %v547_v49  ;;  %v596_v52 = vsel %vm512_vm0, %v547_v49, %v546_v46  ;;  %v645_v53 = vsel %vm621_vm1, %v644_v47, %v608_v50  ;;  %v681_v54 = vsel %vm621_vm1, %v608_v50, %v644_v47 }
  0x68   : > { %v733_v55 = vmax.f32 %v486_v43, %v548_v51  ;;  %v734_v56 = vmax.f32 %v487_v48, %v596_v52  ;;  %v757_v57 = vmax.f32 %v486_v43, %v681_v54  ;;  %v758_v58 = vmax.f32 %v487_v48, %v645_v53 }
  0x69   : > { %vm990_vm0 = vcmp.eq.s32.totalorder %v2073_v62, 32  ;;  %vm1017_vm1 = vcmask 269312  }
  0x6a   : > { %v785_v59 = vsel %vm1872_vm2, %v733_v55, %v757_v57  ;;  %v786_v60 = vsel %vm1876_vm3, %v734_v56, %v758_v58  ;;  %vm1541_vm2 = vcmask 253952  }
  0x6b   : > { %v798_v61 = vpack.c.bf16 %v786_v60, %v785_v59 }
  0x6d   : > { %1685 = vmatmul.mubr.msk.bf16.gmra.mrb[8].mxu1 %vm822_vm6, %v798_v61 }
 0x102   : > { %v1666_v0 = vpop.f32.mrb[0].mxu0 }
 0x103   : > { %v2082_v26 = vadd.f32 %v1666_v0, %v2078_v63  ;;  %v893_v2 = vpop.f32.mrb[1].mxu0 }
 0x104   : > { %v1667_v27 = vpop.f32.mrb[2].mxu0  ;;  %v2099_v12 = vadd.f32 %v2078_v63, %v893_v2 }
 0x105   : > { %v2085_v3 = vadd.f32 %v1667_v27, %v2078_v63  ;;  %v896_v4 = vpop.f32.mrb[3].mxu0  ;;  %v995_v1 = vsel %vm990_vm0, %v2082_v26, 0.0 }
 0x106   : > { %v1024_v6 = vsel %vm1017_vm1, %v995_v1, 0.0  ;;  %v993_v20 = vsel %vm990_vm0, %v2099_v12, 0.0  ;;  %v2126_v25 = vadd.f32 %v2078_v63, %v896_v4 }
 0x107   : > { %1025 = vadd.xlane.f32.xlu1 %v1024_v6  ;;  %v996_v7 = vsel %vm990_vm0, %v2085_v3, 0.0  ;;  %v1018_v24 = vsel %vm1017_vm1, %v993_v20, 0.0 }
 0x108   : > { %v1027_v10 = vsel %vm1017_vm1, %v996_v7, 0.0  ;;  %v994_v32 = vsel %vm990_vm0, %v2126_v25, 0.0 }
 0x109   : > { %v1021_v36 = vsel %vm1017_vm1, %v994_v32, 0.0 }
 0x10a   : > { %v1678_v9 = vpop.f32.mrb[0].mxu1 }
 0x10b   : > { %v2096_v11 = vadd.f32 %v1678_v9, %v2078_v63  ;;  %v941_v13 = vpop.f32.mrb[1].mxu1  ;;  %1028 = vadd.xlane.f32.xlu1 %v1027_v10 }
 0x10c   : > { %v1679_v14 = vpop.f32.mrb[2].mxu1  ;;  %v2112_v5 = vadd.f32 %v2078_v63, %v941_v13 }
 0x10d   : > { %v2102_v15 = vadd.f32 %v1679_v14, %v2078_v63  ;;  %v944_v16 = vpop.f32.mrb[3].mxu1  ;;  %v1007_v17 = vsel %vm990_vm0, %v2096_v11, 0.0 }
 0x10e   : > { %v2108_v18 = vadd.f32 %v2078_v63, %v944_v16  ;;  %v1060_v19 = vsel %vm1017_vm1, %v1007_v17, 0.0  ;;  %v1005_v28 = vsel %vm990_vm0, %v2112_v5, 0.0 }
 0x10f   : > { %1061 = vadd.xlane.f32.xlu0 %v1060_v19  ;;  %v1008_v21 = vsel %vm990_vm0, %v2102_v15, 0.0  ;;  %v1054_v30 = vsel %vm1017_vm1, %v1005_v28, 0.0 }
 0x110   : > { %v1063_v22 = vsel %vm1017_vm1, %v1008_v21, 0.0  ;;  %v1006_v23 = vsel %vm990_vm0, %v2108_v18, 0.0 }
 0x111   : > { %1064 = vadd.xlane.f32.xlu1 %v1063_v22  ;;  %v1057_v29 = vsel %vm1017_vm1, %v1006_v23, 0.0 }
 0x113   : > { %1019 = vadd.xlane.f32.xlu0 %v1018_v24 }
 0x115   : > { %1058 = vadd.xlane.f32.xlu1 %v1057_v29 }
 0x117   : > { %v1670_v31 = vpop.f32.mrb[4].mxu0  ;;  %1055 = vadd.xlane.f32.xlu0 %v1054_v30 }
 0x118   : > { %v2137_v33 = vadd.f32 %v1670_v31, %v2078_v63  ;;  %v909_v34 = vpop.f32.mrb[5].mxu0 }
 0x119   : > { %v1671_v35 = vpop.f32.mrb[6].mxu0  ;;  %v2152_v44 = vadd.f32 %v2078_v63, %v909_v34 }
 0x11a   : > { %v2140_v37 = vadd.f32 %v1671_v35, %v2078_v63  ;;  %v912_v38 = vpop.f32.mrb[7].mxu0  ;;  %v999_v39 = vsel %vm990_vm0, %v2137_v33, 0.0 }
 0x11b   : > { %1022 = vadd.xlane.f32.xlu0 %v1021_v36  ;;  %v1036_v41 = vsel %vm1017_vm1, %v999_v39, 0.0  ;;  %v2158_v42 = vadd.f32 %v2078_v63, %v912_v38  ;;  %v997_v54 = vsel %vm990_vm0, %v2152_v44, 0.0 }
 0x11c   : > { %v1000_v40 = vsel %vm990_vm0, %v2140_v37, 0.0  ;;  %v1030_v58 = vsel %vm1017_vm1, %v997_v54, 0.0 }
 0x11d   : > { %v1039_v8 = vsel %vm1017_vm1, %v1000_v40, 0.0  ;;  %v998_v57 = vsel %vm990_vm0, %v2158_v42, 0.0 }
 0x11e   : > { %1040 = vadd.xlane.f32.xlu1 %v1039_v8  ;;  %v1033_v60 = vsel %vm1017_vm1, %v998_v57, 0.0 }
 0x11f   : > { %1037 = vadd.xlane.f32.xlu0 %v1036_v41 }
 0x126   : > { %v1682_v43 = vpop.f32.mrb[4].mxu1 }
 0x127   : > { %v2155_v45 = vadd.f32 %v1682_v43, %v2078_v63  ;;  %v957_v46 = vpop.f32.mrb[5].mxu1 }
 0x128   : > { %v1683_v47 = vpop.f32.mrb[6].mxu1  ;;  %v2168_v52 = vadd.f32 %v2078_v63, %v957_v46 }
 0x129   : > { %v2161_v48 = vadd.f32 %v1683_v47, %v2078_v63  ;;  %v960_v49 = vpop.f32.mrb[7].mxu1  ;;  %v1011_v50 = vsel %vm990_vm0, %v2155_v45, 0.0 }
 0x12a   : > { %v1072_v51 = vsel %vm1017_vm1, %v1011_v50, 0.0  ;;  %v2178_v56 = vadd.f32 %v2078_v63, %v960_v49  ;;  %v1009_v59 = vsel %vm990_vm0, %v2168_v52, 0.0 }
 0x12b   : > { %v1012_v53 = vsel %vm990_vm0, %v2161_v48, 0.0  ;;  %1073 = vadd.xlane.f32.xlu0 %v1072_v51  ;;  %v1066_v2 = vsel %vm1017_vm1, %v1009_v59, 0.0 }
 0x12c   : > { %v1075_v55 = vsel %vm1017_vm1, %v1012_v53, 0.0  ;;  %v1010_v61 = vsel %vm990_vm0, %v2178_v56, 0.0 }
 0x12d   : > { %1076 = vadd.xlane.f32.xlu1 %v1075_v55  ;;  %v1069_v7 = vsel %vm1017_vm1, %v1010_v61, 0.0 }
 0x12f   : > { %1031 = vadd.xlane.f32.xlu0 %v1030_v58 }
 0x131   : > { %1034 = vadd.xlane.f32.xlu1 %v1033_v60 }
 0x132   : > { %v1674_v0 = vpop.f32.mrb[8].mxu0 }
 0x133   : > { %v2193_v27 = vadd.f32 %v1674_v0, %v2078_v63  ;;  %v925_v4 = vpop.f32.mrb[9].mxu0  ;;  %1067 = vadd.xlane.f32.xlu0 %v1066_v2 }
 0x134   : > { %v2196_v1 = vadd.f32 %v2078_v63, %v925_v4  ;;  %v1675_v6 = vpop.f32.mrb[10].mxu0 }
 0x135   : > { %v2200_v9 = vadd.f32 %v1675_v6, %v2078_v63  ;;  %v928_v10 = vpop.f32.mrb[11].mxu0  ;;  %1070 = vadd.xlane.f32.xlu1 %v1069_v7  ;;  %v1003_v13 = vsel %vm990_vm0, %v2193_v27, 0.0 }
 0x136   : > { %v2206_v14 = vadd.f32 %v2078_v63, %v928_v10  ;;  %v1048_v16 = vsel %vm1017_vm1, %v1003_v13, 0.0  ;;  %v1001_v19 = vsel %vm990_vm0, %v2196_v1, 0.0 }
 0x137   : > { %v1004_v17 = vsel %vm990_vm0, %v2200_v9, 0.0  ;;  %1049 = vadd.xlane.f32.xlu0 %v1048_v16  ;;  %v1042_v22 = vsel %vm1017_vm1, %v1001_v19, 0.0 }
 0x138   : > { %v1051_v20 = vsel %vm1017_vm1, %v1004_v17, 0.0  ;;  %v1002_v21 = vsel %vm990_vm0, %v2206_v14, 0.0 }
 0x139   : > { %1052 = vadd.xlane.f32.xlu1 %v1051_v20  ;;  %v1045_v23 = vsel %vm1017_vm1, %v1002_v21, 0.0 }
 0x13b   : > { %1043 = vadd.xlane.f32.xlu0 %v1042_v22 }
 0x13d   : > { %1046 = vadd.xlane.f32.xlu1 %v1045_v23 }
 0x140   : > { %v1686_v24 = vpop.f32.mrb[8].mxu1 }
 0x141   : > { %v973_v28 = vpop.f32.mrb[9].mxu1  ;;  %v2222_v29 = vadd.f32 %v1686_v24, %v2078_v63 }
 0x142   : > { %v2225_v30 = vadd.f32 %v2078_v63, %v973_v28  ;;  %v1687_v31 = vpop.f32.mrb[10].mxu1 }
 0x143   : > { %2489 = vst [vmem:[#allocation2_spill] sm:$0xff] %v2222_v29  ;;  %v976_v32 = vpop.f32.mrb[11].mxu1  ;;  %v2228_v34 = vadd.f32 %v1687_v31, %v2078_v63  ;;  %v1015_v40 = vsel %vm990_vm0, %v2222_v29, 0.0 }
 0x144   : > { %2490 = vst [vmem:[#allocation3_spill] sm:$0xff] %v2225_v30  ;;  %v2231_v35 = vadd.f32 %v2078_v63, %v976_v32  ;;  %v1013_v38 = vsel %vm990_vm0, %v2225_v30, 0.0  ;;  %v1084_v41 = vsel %vm1017_vm1, %v1015_v40, 0.0 }
 0x145   : > { %2491 = vst [vmem:[#allocation4_spill] sm:$0xff] %v2228_v34  ;;  %v1078_v36 = vsel %vm1017_vm1, %v1013_v38, 0.0  ;;  %v1016_v63 = vsel %vm990_vm0, %v2228_v34, 0.0 }
 0x146   : > { %2492 = vst [vmem:[#allocation5_spill] sm:$0xff] %v2231_v35  ;;  %v1014_v39 = vsel %vm990_vm0, %v2231_v35, 0.0  ;;  %1079 = vadd.xlane.f32.xlu0 %v1078_v36  ;;  %v1087_v43 = vsel %vm1017_vm1, %v1016_v63, 0.0 }
 0x147   : > { %v1081_v8 = vsel %vm1017_vm1, %v1014_v39, 0.0 }
 0x148   : > { %1082 = vadd.xlane.f32.xlu1 %v1081_v8 }
 0x14a   : > { %1085 = vadd.xlane.f32.xlu0 %v1084_v41 }
 0x14c   : > { %1088 = vadd.xlane.f32.xlu1 %v1087_v43 }
 0x194   : > { %v1026_v46 = vpop.xlane.xlu1 %1025 }
 0x198   : > { %v1029_v47 = vpop.xlane.xlu1 %1028 }
 0x199   : > { %v1127_v49 = vmax.f32 %v1026_v46, %v1029_v47 }
 0x19b   : > { %v1128_v50 = vrot.slane %v1127_v49, 4 }
 0x19c   : > { %v1062_v51 = vpop.xlane.xlu0 %1061 }
 0x19d   : > { %v1129_v53 = vmax.f32 %v1127_v49, %v1128_v50 }
 0x19e   : > { %v1065_v54 = vpop.xlane.xlu1 %1064 }
 0x19f   : > { %v1130_v55 = vrot.slane %v1129_v53, 2  ;;  %v1169_v57 = vmax.f32 %v1062_v51, %v1065_v54 }
 0x1a0   : > { %v1020_v58 = vpop.xlane.xlu0 %1019 }
 0x1a1   : > { %v1131_v59 = vmax.f32 %v1129_v53, %v1130_v55  ;;  %v1170_v60 = vrot.slane %v1169_v57, 4 }
 0x1a2   : > { %v1059_v62 = vpop.xlane.xlu1 %1058 }
 0x1a3   : > { %v1132_v61 = vrot.slane %v1131_v59, 1  ;;  %v1171_v0 = vmax.f32 %v1169_v57, %v1170_v60 }
 0x1a4   : > { %v1056_v2 = vpop.xlane.xlu0 %1055 }
 0x1a5   : > { %v1133_v4 = vmax.f32 %v1131_v59, %v1132_v61  ;;  %v1172_v6 = vrot.slane %v1171_v0, 2  ;;  %v1162_v7 = vmax.f32 %v1056_v2, %v1059_v62 }
 0x1a7   : > { %v1206_v10 = vsub.f32 %v1026_v46, %v1133_v4  ;;  %v1207_v13 = vsub.f32 %v1029_v47, %v1133_v4  ;;  %v1173_v16 = vmax.f32 %v1171_v0, %v1172_v6  ;;  %v1163_v17 = vrot.slane %v1162_v7, 4 }
 0x1a8   : > { %v1023_v19 = vpop.xlane.xlu0 %1022 }
 0x1a9   : > { %v1232_v20 = vmul.f32 1.442695, %v1206_v10  ;;  %v1234_v21 = vmul.f32 1.442695, %v1207_v13  ;;  %v1174_v22 = vrot.slane %v1173_v16, 1  ;;  %v1164_v23 = vmax.f32 %v1162_v7, %v1163_v17 }
 0x1aa   : > { %v1120_v24 = vmax.f32 %v1020_v58, %v1023_v19 }
 0x1ab   : > { %1702 = vpow2.f32 %v1232_v20  ;;  %v1175_v28 = vmax.f32 %v1173_v16, %v1174_v22  ;;  %v1165_v31 = vrot.slane %v1164_v23, 2  ;;  %v1041_v32 = vpop.xlane.xlu1 %1040 }
 0x1ac   : > { %1704 = vpow2.f32 %v1234_v21  ;;  %v1121_v38 = vrot.slane %v1120_v24, 4  ;;  %v1038_v36 = vpop.xlane.xlu0 %1037 }
 0x1ad   : > { %v1218_v39 = vsub.f32 %v1062_v51, %v1175_v28  ;;  %v1219_v40 = vsub.f32 %v1065_v54, %v1175_v28  ;;  %v1166_v8 = vmax.f32 %v1164_v23, %v1165_v31  ;;  %v1141_v63 = vmax.f32 %v1038_v36, %v1041_v32 }
 0x1ae   : > { %v1122_v41 = vmax.f32 %v1120_v24, %v1121_v38 }
 0x1af   : > { %v1256_v43 = vmul.f32 1.442695, %v1218_v39  ;;  %v1258_v46 = vmul.f32 1.442695, %v1219_v40  ;;  %v1167_v47 = vrot.slane %v1166_v8, 1  ;;  %v1142_v49 = vrot.slane %v1141_v63, 4 }
 0x1b0   : > { %v1123_v50 = vrot.slane %v1122_v41, 2 }
 0x1b1   : > { %1706 = vpow2.f32 %v1256_v43  ;;  %v1168_v53 = vmax.f32 %v1166_v8, %v1167_v47  ;;  %v1143_v55 = vmax.f32 %v1141_v63, %v1142_v49 }
 0x1b2   : > { %1708 = vpow2.f32 %v1258_v46  ;;  %v1124_v57 = vmax.f32 %v1122_v41, %v1123_v50 }
 0x1b3   : > { %v1216_v59 = vsub.f32 %v1056_v2, %v1168_v53  ;;  %v1217_v60 = vsub.f32 %v1059_v62, %v1168_v53  ;;  %v1144_v61 = vrot.slane %v1143_v55, 2 }
 0x1b4   : > { %v1125_v0 = vrot.slane %v1124_v57, 1 }
 0x1b5   : > { %v2249_v4 = vpop.eup %1702  ;;  %v1252_v51 = vmul.f32 1.442695, %v1216_v59  ;;  %v1254_v54 = vmul.f32 1.442695, %v1217_v60  ;;  %v1145_v6 = vmax.f32 %v1143_v55, %v1144_v61 }
 0x1b6   : > { %v2251_v7 = vpop.eup %1704  ;;  %v1126_v10 = vmax.f32 %v1124_v57, %v1125_v0 }
 0x1b7   : > { %v1283_v13 = vadd.f32 %v2251_v7, %v2249_v4  ;;  %1710 = vpow2.f32 %v1252_v51  ;;  %v1146_v16 = vrot.slane %v1145_v6, 1 }
 0x1b8   : > { %1712 = vpow2.f32 %v1254_v54  ;;  %v1204_v17 = vsub.f32 %v1020_v58, %v1126_v10  ;;  %v1205_v20 = vsub.f32 %v1023_v19, %v1126_v10  ;;  %v2255_v2 = vpop.xlane.xlu0 %1073 }
 0x1b9   : > { %v1284_v62 = vrot.slane %v1283_v13, 4  ;;  %v1147_v21 = vmax.f32 %v1145_v6, %v1146_v16 }
 0x1ba   : > { %v1228_v22 = vmul.f32 1.442695, %v1204_v17  ;;  %v1230_v23 = vmul.f32 1.442695, %v1205_v20  ;;  %v2257_v24 = vpop.xlane.xlu1 %1076 }
 0x1bb   : > { %v2259_v28 = vpop.eup %1706  ;;  %v1285_v31 = vadd.f32 %v1284_v62, %v1283_v13  ;;  %v1210_v38 = vsub.f32 %v1038_v36, %v1147_v21  ;;  %v1211_v39 = vsub.f32 %v1041_v32, %v1147_v21  ;;  %v1183_v40 = vmax.f32 %v2255_v2, %v2257_v24 }
 0x1bc   : > { %v2263_v8 = vpop.eup %1708  ;;  %1714 = vpow2.f32 %v1228_v22  ;;  %v2265_v58 = vpop.xlane.xlu0 %1031 }
 0x1bd   : > { %v1286_v19 = vrot.slane %v1285_v31, 2  ;;  %v1325_v63 = vadd.f32 %v2263_v8, %v2259_v28  ;;  %1716 = vpow2.f32 %v1230_v23  ;;  %v1240_v41 = vmul.f32 1.442695, %v1210_v38 }
 0x1be   : > { %v1242_v43 = vmul.f32 1.442695, %v1211_v39  ;;  %v1184_v46 = vrot.slane %v1183_v40, 4  ;;  %v2269_v47 = vpop.xlane.xlu1 %1034 }
 0x1bf   : > { %v1287_v36 = vadd.f32 %v1286_v19, %v1285_v31  ;;  %v1326_v32 = vrot.slane %v1325_v63, 4  ;;  %1718 = vpow2.f32 %v1240_v41  ;;  %v1134_v49 = vmax.f32 %v2265_v58, %v2269_v47 }
 0x1c0   : > { %1720 = vpow2.f32 %v1242_v43  ;;  %v1185_v50 = vmax.f32 %v1183_v40, %v1184_v46  ;;  %v2273_v53 = vpop.xlane.xlu0 %1067 }
 0x1c1   : > { %v2275_v55 = vpop.eup %1710  ;;  %v1288_v57 = vrot.slane %v1287_v36, 1  ;;  %v1327_v59 = vadd.f32 %v1326_v32, %v1325_v63  ;;  %v1135_v60 = vrot.slane %v1134_v49, 4 }
 0x1c2   : > { %v2277_v61 = vpop.eup %1712  ;;  %v1186_v0 = vrot.slane %v1185_v50, 2  ;;  %v2279_v51 = vpop.xlane.xlu1 %1070 }
 0x1c3   : > { %v1289_v54 = vadd.f32 %v1288_v57, %v1287_v36  ;;  %v1328_v6 = vrot.slane %v1327_v59, 2  ;;  %v1318_v10 = vadd.f32 %v2277_v61, %v2275_v55  ;;  %v1136_v13 = vmax.f32 %v1134_v49, %v1135_v60 }
 0x1c4   : > { %v1187_v16 = vmax.f32 %v1185_v50, %v1186_v0  ;;  %v1176_v17 = vmax.f32 %v2273_v53, %v2279_v51  ;;  %v2285_v20 = vpop.xlane.xlu0 %1049 }
 0x1c5   : > { %1722 = vrcp.f32 %v1289_v54  ;;  %v1329_v62 = vadd.f32 %v1328_v6, %v1327_v59  ;;  %v1319_v21 = vrot.slane %v1318_v10, 4  ;;  %v1137_v22 = vrot.slane %v1136_v13, 2 }
 0x1c6   : > { %v2287_v23 = vpop.eup %1714  ;;  %v1188_v31 = vrot.slane %v1187_v16, 1  ;;  %v1177_v38 = vrot.slane %v1176_v17, 4  ;;  %v2289_v39 = vpop.xlane.xlu1 %1052 }
 0x1c7   : > { %v2291_v40 = vpop.eup %1716  ;;  %v1330_v19 = vrot.slane %v1329_v62, 1  ;;  %v1320_v63 = vadd.f32 %v1319_v21, %v1318_v10  ;;  %v1138_v41 = vmax.f32 %v1136_v13, %v1137_v22  ;;  %v1155_v43 = vmax.f32 %v2285_v20, %v2289_v39 }
 0x1c8   : > { %v1276_v46 = vadd.f32 %v2291_v40, %v2287_v23  ;;  %v1189_v36 = vmax.f32 %v1187_v16, %v1188_v31  ;;  %v1178_v32 = vmax.f32 %v1176_v17, %v1177_v38 }
 0x1c9   : > { %v2297_v49 = vpop.eup %1718  ;;  %v1331_v50 = vadd.f32 %v1330_v19, %v1329_v62  ;;  %v1321_v57 = vrot.slane %v1320_v63, 2  ;;  %v1139_v59 = vrot.slane %v1138_v41, 1  ;;  %v1156_v60 = vrot.slane %v1155_v43, 4 }
 0x1ca   : > { %v2299_v0 = vpop.eup %1720  ;;  %v1277_v54 = vrot.slane %v1276_v46, 4  ;;  %v1222_v6 = vsub.f32 %v2255_v2, %v1189_v36  ;;  %v1223_v10 = vsub.f32 %v2257_v24, %v1189_v36  ;;  %v1179_v13 = vrot.slane %v1178_v32, 2 }
 0x1cb   : > { %1724 = vrcp.f32 %v1331_v50  ;;  %v1322_v21 = vadd.f32 %v1321_v57, %v1320_v63  ;;  %v1297_v16 = vadd.f32 %v2299_v0, %v2297_v49  ;;  %v1140_v17 = vmax.f32 %v1138_v41, %v1139_v59 }
 0x1cc   : > { %v1278_v22 = vadd.f32 %v1277_v54, %v1276_v46  ;;  %v1264_v31 = vmul.f32 1.442695, %v1222_v6  ;;  %v1266_v62 = vmul.f32 1.442695, %v1223_v10  ;;  %v1180_v38 = vmax.f32 %v1178_v32, %v1179_v13  ;;  %v2309_v54 = vpop.xlane.xlu1 %1046 }
 0x1cd   : > { %v1323_v19 = vrot.slane %v1322_v21, 1  ;;  %v1298_v34 = vrot.slane %v1297_v16, 4  ;;  %v1208_v29 = vsub.f32 %v2265_v58, %v1140_v17  ;;  %v1209_v35 = vsub.f32 %v2269_v47, %v1140_v17  ;;  %v2311_v58 = vpop.xlane.xlu0 %1043 }
 0x1ce   : > { %v1279_v2 = vrot.slane %v1278_v22, 2  ;;  %1726 = vpow2.f32 %v1264_v31  ;;  %v1181_v24 = vrot.slane %v1180_v38, 1  ;;  %v1157_v36 = vmax.f32 %v1155_v43, %v1156_v60 }
 0x1cf   : > { %v1723_v50 = vpop.eup %1722  ;;  %v1324_v63 = vadd.f32 %v1323_v19, %v1322_v21  ;;  %v1299_v57 = vadd.f32 %v1298_v34, %v1297_v16  ;;  %1728 = vpow2.f32 %v1266_v62  ;;  %v1236_v30 = vmul.f32 1.442695, %v1208_v29 }
 0x1d0   : > { %v1364_v41 = vmul.f32 %v1723_v50, %v2249_v4  ;;  %v1365_v46 = vmul.f32 %v1723_v50, %v2251_v7  ;;  %v1280_v32 = vadd.f32 %v1279_v2, %v1278_v22  ;;  %v1238_v59 = vmul.f32 1.442695, %v1209_v35 }
 0x1d1   : > { %1730 = vrcp.f32 %v1324_v63  ;;  %v1300_v47 = vrot.slane %v1299_v57, 2  ;;  %v1182_v6 = vmax.f32 %v1180_v38, %v1181_v24  ;;  %v1158_v10 = vrot.slane %v1157_v36, 2 }
 0x1d2   : > { %v1398_v43 = vmul.f32 %v1364_v41, %v2082_v26  ;;  %v1399_v34 = vmul.f32 %v1365_v46, %v2085_v3  ;;  %v1281_v60 = vrot.slane %v1280_v32, 1  ;;  %1732 = vpow2.f32 %v1236_v30 }
 0x1d3   : > { %v1301_v29 = vadd.f32 %v1300_v47, %v1299_v57  ;;  %1734 = vpow2.f32 %v1238_v59  ;;  %v1220_v4 = vsub.f32 %v2273_v53, %v1182_v6  ;;  %v1221_v35 = vsub.f32 %v2279_v51, %v1182_v6  ;;  %v2323_v51 = vpop.xlane.xlu0 %1079 }
 0x1d4   : > { %v1429_v7 = vsel %vm822_vm6, %v1398_v43, 0.0  ;;  %v1430_v13 = vsel %vm822_vm6, %v1399_v34, 0.0  ;;  %v1282_v21 = vadd.f32 %v1281_v60, %v1280_v32  ;;  %v1159_v16 = vmax.f32 %v1157_v36, %v1158_v10 }
 0x1d5   : > { %v1725_v17 = vpop.eup %1724  ;;  %v1431_v22 = vadd.f32 %v1430_v13, %v1429_v7  ;;  %v1302_v31 = vrot.slane %v1301_v29, 1  ;;  %v1260_v26 = vmul.f32 1.442695, %v1220_v4  ;;  %v1262_v62 = vmul.f32 1.442695, %v1221_v35  ;;  %v2321_v53 = vpop.xlane.xlu1 %1082 }
 0x1d6   : > { %v1382_v3 = vmul.f32 %v1725_v17, %v2259_v28  ;;  %v1383_v30 = vmul.f32 %v1725_v17, %v2263_v8  ;;  %1736 = vrcp.f32 %v1282_v21  ;;  %v1160_v38 = vrot.slane %v1159_v16, 1 }
 0x1d7   : > { %v1432_v19 = vrot.slane %v1431_v22, 4  ;;  %v1303_v2 = vadd.f32 %v1302_v31, %v1301_v29  ;;  %1738 = vpow2.f32 %v1260_v26  ;;  %v1148_v24 = vmax.f32 %v2311_v58, %v2309_v54 }
 0x1d8   : > { %v2327_v36 = vpop.eup %1726  ;;  %v1410_v50 = vmul.f32 %v1382_v3, %v2096_v11  ;;  %v1411_v28 = vmul.f32 %v1383_v30, %v2102_v15  ;;  %1740 = vpow2.f32 %v1262_v62  ;;  %v1161_v8 = vmax.f32 %v1159_v16, %v1160_v38 }
 0x1d9   : > { %v2331_v63 = vpop.eup %1728  ;;  %v1433_v57 = vadd.f32 %v1432_v19, %v1431_v22  ;;  %1742 = vrcp.f32 %v1303_v2  ;;  %v1149_v41 = vrot.slane %v1148_v24, 4  ;;  %v2335_v46 = vmax.f32 %v2323_v51, %v2321_v53 }
 0x1da   : > { %v1483_v32 = vsel %vm822_vm6, %v1410_v50, 0.0  ;;  %v1484_v59 = vsel %vm822_vm6, %v1411_v28, 0.0  ;;  %v1339_v11 = vadd.f32 %v2331_v63, %v2327_v36  ;;  %v1214_v15 = vsub.f32 %v2285_v20, %v1161_v8 }
 0x1db   : > { %v1731_v47 = vpop.eup %1730  ;;  %v1434_v6 = vrot.slane %v1433_v57, 2  ;;  %v1485_v10 = vadd.f32 %v1484_v59, %v1483_v32  ;;  %v1215_v43 = vsub.f32 %v2289_v39, %v1161_v8  ;;  %v1150_v34 = vmax.f32 %v1148_v24, %v1149_v41 }
 0x1dc   : > { %v2343_v60 = vpop.eup %1732  ;;  %v1379_v29 = vmul.f32 %v1731_v47, %v2275_v55  ;;  %v1380_v4 = vmul.f32 %v1731_v47, %v2277_v61  ;;  %v1340_v35 = vrot.slane %v1339_v11, 4  ;;  %v1248_v7 = vmul.f32 1.442695, %v1214_v15 }
 0x1dd   : > { %v2347_v13 = vpop.eup %1734  ;;  %v1435_v21 = vadd.f32 %v1434_v6, %v1433_v57  ;;  %v1486_v16 = vrot.slane %v1485_v10, 4  ;;  %v1250_v17 = vmul.f32 1.442695, %v1215_v43  ;;  %v1151_v20 = vrot.slane %v1150_v34, 2 }
 0x1de   : > { %v1408_v22 = vmul.f32 %v1379_v29, %v2112_v5  ;;  %v1409_v31 = vmul.f32 %v1380_v4, %v2108_v18  ;;  %v1341_v39 = vadd.f32 %v1340_v35, %v1339_v11  ;;  %v1290_v26 = vadd.f32 %v2347_v13, %v2343_v60 }
 0x1df   : > { %v1436_v55 = vrot.slane %v1435_v21, 1  ;;  %v1487_v62 = vadd.f32 %v1486_v16, %v1485_v10  ;;  %1744 = vpow2.f32 %v1248_v7  ;;  %v1152_v61 = vmax.f32 %v1150_v34, %v1151_v20 }
 0x1e0   : > { %v1737_v3 = vpop.eup %1736  ;;  %v1474_v30 = vsel %vm822_vm6, %v1408_v22, 0.0  ;;  %v1475_v38 = vsel %vm822_vm6, %v1409_v31, 0.0  ;;  %v1342_v19 = vrot.slane %v1341_v39, 2  ;;  %v1291_v2 = vrot.slane %v1290_v26, 4 }
 0x1e1   : > { %v2355_v24 = vpop.eup %1738  ;;  %v1437_v5 = vadd.f32 %v1436_v55, %v1435_v21  ;;  %v1488_v18 = vrot.slane %v1487_v62, 2  ;;  %v1476_v50 = vadd.f32 %v1475_v38, %v1474_v30  ;;  %v1361_v28 = vmul.f32 %v1737_v3, %v2287_v23 }
 0x1e2   : > { %v2358_v8 = vpop.eup %1740  ;;  %v1362_v57 = vmul.f32 %v1737_v3, %v2291_v40  ;;  %v1343_v41 = vadd.f32 %v1342_v19, %v1341_v39  ;;  %v1292_v32 = vadd.f32 %v1291_v2, %v1290_v26  ;;  %1746 = vpow2.f32 %v1250_v17  ;;  %v2381_v39 = vpop.xlane.xlu1 %1088 }
 0x1e3   : > { %v1743_v59 = vpop.eup %1742  ;;  %v1530_v11 = vmul.f32 0.125, %v1437_v5  ;;  %v1489_v15 = vadd.f32 %v1488_v18, %v1487_v62  ;;  %v1477_v47 = vrot.slane %v1476_v50, 4  ;;  %v1396_v6 = vmul.f32 %v1361_v28, %v2099_v12  ;;  %v2383_v26 = vpop.xlane.xlu0 %1085 }
 0x1e4   : > { %v1397_v23 = vmul.f32 %v1362_v57, %v2126_v25  ;;  %v1370_v10 = vmul.f32 %v1743_v59, %v2297_v49  ;;  %v1371_v43 = vmul.f32 %v1743_v59, %v2299_v0  ;;  %v1344_v34 = vrot.slane %v1343_v41, 1 }
 0x1e5   : > { %1543 = vst.msk [vmem:[%s2364_s19 + $0x1] sm:$0x1] %vm1541_vm2, %v1530_v11  ;;  %v1490_v29 = vrot.slane %v1489_v15, 1  ;;  %v1478_v40 = vadd.f32 %v1477_v47, %v1476_v50  ;;  %v1420_v4 = vsel %vm822_vm6, %v1396_v6, 0.0  ;;  %v1293_v35 = vrot.slane %v1292_v32, 2 }
 0x1e6   : > { %v1421_v7 = vsel %vm822_vm6, %v1397_v23, 0.0  ;;  %v1402_v21 = vmul.f32 %v1370_v10, %v2137_v33  ;;  %v1403_v12 = vmul.f32 %v1371_v43, %v2140_v37  ;;  %v1345_v16 = vadd.f32 %v1344_v34, %v1343_v41 }
 0x1e7   : > { %v1491_v25 = vadd.f32 %v1490_v29, %v1489_v15  ;;  %v1479_v17 = vrot.slane %v1478_v40, 2  ;;  %v1422_v49 = vadd.f32 %v1421_v7, %v1420_v4  ;;  %v1294_v20 = vadd.f32 %v1293_v35, %v1292_v32 }
 0x1e8   : > { %v1447_v0 = vsel %vm822_vm6, %v1402_v21, 0.0  ;;  %v1448_v22 = vsel %vm822_vm6, %v1403_v12, 0.0  ;;  %1748 = vrcp.f32 %v1345_v16  ;;  %v1332_v31 = vadd.f32 %v2358_v8, %v2355_v24 }
 0x1e9   : > { %v2385_v33 = vpop.eup %1744  ;;  %v1536_v37 = vmul.f32 0.125, %v1491_v25  ;;  %v1480_v55 = vadd.f32 %v1479_v17, %v1478_v40  ;;  %v1423_v62 = vrot.slane %v1422_v49, 4  ;;  %v1449_v3 = vadd.f32 %v1448_v22, %v1447_v0 }
 0x1ea   : > { %v1295_v30 = vrot.slane %v1294_v20, 1  ;;  %v1333_v38 = vrot.slane %v1332_v31, 4  ;;  %v1153_v19 = vrot.slane %v1152_v61, 1  ;;  %v1191_v2 = vrot.slane %v2335_v46, 4 }
 0x1eb   : > { %1549 = vst.msk [vmem:[%s2364_s19 + $0x7] sm:$0x1] %vm1541_vm2, %v1536_v37  ;;  %v1481_v5 = vrot.slane %v1480_v55, 1  ;;  %v1424_v18 = vadd.f32 %v1423_v62, %v1422_v49  ;;  %v1450_v50 = vrot.slane %v1449_v3, 4  ;;  %v1197_v28 = vmax.f32 %v2383_v26, %v2381_v39 }
 0x1ec   : > { %v2392_v57 = vpop.eup %1746  ;;  %v1296_v41 = vadd.f32 %v1295_v30, %v1294_v20  ;;  %v1334_v32 = vadd.f32 %v1333_v38, %v1332_v31  ;;  %v1154_v59 = vmax.f32 %v1152_v61, %v1153_v19  ;;  %v1192_v11 = vmax.f32 %v2335_v46, %v1191_v2 }
 0x1ed   : > { %v1482_v15 = vadd.f32 %v1481_v5, %v1480_v55  ;;  %v1425_v47 = vrot.slane %v1424_v18, 2  ;;  %v1451_v6 = vadd.f32 %v1450_v50, %v1449_v3  ;;  %v1311_v23 = vadd.f32 %v2392_v57, %v2385_v33 }
 0x1ee   : > { %1750 = vrcp.f32 %v1296_v41  ;;  %v1335_v10 = vrot.slane %v1334_v32, 2  ;;  %v1212_v43 = vsub.f32 %v2311_v58, %v1154_v59  ;;  %v1213_v34 = vsub.f32 %v2309_v54, %v1154_v59 }
 0x1ef   : > { %v1535_v29 = vmul.f32 0.125, %v1482_v15  ;;  %v1426_v40 = vadd.f32 %v1425_v47, %v1424_v18  ;;  %v1452_v4 = vrot.slane %v1451_v6, 2  ;;  %v1312_v35 = vrot.slane %v1311_v23, 4 }
 0x1f0   : > { %v1336_v61 = vadd.f32 %v1335_v10, %v1334_v32  ;;  %v1244_v7 = vmul.f32 1.442695, %v1212_v43  ;;  %v1246_v46 = vmul.f32 1.442695, %v1213_v34  ;;  %v1193_v21 = vrot.slane %v1192_v11, 2 }
 0x1f1   : > { %1548 = vst.msk [vmem:[%s2364_s19 + $0x6] sm:$0x1] %vm1541_vm2, %v1535_v29  ;;  %v1427_v12 = vrot.slane %v1426_v40, 1  ;;  %v1453_v16 = vadd.f32 %v1452_v4, %v1451_v6  ;;  %v1313_v25 = vadd.f32 %v1312_v35, %v1311_v23  ;;  %v1198_v58 = vrot.slane %v1197_v28, 4 }
 0x1f2   : > { %v1749_v17 = vpop.eup %1748  ;;  %v1337_v49 = vrot.slane %v1336_v61, 1  ;;  %1752 = vpow2.f32 %v1244_v7  ;;  %v1194_v20 = vmax.f32 %v1192_v11, %v1193_v21 }
 0x1f3   : > { %v1428_v0 = vadd.f32 %v1427_v12, %v1426_v40  ;;  %v1454_v54 = vrot.slane %v1453_v16, 1  ;;  %v1388_v22 = vmul.f32 %v1749_v17, %v2327_v36  ;;  %v1389_v31 = vmul.f32 %v1749_v17, %v2331_v63 }
 0x1f4   : > { %v1338_v37 = vadd.f32 %v1337_v49, %v1336_v61  ;;  %v1314_v55 = vrot.slane %v1313_v25, 2  ;;  %1754 = vpow2.f32 %v1246_v46  ;;  %v1195_v62 = vrot.slane %v1194_v20, 1 }
 0x1f5   : > { %v1529_v3 = vmul.f32 0.125, %v1428_v0  ;;  %v1455_v30 = vadd.f32 %v1454_v54, %v1453_v16  ;;  %v1414_v38 = vmul.f32 %v1388_v22, %v2155_v45  ;;  %v1415_v19 = vmul.f32 %v1389_v31, %v2161_v48 }
 0x1f6   : > { %1756 = vrcp.f32 %v1338_v37  ;;  %v1315_v2 = vadd.f32 %v1314_v55, %v1313_v25  ;;  %v1196_v5 = vmax.f32 %v1194_v20, %v1195_v62  ;;  %v1199_v18 = vmax.f32 %v1197_v28, %v1198_v58 }
 0x1f7   : > { %1542 = vst.msk [vmem:[%s2364_s19] sm:$0x1] %vm1541_vm2, %v1529_v3  ;;  %v1532_v36 = vmul.f32 0.125, %v1455_v30  ;;  %v1501_v63 = vsel %vm822_vm6, %v1414_v38, 0.0  ;;  %v1502_v50 = vsel %vm822_vm6, %v1415_v19, 0.0 }
 0x1f8   : > { %v1751_v41 = vpop.eup %1750  ;;  %v1503_v32 = vadd.f32 %v1502_v50, %v1501_v63  ;;  %v1316_v59 = vrot.slane %v1315_v2, 1  ;;  %v1224_v11 = vsub.f32 %v2323_v51, %v1196_v5  ;;  %v1225_v45 = vsub.f32 %v2321_v53, %v1196_v5 }
 0x1f9   : > { %1545 = vst.msk [vmem:[%s2364_s19 + $0x3] sm:$0x1] %vm1541_vm2, %v1532_v36  ;;  %v1367_v48 = vmul.f32 %v1751_v41, %v2343_v60  ;;  %v1368_v28 = vmul.f32 %v1751_v41, %v2347_v13  ;;  %v1200_v15 = vrot.slane %v1199_v18, 2 }
 0x1fa   : > { %v1504_v47 = vrot.slane %v1503_v32, 4  ;;  %v1317_v6 = vadd.f32 %v1316_v59, %v1315_v2  ;;  %v1268_v23 = vmul.f32 1.442695, %v1224_v11  ;;  %v1270_v10 = vmul.f32 1.442695, %v1225_v45 }
 0x1fb   : > { %v1400_v43 = vmul.f32 %v1367_v48, %v2152_v44  ;;  %v1401_v34 = vmul.f32 %v1368_v28, %v2158_v42  ;;  %v1201_v29 = vmax.f32 %v1199_v18, %v1200_v15 }
 0x1fc   : > { %v2417_v40 = vpop.eup %1752  ;;  %v1505_v51 = vadd.f32 %v1504_v47, %v1503_v32  ;;  %1758 = vrcp.f32 %v1317_v6 }
 0x1fd   : > { %v1438_v53 = vsel %vm822_vm6, %v1400_v43, 0.0  ;;  %v1439_v60 = vsel %vm822_vm6, %v1401_v34, 0.0  ;;  %1760 = vpow2.f32 %v1268_v23  ;;  %v1202_v13 = vrot.slane %v1201_v29, 1 }
 0x1fe   : > { %v2421_v4 = vpop.eup %1754  ;;  %v1506_v35 = vrot.slane %v1505_v51, 2  ;;  %v1440_v61 = vadd.f32 %v1439_v60, %v1438_v53  ;;  %1762 = vpow2.f32 %v1270_v10 }
 0x1ff   : > { %v1304_v44 = vadd.f32 %v2421_v4, %v2417_v40  ;;  %v1203_v42 = vmax.f32 %v1201_v29, %v1202_v13 }
 0x200   : > { %v1757_v7 = vpop.eup %1756  ;;  %v1507_v46 = vadd.f32 %v1506_v35, %v1505_v51  ;;  %v1441_v21 = vrot.slane %v1440_v61, 4 }
 0x201   : > { %v1385_v12 = vmul.f32 %v1757_v7, %v2355_v24  ;;  %v1386_v16 = vmul.f32 %v1757_v7, %v2358_v8  ;;  %v1305_v25 = vrot.slane %v1304_v44, 4  ;;  %v1226_v17 = vsub.f32 %v2383_v26, %v1203_v42 }
 0x202   : > { %v1508_v49 = vrot.slane %v1507_v46, 1  ;;  %v1442_v20 = vadd.f32 %v1441_v21, %v1440_v61  ;;  %v1227_v58 = vsub.f32 %v2381_v39, %v1203_v42 }
 0x203   : > { %v1412_v0 = vmul.f32 %v1385_v12, %v2168_v52  ;;  %v1413_v54 = vmul.f32 %v1386_v16, %v2178_v56  ;;  %v1306_v22 = vadd.f32 %v1305_v25, %v1304_v44  ;;  %v1272_v31 = vmul.f32 1.442695, %v1226_v17 }
 0x204   : > { %v1509_v37 = vadd.f32 %v1508_v49, %v1507_v46  ;;  %v1443_v55 = vrot.slane %v1442_v20, 2  ;;  %v1274_v62 = vmul.f32 1.442695, %v1227_v58 }
 0x205   : > { %v1492_v24 = vsel %vm822_vm6, %v1412_v0, 0.0  ;;  %v1493_v8 = vsel %vm822_vm6, %v1413_v54, 0.0  ;;  %v1307_v3 = vrot.slane %v1306_v22, 2  ;;  %1764 = vpow2.f32 %v1272_v31 }
 0x206   : > { %v1759_v26 = vpop.eup %1758  ;;  %v1538_v30 = vmul.f32 0.125, %v1509_v37  ;;  %v1444_v38 = vadd.f32 %v1443_v55, %v1442_v20  ;;  %v1494_v39 = vadd.f32 %v1493_v8, %v1492_v24  ;;  %1766 = vpow2.f32 %v1274_v62 }
 0x207   : > { %v2433_v52 = vpop.eup %1760  ;;  %v1376_v56 = vmul.f32 %v1759_v26, %v2385_v33  ;;  %v1377_v19 = vmul.f32 %v1759_v26, %v2392_v57  ;;  %v1308_v2 = vadd.f32 %v1307_v3, %v1306_v22 }
 0x208   : > { %v1763_v5 = vpop.eup %1762  ;;  %1551 = vst.msk [vmem:[%s2364_s19 + $0x9] sm:$0x1] %vm1541_vm2, %v1538_v30  ;;  %v1445_v18 = vrot.slane %v1444_v38, 1  ;;  %v1495_v36 = vrot.slane %v1494_v39, 4 }
 0x209   : > { %v1406_v63 = vmul.f32 %v1376_v56, %v2193_v27  ;;  %v1407_v50 = vmul.f32 %v1377_v19, %v2200_v9  ;;  %v1309_v41 = vrot.slane %v1308_v2, 1  ;;  %v1346_v32 = vadd.f32 %v1763_v5, %v2433_v52 }
 0x20a   : > { %v1446_v59 = vadd.f32 %v1445_v18, %v1444_v38  ;;  %v1496_v11 = vadd.f32 %v1495_v36, %v1494_v39 }
 0x20b   : > { %v1465_v33 = vsel %vm822_vm6, %v1406_v63, 0.0  ;;  %v1466_v57 = vsel %vm822_vm6, %v1407_v50, 0.0  ;;  %v1310_v45 = vadd.f32 %v1309_v41, %v1308_v2  ;;  %v1347_v48 = vrot.slane %v1346_v32, 4 }
 0x20c   : > { %v1531_v28 = vmul.f32 0.125, %v1446_v59  ;;  %v1497_v15 = vrot.slane %v1496_v11, 2  ;;  %v1467_v47 = vadd.f32 %v1466_v57, %v1465_v33  ;;  %v2495_v59 = vld [vmem:[#allocation2_spill] sm:$0xff]  ;;  %v2496_v33 = vld [vmem:[#allocation4_spill] sm:$0xff] }
 0x20d   : > { %1768 = vrcp.f32 %v1310_v45  ;;  %v1348_v6 = vadd.f32 %v1347_v48, %v1346_v32 }
 0x20e   : > { %1544 = vst.msk [vmem:[%s2364_s19 + $0x2] sm:$0x1] %vm1541_vm2, %v1531_v28  ;;  %v1498_v27 = vadd.f32 %v1497_v15, %v1496_v11  ;;  %v1468_v9 = vrot.slane %v1467_v47, 4 }
 0x20f   : > { %v1765_v23 = vpop.eup %1764  ;;  %v1349_v10 = vrot.slane %v1348_v6, 2 }
 0x210   : > { %v1767_v43 = vpop.eup %1766  ;;  %v1499_v34 = vrot.slane %v1498_v27, 1  ;;  %v1469_v29 = vadd.f32 %v1468_v9, %v1467_v47 }
 0x211   : > { %v1350_v51 = vadd.f32 %v1349_v10, %v1348_v6  ;;  %v1353_v53 = vadd.f32 %v1767_v43, %v1765_v23 }
 0x212   : > { %v1500_v60 = vadd.f32 %v1499_v34, %v1498_v27  ;;  %v1470_v13 = vrot.slane %v1469_v29, 2 }
 0x213   : > { %v1351_v35 = vrot.slane %v1350_v51, 1  ;;  %v1354_v61 = vrot.slane %v1353_v53, 4 }
 0x214   : > { %v1537_v44 = vmul.f32 0.125, %v1500_v60  ;;  %v1471_v42 = vadd.f32 %v1470_v13, %v1469_v29 }
 0x215   : > { %v1352_v7 = vadd.f32 %v1351_v35, %v1350_v51  ;;  %v1355_v46 = vadd.f32 %v1354_v61, %v1353_v53 }
 0x216   : > { %1550 = vst.msk [vmem:[%s2364_s19 + $0x8] sm:$0x1] %vm1541_vm2, %v1537_v44  ;;  %v1472_v21 = vrot.slane %v1471_v42, 1 }
 0x217   : > { %v1769_v12 = vpop.eup %1768  ;;  %1770 = vrcp.f32 %v1352_v7  ;;  %v1356_v16 = vrot.slane %v1355_v46, 2 }
 0x218   : > { %v1473_v25 = vadd.f32 %v1472_v21, %v1471_v42  ;;  %v1373_v17 = vmul.f32 %v1769_v12, %v2417_v40  ;;  %v1374_v49 = vmul.f32 %v1769_v12, %v2421_v4 }
 0x219   : > { %v1357_v20 = vadd.f32 %v1356_v16, %v1355_v46 }
 0x21a   : > { %v1534_v58 = vmul.f32 0.125, %v1473_v25  ;;  %v1404_v0 = vmul.f32 %v1373_v17, %v2196_v1  ;;  %v1405_v54 = vmul.f32 %v1374_v49, %v2206_v14  ;;  %v2493_v1 = vld [vmem:[#allocation3_spill] sm:$0xff]  ;;  %v2494_v14 = vld [vmem:[#allocation5_spill] sm:$0xff] }
 0x21b   : > { %v1358_v22 = vrot.slane %v1357_v20, 1 }
 0x21c   : > { %1547 = vst.msk [vmem:[%s2364_s19 + $0x5] sm:$0x1] %vm1541_vm2, %v1534_v58  ;;  %v1456_v31 = vsel %vm822_vm6, %v1404_v0, 0.0  ;;  %v1457_v37 = vsel %vm822_vm6, %v1405_v54, 0.0 }
 0x21d   : > { %v1458_v55 = vadd.f32 %v1457_v37, %v1456_v31  ;;  %v1359_v62 = vadd.f32 %v1358_v22, %v1357_v20 }
 0x21f   : > { %v1459_v24 = vrot.slane %v1458_v55, 4  ;;  %1772 = vrcp.f32 %v1359_v62 }
 0x221   : > { %v1771_v40 = vpop.eup %1770  ;;  %v1460_v8 = vadd.f32 %v1459_v24, %v1458_v55 }
 0x222   : > { %v1391_v4 = vmul.f32 %v1771_v40, %v2433_v52  ;;  %v1392_v3 = vmul.f32 %v1771_v40, %v1763_v5 }
 0x223   : > { %v1461_v26 = vrot.slane %v1460_v8, 2 }
 0x224   : > { %v1416_v30 = vmul.f32 %v1391_v4, %v2493_v1  ;;  %v1417_v38 = vmul.f32 %v1392_v3, %v2494_v14 }
 0x225   : > { %v1462_v39 = vadd.f32 %v1461_v26, %v1460_v8 }
 0x226   : > { %v1510_v56 = vsel %vm822_vm6, %v1416_v30, 0.0  ;;  %v1511_v19 = vsel %vm822_vm6, %v1417_v38, 0.0 }
 0x227   : > { %v1463_v2 = vrot.slane %v1462_v39, 1  ;;  %v1512_v18 = vadd.f32 %v1511_v19, %v1510_v56 }
 0x229   : > { %v1773_v36 = vpop.eup %1772  ;;  %v1464_v63 = vadd.f32 %v1463_v2, %v1462_v39  ;;  %v1513_v50 = vrot.slane %v1512_v18, 4 }
 0x22a   : > { %v1394_v41 = vmul.f32 %v1773_v36, %v1765_v23  ;;  %v1395_v32 = vmul.f32 %v1773_v36, %v1767_v43 }
 0x22b   : > { %v1533_v52 = vmul.f32 0.125, %v1464_v63  ;;  %v1514_v5 = vadd.f32 %v1513_v50, %v1512_v18 }
 0x22c   : > { %v1418_v11 = vmul.f32 %v1394_v41, %v2495_v59  ;;  %v1419_v57 = vmul.f32 %v1395_v32, %v2496_v33 }
 0x22d   : > { %1546 = vst.msk [vmem:[%s2364_s19 + $0x4] sm:$0x1] %vm1541_vm2, %v1533_v52  ;;  %v1515_v45 = vrot.slane %v1514_v5, 2 }
 0x22e   : > { %v1519_v48 = vsel %vm822_vm6, %v1418_v11, 0.0  ;;  %v1520_v28 = vsel %vm822_vm6, %v1419_v57, 0.0 }
 0x22f   : > { %v1516_v15 = vadd.f32 %v1515_v45, %v1514_v5  ;;  %v1521_v47 = vadd.f32 %v1520_v28, %v1519_v48 }
 0x231   : > { %v1517_v6 = vrot.slane %v1516_v15, 1  ;;  %v1522_v27 = vrot.slane %v1521_v47, 4 }
 0x233   : > { %v1518_v9 = vadd.f32 %v1517_v6, %v1516_v15  ;;  %v1523_v23 = vadd.f32 %v1522_v27, %v1521_v47 }
 0x235   : > { %v1539_v10 = vmul.f32 0.125, %v1518_v9  ;;  %v1524_v43 = vrot.slane %v1523_v23, 2 }
 0x237   : > { %1552 = vst.msk [vmem:[%s2364_s19 + $0xa] sm:$0x1] %vm1541_vm2, %v1539_v10  ;;  %v1525_v34 = vadd.f32 %v1524_v43, %v1523_v23 }
 0x239   : > { %v1526_v29 = vrot.slane %v1525_v34, 1 }
 0x23b   : > { %v1527_v51 = vadd.f32 %v1526_v29, %v1525_v34 }
 0x23d   : > { %v1540_v53 = vmul.f32 0.125, %v1527_v51 }
 0x23f   : > { %1553 = vst.msk [vmem:[%s2364_s19 + $0xb] sm:$0x1] %vm1541_vm2, %v1540_v53 }
 0x240 PF: > { %s16_s21 = sadd.s32 1, %s1780_s21  }
 0x241   : > { %p13_p4 = scmp.ge.s32.totalorder %s16_s21, 4  }
 0x243   :  { %15 = sbr.rel (!%p13_p4) target bundleno = 1 (0x1), region = 77 }

// kernel: encoder_forward.11
= control target key start
LH: loop header
LB: loop body
LE: loop exit
PB: predicated region body
PF: predicated region fallthrough
CT: control target
= control target key end

     0   :  { %v247_v0 = vmov 0.0   ;;  %vm248_vm0 = vmmov 0   ;;  %vm48_vm1 = vcmask 261120   ;;  %vm191_vm4 = vcmask 1040384   ;;  %s316_s1 = inlined_call_operand.vmem [shape: bf16[32,32], index: 1, kind: input, shape index: {}]   ;;  %s317_s0 = inlined_call_operand.vmem [shape: f32[8,32], index: 0, kind: input, shape index: {}]   ;;  %s318_s3 = inlined_call_operand.vmem [shape: bf16[32,32], index: 3, kind: input, shape index: {}]   ;;  %s319_s2 = inlined_call_operand.vmem [shape: f32[1,32], index: 2, kind: input, shape index: {}]   ;;  %s320_s4 = inlined_call_operand.vmem [shape: f32[1,32], index: 4, kind: input, shape index: {}]   ;;  %s321_s5 = inlined_call_operand.vmem [shape: f32[8,32], index: 5, kind: output, shape index: {0}]   ;;  %s322_s6 = inlined_call_operand.vmem [shape: f32[1,2,32], index: 6, kind: output, shape index: {1}]  }
   0x1   :  { %217 = vmatprep.subr.bf16.mxu0 %v247_v0  ;;  %v235_v1 = vld [vmem:[%s316_s1] sm:$0xff]   ;;  %221 = vmatprep.mubr.msk.bf16.mxu0 %vm248_vm0, %v247_v0  ;;  %v236_v2 = vld [vmem:[%s316_s1 + $0x8] sm:$0xff]   ;;  %vm193_vm5 = vcmask 254976  }
   0x2   :  { %225 = vmatprep.subr.bf16.mxu1 %v247_v0  ;;  %229 = vmatprep.mubr.msk.bf16.mxu1 %vm248_vm0, %v247_v0  ;;  %v23_v3 = vld [vmem:[%s317_s0] sm:$0xff]  ;;  %v238_v6 = vld [vmem:[%s318_s3 + $0x8] sm:$0xff]  }
   0x3   :  { %218 = vmatpush3.bf16.msra.mxu0 %v235_v1  ;;  %v24_v4 = vpack.c.bf16 %v23_v3, %v23_v3  ;;  %v237_v5 = vld [vmem:[%s318_s3] sm:$0xff]  }
   0x4   :  { %219 = vmatprep.subr.bf16.mxu0 %v247_v0  ;;  %226 = vmatpush3.bf16.msra.mxu1 %v237_v5  ;;  %v203_v7 = vld [vmem:[%s319_s2] ss:$0 sm:$0xff] }
   0x5   :  { %227 = vmatprep.subr.bf16.mxu1 %v247_v0  ;;  %v207_v21 = vld [vmem:[%s320_s4] ss:$0 sm:$0xff] }
   0x7   :  { %220 = vmatpush3.bf16.msra.mxu0 %v236_v2 }
   0x8   :  { %228 = vmatpush3.bf16.msra.mxu1 %v238_v6 }
   0xa   :  { %222 = vmatmul.mubr.msk.bf16.vlgmr.msra.gmra.mrb[0].mxu0 %vm48_vm1, %v24_v4 }
  0xdd   :  { %v86_v8 = vpop.f32.mrb[0].mxu0 }
  0xde   :  { %v87_v9 = vadd.f32 %v203_v7, %v86_v8  ;;  %v223_v10 = vpop.f32.mrb[1].mxu0 }
  0xdf   :  { %v89_v11 = vpop.f32.mrb[2].mxu0 }
  0xe0   :  { %v95_v12 = vmul.f32 1.442695, %v87_v9  ;;  %v224_v13 = vpop.f32.mrb[3].mxu0  ;;  %v93_v14 = vmul.f32 0.5, %v87_v9  ;;  %vm92_vm2 = vcmp.gt.f32.partialorder %v87_v9, 0.0 }
  0xe2   :  { %239 = vpow2.f32 %v95_v12 }
  0xe3   :  { %241 = vtanh.f32 %v93_v14 }
  0xec   :  { %v240_v15 = vpop.eup %239 }
  0xed   :  { %v97_v16 = vadd.f32 1.0, %v240_v15  ;;  %v242_v17 = vpop.eup %241 }
  0xef   :  { %v98_v18 = vmul.f32 %v242_v17, %v97_v16 }
  0xf1   :  { %v99_v19 = vsel %vm92_vm2, %v87_v9, %v98_v18 }
  0xf2   :  { %v100_v20 = vpack.c.bf16 %v99_v19, %v99_v19 }
  0xf4   :  { %230 = vmatmul.mubr.msk.bf16.vlgmr.msra.gmra.mrb[0].mxu1 %vm48_vm1, %v100_v20 }
 0x1c7   :  { %v161_v22 = vpop.f32.mrb[0].mxu1 }
 0x1c8   :  { %v162_v23 = vadd.f32 %v207_v21, %v161_v22  ;;  %v231_v24 = vpop.f32.mrb[1].mxu1 }
 0x1c9   :  { %v164_v25 = vpop.f32.mrb[2].mxu1 }
 0x1ca   :  { %v170_v26 = vmul.f32 1.442695, %v162_v23  ;;  %v232_v27 = vpop.f32.mrb[3].mxu1  ;;  %v168_v28 = vmul.f32 0.5, %v162_v23  ;;  %vm167_vm3 = vcmp.gt.f32.partialorder %v162_v23, 0.0 }
 0x1cc   :  { %243 = vpow2.f32 %v170_v26 }
 0x1cd   :  { %245 = vtanh.f32 %v168_v28 }
 0x1d6   :  { %v244_v29 = vpop.eup %243 }
 0x1d7   :  { %v172_v30 = vadd.f32 1.0, %v244_v29  ;;  %v246_v31 = vpop.eup %245 }
 0x1d9   :  { %v173_v32 = vmul.f32 %v246_v31, %v172_v30 }
 0x1db   :  { %v174_v33 = vsel %vm167_vm3, %v162_v23, %v173_v32 }
 0x1dc   :  { %175 = vst.msk [vmem:[%s321_s5] sm:$0xff] %vm48_vm1, %v174_v33  ;;  %v176_v34 = vsel %vm48_vm1, %v174_v33, 0.0  ;;  %v183_v35 = vmul.f32 %v174_v33, %v174_v33 }
 0x1dd   :  { %v177_v36 = vrot.slane %v176_v34, 4 }
 0x1de   :  { %v184_v37 = vsel %vm48_vm1, %v183_v35, 0.0 }
 0x1df   :  { %v178_v38 = vadd.f32 %v177_v36, %v176_v34  ;;  %v185_v39 = vrot.slane %v184_v37, 4 }
 0x1e1   :  { %v179_v40 = vrot.slane %v178_v38, 2  ;;  %v186_v41 = vadd.f32 %v185_v39, %v184_v37 }
 0x1e3   :  { %v180_v42 = vadd.f32 %v179_v40, %v178_v38  ;;  %v187_v43 = vrot.slane %v186_v41, 2 }
 0x1e5   :  { %v181_v44 = vrot.slane %v180_v42, 1  ;;  %v188_v45 = vadd.f32 %v187_v43, %v186_v41 }
 0x1e7   :  { %v189_v46 = vrot.slane %v188_v45, 1  ;;  %v182_v47 = vadd.f32 %v181_v44, %v180_v42 }
 0x1e9   :  { %v190_v48 = vadd.f32 %v189_v46, %v188_v45 }
 0x1eb   :  { %v192_v49 = vsel %vm191_vm4, %v182_v47, %v190_v48 }
 0x1ec   :  { %194 = vst.msk [vmem:[%s322_s6] sm:$0x3] %vm193_vm5, %v192_v49 }

// kernel: encoder_forward.13
= control target key start
LH: loop header
LB: loop body
LE: loop exit
PB: predicated region body
PF: predicated region fallthrough
CT: control target
= control target key end

     0   :  { %vm69_vm0 = vcmask 261120   ;;  %vm124_vm1 = vcmask 64512   ;;  %s216_s3 = inlined_call_operand.vmem [shape: bf16[32,8], index: 3, kind: input, shape index: {}]   ;;  %s217_s0 = inlined_call_operand.vmem [shape: f32[24,32], index: 0, kind: input, shape index: {}]   ;;  %s218_s1 = inlined_call_operand.vmem [shape: f32[1,32], index: 1, kind: input, shape index: {}]   ;;  %s219_s2 = inlined_call_operand.vmem [shape: f32[1,32], index: 2, kind: input, shape index: {}]   ;;  %s220_s4 = inlined_call_operand.vmem [shape: f32[1,8], index: 4, kind: input, shape index: {}]   ;;  %s221_s5 = inlined_call_operand.vmem [shape: f32[24,8], index: 5, kind: output, shape index: {}]  }
   0x1   :  { %v151_v0 = vld [vmem:[%s216_s3] sm:$0xff]   ;;  %v152_v1 = vld [vmem:[%s216_s3 + $0x8] sm:$0xff]   ;;  %v23_v8 = vld [vmem:[%s217_s0 + $0x10] sm:$0xff] }
   0x2   :  { %143 = vmatprep.subr.bf16.mxu0 %v151_v0  ;;  %v21_v2 = vld [vmem:[%s217_s0] sm:$0xff]  ;;  %v22_v3 = vld [vmem:[%s217_s0 + $0x8] sm:$0xff] }
   0x3   :  { %v132_v4 = vld [vmem:[%s218_s1] ss:$0 sm:$0xff]  ;;  %144 = vmatpush3.bf16.msra.mxu0 %v151_v0 }
   0x4   :  { %v31_v5 = vmul.f32 %v132_v4, %v21_v2  ;;  %v32_v6 = vmul.f32 %v132_v4, %v22_v3  ;;  %v133_v7 = vld [vmem:[%s219_s2] ss:$0 sm:$0xff]  ;;  %145 = vmatprep.subr.bf16.mxu0 %v152_v1  ;;  %v33_v9 = vmul.f32 %v132_v4, %v23_v8 }
   0x5   :  { %v134_v15 = vld [vmem:[%s220_s4] ss:$0 sm:$0xff] }
   0x6   :  { %v41_v10 = vadd.f32 %v133_v7, %v31_v5  ;;  %v42_v11 = vadd.f32 %v133_v7, %v32_v6  ;;  %v43_v12 = vadd.f32 %v133_v7, %v33_v9 }
   0x7   :  { %146 = vmatpush3.bf16.msra.mxu0 %v152_v1 }
   0x8   :  { %v44_v13 = vpack.c.bf16 %v42_v11, %v41_v10  ;;  %v45_v14 = vpack.c.bf16 %v43_v12, %v43_v12 }
   0xa   :  { %147 = vmatprep.mubr.msk.bf16.mxu0 %vm69_vm0, %v44_v13 }
   0xb   :  { %148 = vmatmul.mubr.msk.bf16.vlgmr.msra.gmra.mrb[0].mxu0 %vm69_vm0, %v45_v14 }
  0xde   :  { %v149_v16 = vpop.f32.mrb[0].mxu0 }
  0xdf   :  { %v119_v17 = vadd.f32 %v149_v16, %v134_v15  ;;  %v110_v18 = vpop.f32.mrb[1].mxu0 }
  0xe0   :  { %v111_v19 = vadd.f32 %v134_v15, %v110_v18  ;;  %v150_v20 = vpop.f32.mrb[2].mxu0 }
  0xe1   :  { %127 = vst.msk [vmem:[%s221_s5 + $0x10] sm:$0xff] %vm124_vm1, %v119_v17  ;;  %v113_v21 = vpop.f32.mrb[3].mxu0 }
  0xe2   :  { %125 = vst.msk [vmem:[%s221_s5] sm:$0xff] %vm124_vm1, %v111_v19  ;;  %v114_v22 = vadd.f32 %v134_v15, %v113_v21 }
  0xe4   :  { %126 = vst.msk [vmem:[%s221_s5 + $0x8] sm:$0xff] %vm124_vm1, %v114_v22 }

// kernel: encoder_forward.12
= control target key start
LH: loop header
LB: loop body
LE: loop exit
PB: predicated region body
PF: predicated region fallthrough
CT: control target
= control target key end

     0   :  { %vm83_vm0 = vcmask 785408   ;;  %vm187_vm4 = vcmask 261120   ;;  %vm294_vm8 = vcmask 1040384   ;;  %vm296_vm9 = vcmask 254976   ;;  %s487_s1 = inlined_call_operand.vmem [shape: bf16[96,32], index: 1, kind: input, shape index: {}]   ;;  %s488_s0 = inlined_call_operand.vmem [shape: f32[24,96], index: 0, kind: input, shape index: {}]   ;;  %s489_s3 = inlined_call_operand.vmem [shape: bf16[32,32], index: 3, kind: input, shape index: {}]   ;;  %s490_s2 = inlined_call_operand.vmem [shape: f32[1,32], index: 2, kind: input, shape index: {}]   ;;  %s491_s4 = inlined_call_operand.vmem [shape: f32[1,32], index: 4, kind: input, shape index: {}]   ;;  %s492_s5 = inlined_call_operand.vmem [shape: f32[24,32], index: 5, kind: output, shape index: {0}]   ;;  %s493_s6 = inlined_call_operand.vmem [shape: f32[1,2,32], index: 6, kind: output, shape index: {1}]  }
   0x1   :  { %v356_v0 = vld [vmem:[%s487_s1] sm:$0xff]   ;;  %v357_v1 = vld [vmem:[%s487_s1 + $0x8] sm:$0xff]   ;;  %v358_v2 = vld [vmem:[%s487_s1 + $0x10] sm:$0xff]  }
   0x2   :  { %332 = vmatprep.subr.bf16.mxu0 %v356_v0  ;;  %v23_v3 = vld [vmem:[%s488_s0] sm:$0xff]  ;;  %v24_v4 = vld [vmem:[%s488_s0 + $0x8] sm:$0xff]  ;;  %v359_v6 = vld [vmem:[%s487_s1 + $0x18] sm:$0xff]  }
   0x3   :  { %333 = vmatpush3.bf16.msra.mxu0 %v356_v0  ;;  %v26_v5 = vpack.c.bf16 %v24_v4, %v23_v3  ;;  %v360_v7 = vld [vmem:[%s487_s1 + $0x20] sm:$0xff]   ;;  %v361_v8 = vld [vmem:[%s487_s1 + $0x28] sm:$0xff]   ;;  %v25_v9 = vld [vmem:[%s488_s0 + $0x10] sm:$0xff] }
   0x4   :  { %334 = vmatprep.subr.bf16.mxu0 %v357_v1  ;;  %v27_v10 = vpack.c.bf16 %v25_v9, %v25_v9  ;;  %v362_v11 = vld [vmem:[%s489_s3] sm:$0xff]   ;;  %v363_v12 = vld [vmem:[%s489_s3 + $0x8] sm:$0xff]  }
   0x5   :  { %344 = vmatprep.mubr.msk.bf16.mxu0 %vm83_vm0, %v26_v5  ;;  %348 = vmatprep.subr.bf16.mxu1 %v362_v11  ;;  %v306_v13 = vld [vmem:[%s490_s2] ss:$0 sm:$0xff] }
   0x6   :  { %349 = vmatpush3.bf16.msra.mxu1 %v362_v11  ;;  %v315_v44 = vld [vmem:[%s491_s4] ss:$0 sm:$0xff] }
   0x7   :  { %335 = vmatpush3.bf16.msra.mxu0 %v357_v1  ;;  %350 = vmatprep.subr.bf16.mxu1 %v363_v12 }
   0x8   :  { %336 = vmatprep.subr.bf16.mxu0 %v358_v2 }
   0xa   :  { %351 = vmatpush3.bf16.msra.mxu1 %v363_v12 }
   0xb   :  { %337 = vmatpush3.bf16.msra.mxu0 %v358_v2 }
   0xc   :  { %338 = vmatprep.subr.bf16.mxu0 %v359_v6 }
   0xf   :  { %339 = vmatpush3.bf16.msra.mxu0 %v359_v6 }
  0x10   :  { %340 = vmatprep.subr.bf16.mxu0 %v360_v7 }
  0x13   :  { %341 = vmatpush3.bf16.msra.mxu0 %v360_v7 }
  0x14   :  { %342 = vmatprep.subr.bf16.mxu0 %v361_v8 }
  0x17   :  { %343 = vmatpush3.bf16.msra.mxu0 %v361_v8 }
  0x1a   :  { %345 = vmatmul.mubr.msk.bf16.vlgmr.msra.gmra.mrb[0].mxu0 %vm83_vm0, %v27_v10 }
  0xed   :  { %v346_v14 = vpop.f32.mrb[0].mxu0 }
  0xee   :  { %v133_v15 = vadd.f32 %v346_v14, %v306_v13  ;;  %v124_v16 = vpop.f32.mrb[1].mxu0 }
  0xef   :  { %v125_v17 = vadd.f32 %v306_v13, %v124_v16  ;;  %v347_v18 = vpop.f32.mrb[2].mxu0 }
  0xf0   :  { %v143_v19 = vmul.f32 0.5, %v133_v15  ;;  %v151_v20 = vmul.f32 1.442695, %v133_v15  ;;  %v127_v21 = vpop.f32.mrb[3].mxu0  ;;  %vm140_vm1 = vcmp.gt.f32.partialorder %v133_v15, 0.0 }
  0xf1   :  { %v147_v22 = vmul.f32 1.442695, %v125_v17  ;;  %v128_v23 = vadd.f32 %v306_v13, %v127_v21  ;;  %v141_v24 = vmul.f32 0.5, %v125_v17  ;;  %vm138_vm2 = vcmp.gt.f32.partialorder %v125_v17, 0.0 }
  0xf2   :  { %364 = vpow2.f32 %v151_v20 }
  0xf3   :  { %v149_v25 = vmul.f32 1.442695, %v128_v23  ;;  %366 = vtanh.f32 %v143_v19  ;;  %v142_v26 = vmul.f32 0.5, %v128_v23  ;;  %vm139_vm3 = vcmp.gt.f32.partialorder %v128_v23, 0.0 }
  0xf4   :  { %368 = vpow2.f32 %v147_v22 }
  0xf5   :  { %370 = vtanh.f32 %v141_v24 }
  0xf6   :  { %372 = vpow2.f32 %v149_v25 }
  0xf7   :  { %374 = vtanh.f32 %v142_v26 }
  0xfc   :  { %v365_v27 = vpop.eup %364 }
  0xfd   :  { %v367_v28 = vpop.eup %366  ;;  %v155_v29 = vadd.f32 1.0, %v365_v27 }
  0xfe   :  { %v369_v30 = vpop.eup %368 }
  0xff   :  { %v371_v31 = vpop.eup %370  ;;  %v153_v32 = vadd.f32 1.0, %v369_v30  ;;  %v158_v34 = vmul.f32 %v367_v28, %v155_v29 }
 0x100   :  { %v373_v33 = vpop.eup %372 }
 0x101   :  { %v154_v35 = vadd.f32 1.0, %v373_v33  ;;  %v156_v36 = vmul.f32 %v371_v31, %v153_v32  ;;  %v375_v37 = vpop.eup %374  ;;  %v161_v39 = vsel %vm140_vm1, %v133_v15, %v158_v34 }
 0x102   :  { %v163_v43 = vpack.c.bf16 %v161_v39, %v161_v39 }
 0x103   :  { %v157_v38 = vmul.f32 %v375_v37, %v154_v35  ;;  %v159_v40 = vsel %vm138_vm2, %v125_v17, %v156_v36 }
 0x105   :  { %v160_v41 = vsel %vm139_vm3, %v128_v23, %v157_v38 }
 0x106   :  { %v162_v42 = vpack.c.bf16 %v160_v41, %v159_v40 }
 0x108   :  { %352 = vmatprep.mubr.msk.bf16.mxu1 %vm187_vm4, %v162_v42 }
 0x109   :  { %353 = vmatmul.mubr.msk.bf16.vlgmr.msra.gmra.mrb[0].mxu1 %vm187_vm4, %v163_v43 }
 0x1dc   :  { %v354_v45 = vpop.f32.mrb[0].mxu1 }
 0x1dd   :  { %v237_v46 = vadd.f32 %v354_v45, %v315_v44  ;;  %v228_v47 = vpop.f32.mrb[1].mxu1 }
 0x1de   :  { %v229_v48 = vadd.f32 %v315_v44, %v228_v47  ;;  %v355_v49 = vpop.f32.mrb[2].mxu1 }
 0x1df   :  { %v247_v50 = vmul.f32 0.5, %v237_v46  ;;  %v255_v51 = vmul.f32 1.442695, %v237_v46  ;;  %v231_v52 = vpop.f32.mrb[3].mxu1  ;;  %vm244_vm5 = vcmp.gt.f32.partialorder %v237_v46, 0.0 }
 0x1e0   :  { %v251_v53 = vmul.f32 1.442695, %v229_v48  ;;  %v232_v54 = vadd.f32 %v315_v44, %v231_v52  ;;  %v245_v55 = vmul.f32 0.5, %v229_v48  ;;  %vm242_vm6 = vcmp.gt.f32.partialorder %v229_v48, 0.0 }
 0x1e1   :  { %376 = vpow2.f32 %v255_v51 }
 0x1e2   :  { %v253_v56 = vmul.f32 1.442695, %v232_v54  ;;  %378 = vtanh.f32 %v247_v50  ;;  %v246_v57 = vmul.f32 0.5, %v232_v54  ;;  %vm243_vm7 = vcmp.gt.f32.partialorder %v232_v54, 0.0 }
 0x1e3   :  { %380 = vpow2.f32 %v251_v53 }
 0x1e4   :  { %382 = vtanh.f32 %v245_v55 }
 0x1e5   :  { %384 = vpow2.f32 %v253_v56 }
 0x1e6   :  { %386 = vtanh.f32 %v246_v57 }
 0x1eb   :  { %v377_v58 = vpop.eup %376 }
 0x1ec   :  { %v379_v59 = vpop.eup %378  ;;  %v259_v60 = vadd.f32 1.0, %v377_v58 }
 0x1ed   :  { %v381_v61 = vpop.eup %380 }
 0x1ee   :  { %v383_v62 = vpop.eup %382  ;;  %v262_v63 = vmul.f32 %v379_v59, %v259_v60  ;;  %v257_v0 = vadd.f32 1.0, %v381_v61 }
 0x1ef   :  { %v385_v1 = vpop.eup %384 }
 0x1f0   :  { %v265_v2 = vsel %vm244_vm5, %v237_v46, %v262_v63  ;;  %v260_v3 = vmul.f32 %v383_v62, %v257_v0  ;;  %v258_v4 = vadd.f32 1.0, %v385_v1  ;;  %v387_v5 = vpop.eup %386 }
 0x1f1   :  { %268 = vst.msk [vmem:[%s492_s5 + $0x10] sm:$0xff] %vm187_vm4, %v265_v2  ;;  %v282_v10 = vmul.f32 %v265_v2, %v265_v2  ;;  %v272_v15 = vsel %vm187_vm4, %v265_v2, 0.0 }
 0x1f2   :  { %v263_v6 = vsel %vm242_vm6, %v229_v48, %v260_v3  ;;  %v261_v7 = vmul.f32 %v387_v5, %v258_v4 }
 0x1f3   :  { %266 = vst.msk [vmem:[%s492_s5] sm:$0xff] %vm187_vm4, %v263_v6  ;;  %v280_v8 = vmul.f32 %v263_v6, %v263_v6  ;;  %v269_v11 = vsel %vm187_vm4, %v263_v6, 0.0  ;;  %v286_v20 = vsel %vm187_vm4, %v282_v10, 0.0 }
 0x1f4   :  { %v264_v9 = vsel %vm243_vm7, %v232_v54, %v261_v7 }
 0x1f5   :  { %267 = vst.msk [vmem:[%s492_s5 + $0x8] sm:$0xff] %vm187_vm4, %v264_v9  ;;  %v270_v12 = vsel %vm187_vm4, %v264_v9, 0.0  ;;  %v281_v13 = vmul.f32 %v264_v9, %v264_v9  ;;  %v283_v16 = vsel %vm187_vm4, %v280_v8, 0.0 }
 0x1f6   :  { %v271_v14 = vadd.f32 %v270_v12, %v269_v11 }
 0x1f7   :  { %v284_v17 = vsel %vm187_vm4, %v281_v13, 0.0 }
 0x1f8   :  { %v273_v18 = vadd.f32 %v272_v15, %v271_v14  ;;  %v285_v19 = vadd.f32 %v284_v17, %v283_v16 }
 0x1fa   :  { %v274_v21 = vrot.slane %v273_v18, 4  ;;  %v287_v22 = vadd.f32 %v286_v20, %v285_v19 }
 0x1fc   :  { %v275_v23 = vadd.f32 %v274_v21, %v273_v18  ;;  %v288_v24 = vrot.slane %v287_v22, 4 }
 0x1fe   :  { %v276_v25 = vrot.slane %v275_v23, 2  ;;  %v289_v26 = vadd.f32 %v288_v24, %v287_v22 }
 0x200   :  { %v277_v27 = vadd.f32 %v276_v25, %v275_v23  ;;  %v290_v28 = vrot.slane %v289_v26, 2 }
 0x202   :  { %v278_v29 = vrot.slane %v277_v27, 1  ;;  %v291_v30 = vadd.f32 %v290_v28, %v289_v26 }
 0x204   :  { %v292_v31 = vrot.slane %v291_v30, 1  ;;  %v279_v32 = vadd.f32 %v278_v29, %v277_v27 }
 0x206   :  { %v293_v33 = vadd.f32 %v292_v31, %v291_v30 }
 0x208   :  { %v295_v34 = vsel %vm294_vm8, %v279_v32, %v293_v33 }
 0x209   :  { %297 = vst.msk [vmem:[%s493_s6] sm:$0x3] %vm296_vm9, %v295_v34 }

</bundles_post_ra>
